<compile_context>
chip_gen: v5e
topology: v5e:2x2
jax: 0.10.0
libtpu: 0.0.40
codegen_flags: <defaults>
</compile_context>

<pallas_src>
import functools

import jax
import jax.numpy as jnp
from jax.experimental import pallas as pl
from jax.experimental.pallas import tpu as pltpu

_EPS = 1e-5


def _round_up(x, m):
    return ((x + m - 1) // m) * m


# ----------------------------------------------------------------------------
# Fused conv + folded-BN + (residual) + (ReLU) kernel
# ----------------------------------------------------------------------------
def _conv_kernel(*refs, taps, mout, apply_relu, has_residual):
    """Sum-of-taps convolution for one image x one Cout tile.

    x_ref    : (1, P, Mv, Cin_p)  flattened (phase-split) padded image, bf16
    w_ref    : (k*k, Cin_p, tn)   tap-major weights (BN scale folded in), bf16
    shift_ref: (1, tn)            folded BN shift, f32
    res_ref  : (1, Mout, tn)      optional residual in the flat output layout
    o_ref    : (1, Mout, tn)      output, bf16
    acc_ref  : (Mout, tn)         f32 VMEM accumulator
    """
    if has_residual:
        x_ref, w_ref, shift_ref, res_ref, o_ref, acc_ref = refs
    else:
        x_ref, w_ref, shift_ref, o_ref, acc_ref = refs
        res_ref = None

    for t, (ph, off) in enumerate(taps):
        a = x_ref[0, ph, pl.ds(off, mout), :]          # (Mout, Cin_p) bf16
        prod = jnp.dot(a, w_ref[t], preferred_element_type=jnp.float32)
        if t == 0:
            acc_ref[...] = prod
        else:
            acc_ref[...] += prod

    out = acc_ref[...] + shift_ref[...]
    if res_ref is not None:
        out = out + res_ref[0].astype(jnp.float32)
    if apply_relu:
        out = jnp.maximum(out, 0.0)
    o_ref[0] = out.astype(o_ref.dtype)


# ----------------------------------------------------------------------------
# Plain-JAX layout glue (cheap, no data duplication)
# ----------------------------------------------------------------------------
def _conv_view(x, ksize, stride, pad):
    """Build the flat, phase-split view of a NHWC activation for the kernel.

    x: (N, H, W, Cp) bf16, Cp a multiple of 128.
    Returns (xv, taps, (Ho, Wo, Wv, Mout)) where
      xv   : (N, P, Mv, Cp) bf16
      taps : list of (phase_index, flat_row_offset), one per (ki, kj)
      Wv   : width of the flat output view (valid cols [0, Wo), rest garbage)
    """
    n, h, w, cp = x.shape
    ho = (h + 2 * pad - ksize) // stride + 1
    wo = (w + 2 * pad - ksize) // stride + 1
    ext = (ksize - 1) // stride
    hph, wph = ho + ext, wo + ext            # per-phase extents
    hp_need, wp_need = stride * hph, stride * wph

    xp = jnp.pad(x, ((0, 0),
                     (pad, max(hp_need - h - pad, 0)),
                     (pad, max(wp_need - w - pad, 0)),
                     (0, 0)))

    phase_ids = {}
    taps = []
    for ki in range(ksize):
        for kj in range(ksize):
            key = (ki % stride, kj % stride)
            if key not in phase_ids:
                phase_ids[key] = len(phase_ids)
            taps.append((phase_ids[key], (ki // stride) * wph + (kj // stride)))

    mout = _round_up(ho * wph, 8)
    max_off = max(off for _, off in taps)
    mv = _round_up(max_off + mout, 8)

    views = []
    for (pi, pj), _ in sorted(phase_ids.items(), key=lambda kv: kv[1]):
        ph = xp[:, pi::stride, pj::stride, :][:, :hph, :wph, :]
        flat = ph.reshape(n, hph * wph, cp)
        flat = jnp.pad(flat, ((0, 0), (0, mv - hph * wph), (0, 0)))
        views.append(flat)
    xv = jnp.stack(views, axis=1)            # (N, P, Mv, Cp)
    return xv, taps, (ho, wo, wph, mout)


def fold_bn(bn):
    scale = bn["gamma"] / jnp.sqrt(bn["var"] + _EPS)
    shift = bn["beta"] - bn["mean"] * scale
    return scale, shift


def conv_bn(x, w, bn, stride, relu, ksize, pad, residual=None):
    """x: (N,H,W,Cin_p) bf16 NHWC (channels padded to 128) -> (N,Ho,Wo,Cout_p)."""
    n, _, _, cin_p = x.shape
    cout, cin = w.shape[0], w.shape[1]
    cout_p = _round_up(cout, 128)
    tn = 256 if cout_p % 256 == 0 else 128   # 256-wide N tiles for the 256x256 MXU

    xv, taps, (ho, wo, wv, mout) = _conv_view(x, ksize, stride, pad)
    p, mv = xv.shape[1], xv.shape[2]

    # Fold the BN scale into the weight columns; epilogue only adds `shift`.
    scale, shift = fold_bn(bn)
    wt = jnp.transpose(w, (2, 3, 1, 0)).reshape(ksize * ksize, cin, cout)
    wt = (wt * scale[None, None, :])
    wt = jnp.pad(wt, ((0, 0), (0, cin_p - cin), (0, cout_p - cout)))
    wt = wt.astype(jnp.bfloat16)
    shift_p = jnp.pad(shift, (0, cout_p - cout)).reshape(1, cout_p)
    shift_p = shift_p.astype(jnp.float32)

    inputs = [xv, wt, shift_p]
    in_specs = [
        pl.BlockSpec((1, p, mv, cin_p), lambda i, j: (i, 0, 0, 0)),
        pl.BlockSpec((ksize * ksize, cin_p, tn), lambda i, j: (0, 0, j)),
        pl.BlockSpec((1, tn), lambda i, j: (0, j)),
    ]
    has_residual = residual is not None
    if has_residual:
        # Align the (N, Ho, Wo, Cout_p) shortcut with the flat (Ho, Wv) view.
        res = jnp.pad(residual, ((0, 0), (0, 0), (0, wv - wo), (0, 0)))
        res = res.reshape(n, ho * wv, cout_p)
        res = jnp.pad(res, ((0, 0), (0, mout - ho * wv), (0, 0)))
        inputs.append(res.astype(jnp.bfloat16))
        in_specs.append(pl.BlockSpec((1, mout, tn), lambda i, j: (i, 0, j)))

    # VMEM budget from the actual double-buffered block footprint (+ margin).
    blk_bytes = (p * mv * cin_p * 2
                 + ksize * ksize * cin_p * tn * 2
                 + tn * 4
                 + mout * tn * 2 * (2 if has_residual else 1))
    vmem_limit = int(min(max(2 * blk_bytes + mout * tn * 4 + (4 << 20),
                             16 << 20), 48 << 20))

    kernel = functools.partial(_conv_kernel, taps=taps, mout=mout,
                               apply_relu=relu, has_residual=has_residual)
    out = pl.pallas_call(
        kernel,
        out_shape=jax.ShapeDtypeStruct((n, mout, cout_p), jnp.bfloat16),
        grid=(n, cout_p // tn),
        in_specs=in_specs,
        out_specs=pl.BlockSpec((1, mout, tn), lambda i, j: (i, 0, j)),
        scratch_shapes=[pltpu.VMEM((mout, tn), jnp.float32)],
        compiler_params=pltpu.CompilerParams(
            dimension_semantics=("parallel", "parallel"),
            vmem_limit_bytes=vmem_limit,
        ),
    )(*inputs)

    # Drop padded rows / garbage columns; keep channels persistently padded.
    out = out[:, :ho * wv, :].reshape(n, ho, wv, cout_p)[:, :, :wo, :]
    return out


# ----------------------------------------------------------------------------
# Fused global-average-pool + FC head
# ----------------------------------------------------------------------------
def _pool_fc_kernel(x_ref, w_ref, b_ref, o_ref):
    pooled = jnp.mean(x_ref[...].astype(jnp.float32), axis=1)     # (N, Cp)
    o_ref[...] = (jnp.dot(pooled, w_ref[...],
                          preferred_element_type=jnp.float32) + b_ref[...])


def pool_fc(x, fc_w, fc_b):
    n, h, w, cp = x.shape
    ncls, feat = fc_w.shape
    ncls_p = _round_up(ncls, 128)
    wp = jnp.pad(fc_w.T, ((0, cp - feat), (0, ncls_p - ncls))).astype(jnp.float32)
    bp = jnp.pad(fc_b, (0, ncls_p - ncls)).reshape(1, ncls_p).astype(jnp.float32)
    xf = x.reshape(n, h * w, cp)
    out = pl.pallas_call(
        _pool_fc_kernel,
        out_shape=jax.ShapeDtypeStruct((n, ncls_p), jnp.float32),
    )(xf, wp, bp)
    return out[:, :ncls]


# ----------------------------------------------------------------------------
# Parameter initialization (deterministic, synthetic)
# ----------------------------------------------------------------------------
def init_conv(key, cin, cout, k):
    fan_in = cin * k * k
    return jax.random.normal(key, (cout, cin, k, k), jnp.float32) * (2.0 / fan_in) ** 0.5


def init_bn(key, c):
    k1, k2, k3, k4 = jax.random.split(key, 4)
    return {
        "gamma": 1.0 + 0.1 * jax.random.normal(k1, (c,), jnp.float32),
        "beta": 0.1 * jax.random.normal(k2, (c,), jnp.float32),
        "mean": 0.1 * jax.random.normal(k3, (c,), jnp.float32),
        "var": jnp.abs(jax.random.normal(k4, (c,), jnp.float32)) + 0.5,
    }


def init_block(key, cin, cout, stride):
    ks = jax.random.split(key, 6)
    p = {
        "w1": init_conv(ks[0], cin, cout, 3),
        "bn1": init_bn(ks[1], cout),
        "w2": init_conv(ks[2], cout, cout, 3),
        "bn2": init_bn(ks[3], cout),
        "stride": stride,
        "proj": (stride != 1) or (cin != cout),
    }
    if p["proj"]:
        p["ws"] = init_conv(ks[4], cin, cout, 1)
        p["bns"] = init_bn(ks[5], cout)
    return p


def init_wrn(key, num_layers, widen_factor, num_classes=10):
    ks = jax.random.split(key, 8)
    params = {"conv1": init_conv(ks[0], 3, 16, 3), "bn1": init_bn(ks[1], 16)}

    def make_layer(lkey, cin, cout, stride):
        bkeys = jax.random.split(lkey, num_layers)
        blocks = []
        for i in range(num_layers):
            if i == 0:
                blocks.append(init_block(bkeys[i], cin, cout, stride))
            else:
                blocks.append(init_block(bkeys[i], cout, cout, 1))
        return blocks

    params["layer1"] = make_layer(ks[2], 16, 16 * widen_factor, 1)
    params["layer2"] = make_layer(ks[3], 16 * widen_factor, 32 * widen_factor, 2)
    params["layer3"] = make_layer(ks[4], 32 * widen_factor, 64 * widen_factor, 2)
    params["fc_w"] = 0.05 * jax.random.normal(
        ks[5], (num_classes, 64 * widen_factor), jnp.float32)
    params["fc_b"] = 0.01 * jax.random.normal(ks[6], (num_classes,), jnp.float32)
    return params


# ----------------------------------------------------------------------------
# Forward pass
# ----------------------------------------------------------------------------
def basic_block(x, p):
    out = conv_bn(x, p["w1"], p["bn1"], p["stride"], True, 3, 1)
    if p["proj"]:
        sc = conv_bn(x, p["ws"], p["bns"], p["stride"], False, 1, 0)
    else:
        sc = x
    # Residual add + final ReLU fused into the second conv's epilogue.
    return conv_bn(out, p["w2"], p["bn2"], 1, True, 3, 1, residual=sc)


def wide_resnet_forward(params, x_nchw):
    x = jnp.transpose(x_nchw, (0, 2, 3, 1)).astype(jnp.bfloat16)  # NCHW -> NHWC
    cin_p = _round_up(x.shape[-1], 128)
    x = jnp.pad(x, ((0, 0), (0, 0), (0, 0), (0, cin_p - x.shape[-1])))
    x = conv_bn(x, params["conv1"], params["bn1"], 1, True, 3, 1)
    for blk in params["layer1"]:
        x = basic_block(x, blk)
    for blk in params["layer2"]:
        x = basic_block(x, blk)
    for blk in params["layer3"]:
        x = basic_block(x, blk)
    logits = pool_fc(x, params["fc_w"], params["fc_b"])  # (N, num_classes) f32
    return (logits,)


if __name__ == "__main__":
    key = jax.random.PRNGKey(0)
    pkey, xkey = jax.random.split(key)
    # small WRN: num_layers=1 per stage, widen_factor=2, 10 classes
    params = init_wrn(pkey, num_layers=1, widen_factor=2, num_classes=10)
    x = jax.random.normal(xkey, (2, 3, 16, 16), jnp.float32)  # NCHW, like PyTorch
    (logits,) = wide_resnet_forward(params, x)
    jax.block_until_ready(logits)
    assert logits.shape == (2, 10) and logits.dtype == jnp.float32
    print("KERNEL_OK")
</pallas_src>

<mosaic_0001>
module attributes {stable_mosaic.version = 11 : i64} {
  func.func @_conv_kernel(%arg0: i32, %arg1: i32, %arg2: memref<1x1x328x128xbf16, #tpu.memory_space<vmem>>, %arg3: memref<9x128x128xbf16, #tpu.memory_space<vmem>>, %arg4: memref<1x128xf32, #tpu.memory_space<vmem>>, %arg5: memref<1x288x128xbf16, #tpu.memory_space<vmem>>, %arg6: memref<288x128xf32, #tpu.memory_space<vmem>>) attributes {dimension_semantics = [#tpu.dimension_semantics<parallel>, #tpu.dimension_semantics<parallel>], iteration_bounds = array<i64: 2, 1>, scalar_prefetch = 0 : i64, scratch_operands = 1 : i64, tpu.core_type = #tpu.core_type<tc>, window_params = [{transform_indices = @transform_0, window_bounds = array<i64: 1, 1, 328, 128>}, {transform_indices = @transform_1, window_bounds = array<i64: 9, 128, 128>}, {transform_indices = @transform_2, window_bounds = array<i64: 1, 128>}, {transform_indices = @transform_3, window_bounds = array<i64: 1, 288, 128>}]} {
    %c0 = arith.constant 0 : index
    %c0_0 = arith.constant 0 : index
    %c0_1 = arith.constant 0 : index
    %c0_2 = arith.constant 0 : index
    %0 = vector.load %arg2[%c0, %c0_0, %c0_1, %c0_2] : memref<1x1x328x128xbf16, #tpu.memory_space<vmem>>, vector<1x1x288x128xbf16>
    %1 = vector.shape_cast %0 : vector<1x1x288x128xbf16> to vector<288x128xbf16>
    %c0_3 = arith.constant 0 : index
    %c0_4 = arith.constant 0 : index
    %c0_5 = arith.constant 0 : index
    %2 = vector.load %arg3[%c0_3, %c0_4, %c0_5] : memref<9x128x128xbf16, #tpu.memory_space<vmem>>, vector<1x128x128xbf16>
    %3 = vector.shape_cast %2 : vector<1x128x128xbf16> to vector<128x128xbf16>
    %cst = arith.constant dense<0.000000e+00> : vector<288x128xf32>
    %4 = tpu.matmul %1, %3, %cst {dimension_numbers = #tpu.dot_dimension_numbers<[1], [0], [0], [1], [0, 0, 1, 1], [], []>} : vector<288x128xbf16>, vector<128x128xbf16>, vector<288x128xf32> -> vector<288x128xf32>
    %c0_6 = arith.constant 0 : index
    %c0_7 = arith.constant 0 : index
    %5 = vector.load %arg6[%c0_6, %c0_7] : memref<288x128xf32, #tpu.memory_space<vmem>>, vector<288x128xf32>
    tpu.vector_store %arg6[%c0_6, %c0_7], %4 {strides = array<i32>} : memref<288x128xf32, #tpu.memory_space<vmem>>, vector<288x128xf32>,
    %c0_8 = arith.constant 0 : index
    %c0_9 = arith.constant 0 : index
    %c1 = arith.constant 1 : index
    %c0_10 = arith.constant 0 : index
    %6 = vector.load %arg2[%c0_8, %c0_9, %c1, %c0_10] : memref<1x1x328x128xbf16, #tpu.memory_space<vmem>>, vector<1x1x288x128xbf16>
    %7 = vector.shape_cast %6 : vector<1x1x288x128xbf16> to vector<288x128xbf16>
    %c1_11 = arith.constant 1 : index
    %c0_12 = arith.constant 0 : index
    %c0_13 = arith.constant 0 : index
    %8 = vector.load %arg3[%c1_11, %c0_12, %c0_13] : memref<9x128x128xbf16, #tpu.memory_space<vmem>>, vector<1x128x128xbf16>
    %9 = vector.shape_cast %8 : vector<1x128x128xbf16> to vector<128x128xbf16>
    %cst_14 = arith.constant dense<0.000000e+00> : vector<288x128xf32>
    %10 = tpu.matmul %7, %9, %cst_14 {dimension_numbers = #tpu.dot_dimension_numbers<[1], [0], [0], [1], [0, 0, 1, 1], [], []>} : vector<288x128xbf16>, vector<128x128xbf16>, vector<288x128xf32> -> vector<288x128xf32>
    %c0_15 = arith.constant 0 : index
    %c0_16 = arith.constant 0 : index
    %11 = vector.load %arg6[%c0_15, %c0_16] : memref<288x128xf32, #tpu.memory_space<vmem>>, vector<288x128xf32>
    %12 = arith.addf %11, %10 : vector<288x128xf32>
    %c0_17 = arith.constant 0 : index
    %c0_18 = arith.constant 0 : index
    %13 = vector.load %arg6[%c0_17, %c0_18] : memref<288x128xf32, #tpu.memory_space<vmem>>, vector<288x128xf32>
    tpu.vector_store %arg6[%c0_17, %c0_18], %12 {strides = array<i32>} : memref<288x128xf32, #tpu.memory_space<vmem>>, vector<288x128xf32>,
    %c0_19 = arith.constant 0 : index
    %c0_20 = arith.constant 0 : index
    %c2 = arith.constant 2 : index
    %c0_21 = arith.constant 0 : index
    %14 = vector.load %arg2[%c0_19, %c0_20, %c2, %c0_21] : memref<1x1x328x128xbf16, #tpu.memory_space<vmem>>, vector<1x1x288x128xbf16>
    %15 = vector.shape_cast %14 : vector<1x1x288x128xbf16> to vector<288x128xbf16>
    %c2_22 = arith.constant 2 : index
    %c0_23 = arith.constant 0 : index
    %c0_24 = arith.constant 0 : index
    %16 = vector.load %arg3[%c2_22, %c0_23, %c0_24] : memref<9x128x128xbf16, #tpu.memory_space<vmem>>, vector<1x128x128xbf16>
    %17 = vector.shape_cast %16 : vector<1x128x128xbf16> to vector<128x128xbf16>
    %cst_25 = arith.constant dense<0.000000e+00> : vector<288x128xf32>
    %18 = tpu.matmul %15, %17, %cst_25 {dimension_numbers = #tpu.dot_dimension_numbers<[1], [0], [0], [1], [0, 0, 1, 1], [], []>} : vector<288x128xbf16>, vector<128x128xbf16>, vector<288x128xf32> -> vector<288x128xf32>
    %c0_26 = arith.constant 0 : index
    %c0_27 = arith.constant 0 : index
    %19 = vector.load %arg6[%c0_26, %c0_27] : memref<288x128xf32, #tpu.memory_space<vmem>>, vector<288x128xf32>
    %20 = arith.addf %19, %18 : vector<288x128xf32>
    %c0_28 = arith.constant 0 : index
    %c0_29 = arith.constant 0 : index
    %21 = vector.load %arg6[%c0_28, %c0_29] : memref<288x128xf32, #tpu.memory_space<vmem>>, vector<288x128xf32>
    tpu.vector_store %arg6[%c0_28, %c0_29], %20 {strides = array<i32>} : memref<288x128xf32, #tpu.memory_space<vmem>>, vector<288x128xf32>,
    %c0_30 = arith.constant 0 : index
    %c0_31 = arith.constant 0 : index
    %c18 = arith.constant 18 : index
    %c0_32 = arith.constant 0 : index
    %22 = vector.load %arg2[%c0_30, %c0_31, %c18, %c0_32] : memref<1x1x328x128xbf16, #tpu.memory_space<vmem>>, vector<1x1x288x128xbf16>
    %23 = vector.shape_cast %22 : vector<1x1x288x128xbf16> to vector<288x128xbf16>
    %c3 = arith.constant 3 : index
    %c0_33 = arith.constant 0 : index
    %c0_34 = arith.constant 0 : index
    %24 = vector.load %arg3[%c3, %c0_33, %c0_34] : memref<9x128x128xbf16, #tpu.memory_space<vmem>>, vector<1x128x128xbf16>
    %25 = vector.shape_cast %24 : vector<1x128x128xbf16> to vector<128x128xbf16>
    %cst_35 = arith.constant dense<0.000000e+00> : vector<288x128xf32>
    %26 = tpu.matmul %23, %25, %cst_35 {dimension_numbers = #tpu.dot_dimension_numbers<[1], [0], [0], [1], [0, 0, 1, 1], [], []>} : vector<288x128xbf16>, vector<128x128xbf16>, vector<288x128xf32> -> vector<288x128xf32>
    %c0_36 = arith.constant 0 : index
    %c0_37 = arith.constant 0 : index
    %27 = vector.load %arg6[%c0_36, %c0_37] : memref<288x128xf32, #tpu.memory_space<vmem>>, vector<288x128xf32>
    %28 = arith.addf %27, %26 : vector<288x128xf32>
    %c0_38 = arith.constant 0 : index
    %c0_39 = arith.constant 0 : index
    %29 = vector.load %arg6[%c0_38, %c0_39] : memref<288x128xf32, #tpu.memory_space<vmem>>, vector<288x128xf32>
    tpu.vector_store %arg6[%c0_38, %c0_39], %28 {strides = array<i32>} : memref<288x128xf32, #tpu.memory_space<vmem>>, vector<288x128xf32>,
    %c0_40 = arith.constant 0 : index
    %c0_41 = arith.constant 0 : index
    %c19 = arith.constant 19 : index
    %c0_42 = arith.constant 0 : index
    %30 = vector.load %arg2[%c0_40, %c0_41, %c19, %c0_42] : memref<1x1x328x128xbf16, #tpu.memory_space<vmem>>, vector<1x1x288x128xbf16>
    %31 = vector.shape_cast %30 : vector<1x1x288x128xbf16> to vector<288x128xbf16>
    %c4 = arith.constant 4 : index
    %c0_43 = arith.constant 0 : index
    %c0_44 = arith.constant 0 : index
    %32 = vector.load %arg3[%c4, %c0_43, %c0_44] : memref<9x128x128xbf16, #tpu.memory_space<vmem>>, vector<1x128x128xbf16>
    %33 = vector.shape_cast %32 : vector<1x128x128xbf16> to vector<128x128xbf16>
    %cst_45 = arith.constant dense<0.000000e+00> : vector<288x128xf32>
    %34 = tpu.matmul %31, %33, %cst_45 {dimension_numbers = #tpu.dot_dimension_numbers<[1], [0], [0], [1], [0, 0, 1, 1], [], []>} : vector<288x128xbf16>, vector<128x128xbf16>, vector<288x128xf32> -> vector<288x128xf32>
    %c0_46 = arith.constant 0 : index
    %c0_47 = arith.constant 0 : index
    %35 = vector.load %arg6[%c0_46, %c0_47] : memref<288x128xf32, #tpu.memory_space<vmem>>, vector<288x128xf32>
    %36 = arith.addf %35, %34 : vector<288x128xf32>
    %c0_48 = arith.constant 0 : index
    %c0_49 = arith.constant 0 : index
    %37 = vector.load %arg6[%c0_48, %c0_49] : memref<288x128xf32, #tpu.memory_space<vmem>>, vector<288x128xf32>
    tpu.vector_store %arg6[%c0_48, %c0_49], %36 {strides = array<i32>} : memref<288x128xf32, #tpu.memory_space<vmem>>, vector<288x128xf32>,
    %c0_50 = arith.constant 0 : index
    %c0_51 = arith.constant 0 : index
    %c20 = arith.constant 20 : index
    %c0_52 = arith.constant 0 : index
    %38 = vector.load %arg2[%c0_50, %c0_51, %c20, %c0_52] : memref<1x1x328x128xbf16, #tpu.memory_space<vmem>>, vector<1x1x288x128xbf16>
    %39 = vector.shape_cast %38 : vector<1x1x288x128xbf16> to vector<288x128xbf16>
    %c5 = arith.constant 5 : index
    %c0_53 = arith.constant 0 : index
    %c0_54 = arith.constant 0 : index
    %40 = vector.load %arg3[%c5, %c0_53, %c0_54] : memref<9x128x128xbf16, #tpu.memory_space<vmem>>, vector<1x128x128xbf16>
    %41 = vector.shape_cast %40 : vector<1x128x128xbf16> to vector<128x128xbf16>
    %cst_55 = arith.constant dense<0.000000e+00> : vector<288x128xf32>
    %42 = tpu.matmul %39, %41, %cst_55 {dimension_numbers = #tpu.dot_dimension_numbers<[1], [0], [0], [1], [0, 0, 1, 1], [], []>} : vector<288x128xbf16>, vector<128x128xbf16>, vector<288x128xf32> -> vector<288x128xf32>
    %c0_56 = arith.constant 0 : index
    %c0_57 = arith.constant 0 : index
    %43 = vector.load %arg6[%c0_56, %c0_57] : memref<288x128xf32, #tpu.memory_space<vmem>>, vector<288x128xf32>
    %44 = arith.addf %43, %42 : vector<288x128xf32>
    %c0_58 = arith.constant 0 : index
    %c0_59 = arith.constant 0 : index
    %45 = vector.load %arg6[%c0_58, %c0_59] : memref<288x128xf32, #tpu.memory_space<vmem>>, vector<288x128xf32>
    tpu.vector_store %arg6[%c0_58, %c0_59], %44 {strides = array<i32>} : memref<288x128xf32, #tpu.memory_space<vmem>>, vector<288x128xf32>,
    %c0_60 = arith.constant 0 : index
    %c0_61 = arith.constant 0 : index
    %c36 = arith.constant 36 : index
    %c0_62 = arith.constant 0 : index
    %46 = vector.load %arg2[%c0_60, %c0_61, %c36, %c0_62] : memref<1x1x328x128xbf16, #tpu.memory_space<vmem>>, vector<1x1x288x128xbf16>
    %47 = vector.shape_cast %46 : vector<1x1x288x128xbf16> to vector<288x128xbf16>
    %c6 = arith.constant 6 : index
    %c0_63 = arith.constant 0 : index
    %c0_64 = arith.constant 0 : index
    %48 = vector.load %arg3[%c6, %c0_63, %c0_64] : memref<9x128x128xbf16, #tpu.memory_space<vmem>>, vector<1x128x128xbf16>
    %49 = vector.shape_cast %48 : vector<1x128x128xbf16> to vector<128x128xbf16>
    %cst_65 = arith.constant dense<0.000000e+00> : vector<288x128xf32>
    %50 = tpu.matmul %47, %49, %cst_65 {dimension_numbers = #tpu.dot_dimension_numbers<[1], [0], [0], [1], [0, 0, 1, 1], [], []>} : vector<288x128xbf16>, vector<128x128xbf16>, vector<288x128xf32> -> vector<288x128xf32>
    %c0_66 = arith.constant 0 : index
    %c0_67 = arith.constant 0 : index
    %51 = vector.load %arg6[%c0_66, %c0_67] : memref<288x128xf32, #tpu.memory_space<vmem>>, vector<288x128xf32>
    %52 = arith.addf %51, %50 : vector<288x128xf32>
    %c0_68 = arith.constant 0 : index
    %c0_69 = arith.constant 0 : index
    %53 = vector.load %arg6[%c0_68, %c0_69] : memref<288x128xf32, #tpu.memory_space<vmem>>, vector<288x128xf32>
    tpu.vector_store %arg6[%c0_68, %c0_69], %52 {strides = array<i32>} : memref<288x128xf32, #tpu.memory_space<vmem>>, vector<288x128xf32>,
    %c0_70 = arith.constant 0 : index
    %c0_71 = arith.constant 0 : index
    %c37 = arith.constant 37 : index
    %c0_72 = arith.constant 0 : index
    %54 = vector.load %arg2[%c0_70, %c0_71, %c37, %c0_72] : memref<1x1x328x128xbf16, #tpu.memory_space<vmem>>, vector<1x1x288x128xbf16>
    %55 = vector.shape_cast %54 : vector<1x1x288x128xbf16> to vector<288x128xbf16>
    %c7 = arith.constant 7 : index
    %c0_73 = arith.constant 0 : index
    %c0_74 = arith.constant 0 : index
    %56 = vector.load %arg3[%c7, %c0_73, %c0_74] : memref<9x128x128xbf16, #tpu.memory_space<vmem>>, vector<1x128x128xbf16>
    %57 = vector.shape_cast %56 : vector<1x128x128xbf16> to vector<128x128xbf16>
    %cst_75 = arith.constant dense<0.000000e+00> : vector<288x128xf32>
    %58 = tpu.matmul %55, %57, %cst_75 {dimension_numbers = #tpu.dot_dimension_numbers<[1], [0], [0], [1], [0, 0, 1, 1], [], []>} : vector<288x128xbf16>, vector<128x128xbf16>, vector<288x128xf32> -> vector<288x128xf32>
    %c0_76 = arith.constant 0 : index
    %c0_77 = arith.constant 0 : index
    %59 = vector.load %arg6[%c0_76, %c0_77] : memref<288x128xf32, #tpu.memory_space<vmem>>, vector<288x128xf32>
    %60 = arith.addf %59, %58 : vector<288x128xf32>
    %c0_78 = arith.constant 0 : index
    %c0_79 = arith.constant 0 : index
    %61 = vector.load %arg6[%c0_78, %c0_79] : memref<288x128xf32, #tpu.memory_space<vmem>>, vector<288x128xf32>
    tpu.vector_store %arg6[%c0_78, %c0_79], %60 {strides = array<i32>} : memref<288x128xf32, #tpu.memory_space<vmem>>, vector<288x128xf32>,
    %c0_80 = arith.constant 0 : index
    %c0_81 = arith.constant 0 : index
    %c38 = arith.constant 38 : index
    %c0_82 = arith.constant 0 : index
    %62 = vector.load %arg2[%c0_80, %c0_81, %c38, %c0_82] : memref<1x1x328x128xbf16, #tpu.memory_space<vmem>>, vector<1x1x288x128xbf16>
    %63 = vector.shape_cast %62 : vector<1x1x288x128xbf16> to vector<288x128xbf16>
    %c8 = arith.constant 8 : index
    %c0_83 = arith.constant 0 : index
    %c0_84 = arith.constant 0 : index
    %64 = vector.load %arg3[%c8, %c0_83, %c0_84] : memref<9x128x128xbf16, #tpu.memory_space<vmem>>, vector<1x128x128xbf16>
    %65 = vector.shape_cast %64 : vector<1x128x128xbf16> to vector<128x128xbf16>
    %cst_85 = arith.constant dense<0.000000e+00> : vector<288x128xf32>
    %66 = tpu.matmul %63, %65, %cst_85 {dimension_numbers = #tpu.dot_dimension_numbers<[1], [0], [0], [1], [0, 0, 1, 1], [], []>} : vector<288x128xbf16>, vector<128x128xbf16>, vector<288x128xf32> -> vector<288x128xf32>
    %c0_86 = arith.constant 0 : index
    %c0_87 = arith.constant 0 : index
    %67 = vector.load %arg6[%c0_86, %c0_87] : memref<288x128xf32, #tpu.memory_space<vmem>>, vector<288x128xf32>
    %68 = arith.addf %67, %66 : vector<288x128xf32>
    %c0_88 = arith.constant 0 : index
    %c0_89 = arith.constant 0 : index
    %69 = vector.load %arg6[%c0_88, %c0_89] : memref<288x128xf32, #tpu.memory_space<vmem>>, vector<288x128xf32>
    tpu.vector_store %arg6[%c0_88, %c0_89], %68 {strides = array<i32>} : memref<288x128xf32, #tpu.memory_space<vmem>>, vector<288x128xf32>,
    %c0_90 = arith.constant 0 : index
    %c0_91 = arith.constant 0 : index
    %70 = vector.load %arg6[%c0_90, %c0_91] : memref<288x128xf32, #tpu.memory_space<vmem>>, vector<288x128xf32>
    %c0_92 = arith.constant 0 : index
    %c0_93 = arith.constant 0 : index
    %71 = vector.load %arg4[%c0_92, %c0_93] : memref<1x128xf32, #tpu.memory_space<vmem>>, vector<1x128xf32>
    %72 = vector.broadcast %71 : vector<1x128xf32> to vector<288x128xf32>
    %73 = arith.addf %70, %72 : vector<288x128xf32>
    %cst_94 = arith.constant 0.000000e+00 : f32
    %74 = vector.broadcast %cst_94 : f32 to vector<288x128xf32>
    %75 = arith.maximumf %73, %74 : vector<288x128xf32>
    %76 = arith.truncf %75 : vector<288x128xf32> to vector<288x128xbf16>
    %c0_95 = arith.constant 0 : index
    %c0_96 = arith.constant 0 : index
    %c0_97 = arith.constant 0 : index
    %77 = vector.load %arg5[%c0_95, %c0_96, %c0_97] : memref<1x288x128xbf16, #tpu.memory_space<vmem>>, vector<1x288x128xbf16>
    %78 = vector.shape_cast %77 : vector<1x288x128xbf16> to vector<288x128xbf16>
    %79 = vector.shape_cast %76 : vector<288x128xbf16> to vector<1x288x128xbf16>
    tpu.vector_store %arg5[%c0_95, %c0_96, %c0_97], %79 {strides = array<i32>} : memref<1x288x128xbf16, #tpu.memory_space<vmem>>, vector<1x288x128xbf16>,
    return
  }
  func.func @transform_0(%arg0: i32, %arg1: i32) -> (i32, i32, i32, i32) {
    %c0_i32 = arith.constant 0 : i32
    %c0_i32_0 = arith.constant 0 : i32
    %c0_i32_1 = arith.constant 0 : i32
    %c0_i32_2 = arith.constant 0 : i32
    return %arg0, %c0_i32, %c0_i32_0, %c0_i32_1 : i32, i32, i32, i32
  }
  func.func @transform_1(%arg0: i32, %arg1: i32) -> (i32, i32, i32) {
    %c0_i32 = arith.constant 0 : i32
    %c0_i32_0 = arith.constant 0 : i32
    %c0_i32_1 = arith.constant 0 : i32
    return %c0_i32, %c0_i32_0, %arg1 : i32, i32, i32
  }
  func.func @transform_2(%arg0: i32, %arg1: i32) -> (i32, i32) {
    %c0_i32 = arith.constant 0 : i32
    %c0_i32_0 = arith.constant 0 : i32
    return %c0_i32, %arg1 : i32, i32
  }
  func.func @transform_3(%arg0: i32, %arg1: i32) -> (i32, i32, i32) {
    %c0_i32 = arith.constant 0 : i32
    %c0_i32_0 = arith.constant 0 : i32
    return %arg0, %c0_i32, %arg1 : i32, i32, i32
  }
}

</mosaic_0001>

<bundles_post_ra>
// kernel: tpu_custom_call.1
= control target key start
LH: loop header
LB: loop body
LE: loop exit
PB: predicated region body
PF: predicated region fallthrough
CT: control target
= control target key end

     0   :  { %8 = vsyncpa [#allocation4], 0  ;;  %s7551_s0 = inlined_call_operand.hbm [shape: bf16[2,1,328,128], index: 0, kind: input, shape index: {}]   ;;  %s7552_s1 = inlined_call_operand.hbm [shape: bf16[9,128,128], index: 1, kind: input, shape index: {}]   ;;  %s7553_s2 = inlined_call_operand.vmem [shape: f32[1,128], index: 2, kind: input, shape index: {}]   ;;  %s7554_s3 = inlined_call_operand.hbm [shape: bf16[2,288,128], index: 3, kind: output, shape index: {}]  }
   0x1   :  { %10 = vsyncpa [#allocation4 + $0x1], 0 }
   0x2   :  { %11 = vsyncpa [#allocation7], 0 }
   0x3   :  { %12 = vsyncpa [#allocation5], 0 }
   0x4   :  { %14 = vsyncpa [#allocation5 + $0x1], 0  ;;  %s6503_s12 = smov 0   ;;  %s6505_s13 = smov 0  }
   0x5   :  { %s6507_s14 = smov 0   ;;  %s6509_s15 = smov 0  }
   0x6   :  { %s6511_s16 = smov 0   ;;  %s6513_s17 = smov 0  }
   0x7 LB: > { %s4933_s18 = sadd.s32 4294967295, %s6476_s17   ;;  %s4934_s19 = sadd.s32 4294967294, %s6476_s17   ;;  %s6476_s17 = sphi %s6513_s17, %s20_s17   ;;  %s6472_s16 = sphi %s6511_s16, %s7581_s16   ;;  %s6468_s15 = sphi %s6509_s15, %s7580_s15   ;;  %s6464_s14 = sphi %s6507_s14, %s7579_s14   ;;  %s6460_s13 = sphi %s6505_s13, %s7578_s13   ;;  %s6456_s12 = sphi %s6503_s12, %s7577_s12  }
   0x8   : > { %p52_p0 = scmp.ne.s32.totalorder %s6460_s13, %s6456_s12  ;;  %p6537_p1 = scmp.eq.s32.totalorder %s4933_s18, 0 }
   0x9   : > { %p6541_p2 = scmp.eq.s32.totalorder %s4933_s18, 1  ;;  %p136_p3 = scmp.eq.s32.totalorder %s4934_s19, 1 }
   0xa   : > { %p6547_p4 = por %p6537_p1, %p52_p0  ;;  %p4935_p5 = scmp.ge.s32.totalorder %s6476_s17, 1 }
   0xb   : > { %p6552_p6 = por %p136_p3, %p52_p0  ;;  %p143_p7 = scmp.lt.s32.totalorder %s6476_s17, 3 }
   0xc   : > { %s156_s26 = sshll.u32 %s7552_s1, 4  ;;  %s6478_s28 = smov [#allocation6]   ;;  %s157_s26 = int_to_ptr.hbm [resolvable:$true] %s156_s26 }
   0xd   : > { %p6560_p8 = pnand %p4935_p5, %p143_p7  ;;  %s158_s29 = sshll.u32 %s6478_s28, 4  ;;  %s159_s29 = int_to_ptr.vmem [resolvable:$true] %s158_s29 }
   0xe   : > { %p4938_p11 = scmp.ge.s32.totalorder %s6476_s17, 2  ;;  %s6479_s30 = smov 64  }
   0xf   : > { %p6259_p9 = pneg %p6560_p8  ;;  %s6480_s4 = smov 4  }
  0x10   : > { %s32_s5 = sadd.s32 1, %s6472_s16  ;;  %s39_s6 = sadd.s32 1, %s6464_s14 }
  0x11   : > { %p6260_p10 = pnand %p6259_p9, %p6537_p1  ;;  %p34_p12 = scmp.ge.s32.totalorder %s32_s5, 2 }
  0x12   : > { %p46_p13 = scmp.ne.s32.totalorder %s6464_s14, %s6460_s13  ;;  %p47_p0 = scmp.eq.s32.totalorder %s6476_s17, 0 }
  0x13   : > { %6262 = dma.hbm_to_vmem [thread:$0]  (!%p6260_p10), %s157_s26, 9216, %s159_s29, [#allocation7], %s6479_s30, %s6479_s30, %s6480_s4  }
  0x14   : > { %s7583_s5 = smov (%p34_p12, %s32_s5), 0  ;;  %p48_p3 = por %p47_p0, %p46_p13 }
  0x15   : > { %p6581_p5 = por %p6541_p2, %p46_p13  ;;  %s36_s8 = ssub.s32 %s6472_s16, %s7583_s5 }
  0x16   : > { %p6272_p7 = scmp.lt.s32.totalorder %s6476_s17, 2  ;;  %p37_p9 = scmp.eq.s32.totalorder %s36_s8, 0 }
  0x17   : > { %s178_s9 = sand.u32 1, %s6464_s14   ;;  %s6247_s18 = smul.u32 164, %s6472_s16 }
  0x18   : > { %s6246_s10 = smul.u32 164, %s178_s9  ;;  %p6264_p10 = pnand %p6272_p7, %p48_p3 }
  0x19   : > { %s6590_s11 = scalar_select %p37_p9, %s6464_s14, %s39_s6  }
  0x1a   : > { %s182_s19 = scalar_lea.vmem [#allocation3], %s6246_s10  ;;  %s187_s28 = scalar_lea.hbm %s7551_s0, %s6247_s18 }
  0x1b   : > { %s190_s24 = sshll.u32 %s182_s19, 4  ;;  %s188_s21 = sshll.u32 %s187_s28, 4  ;;  %s191_s24 = int_to_ptr.vmem [resolvable:$true] %s190_s24  ;;  %s189_s21 = int_to_ptr.hbm [resolvable:$true] %s188_s21 }
  0x1c   : > { %s179_s29 = scalar_lea.sflag [#allocation4], %s178_s9  ;;  %202 = sbr.rel (%p6560_p8) target bundleno = 868 (0x364), region = 32 }
  0x1d   : > { %6266 = dma.hbm_to_vmem [thread:$0]  (!%p6264_p10), %s189_s21, 2624, %s191_s24, %s179_s29, %s6479_s30, %s6479_s30, %s6480_s4  }
  0x21   : > { %s6602_s6 = sand.u32 1, %s6460_s13  }
  0x22   : > { %s6248_s8 = smul.u32 164, %s6602_s6  ;;  %s205_s10 = scalar_lea.sflag [#allocation4], %s6602_s6 }
  0x24   : > { %s6606_s18 = scalar_lea.vmem [#allocation3], %s6248_s8 }
  0x25   : > { %6443 = dma.done.wait (%p6547_p4), %s205_s10, 2624  }
  0x26   : > { %6445 = vsyncadd (%p6547_p4), %s205_s10, 4294964672 }
  0x27   : > { %6447 = dma.done.wait (%p6537_p1), [#allocation7], 9216  }
  0x28   : > { %6449 = vsyncadd (%p6537_p1), [#allocation7], 4294958080  ;;  %v5906_v0 = vld [vmem:[#allocation6 + $0x38] sm:$0xff]  ;;  %v5905_v1 = vld [vmem:[#allocation6 + $0x30] sm:$0xff]  ;;  %vm1302_vm0 = vcmask 1046528   ;;  %vm2808_vm4 = vcmask 1045504  }
  0x29   : > { %6222 = vmatpush.bf16.msra.mxu1 %v5906_v0  ;;  %6223 = vmatpush.bf16.msra.mxu2 %v5906_v0  ;;  %v5904_v2 = vld [vmem:[#allocation6 + $0x28] sm:$0xff]  ;;  %v5903_v3 = vld [vmem:[#allocation6 + $0x20] sm:$0xff]  ;;  %v5902_v4 = vld [vmem:[#allocation6 + $0x18] sm:$0xff]  ;;  %vm733_vm1 = vsmask.f32 7424  ;;  %vm4314_vm5 = vcmask 1044480  }
  0x2a   : > { %451 = vmatpush.bf16.msra.mxu0 %v5906_v0  ;;  %6224 = vmatpush.bf16.msra.mxu3 %v5906_v0  ;;  %v5901_v5 = vld [vmem:[#allocation6 + $0x10] sm:$0xff]  ;;  %v5900_v6 = vld [vmem:[#allocation6 + $0x8] sm:$0xff]  ;;  %v5899_v7 = vld [vmem:[#allocation6] sm:$0xff]  ;;  %vm2217_vm2 = vsmask.f32 6400  ;;  %s6249_s27 = smul.u32 144, %s6602_s6 }
  0x2b   : > { %v5958_v8 = vld [vmem:[#allocation6 + $0xb8] sm:$0xff]  ;;  %v5886_v11 = vld [vmem:[%s6606_s18 + $0x28] sm:$0xff]  ;;  %v5891_v12 = vld [vmem:[%s6606_s18 + $0x50] sm:$0xff]  ;;  %vm3723_vm3 = vsmask.f32 5376  ;;  %s6250_s19 = smul.u32 144, %s6468_s15 }
  0x2c   : > { %v5932_v9 = vld [vmem:[#allocation6 + $0x78] sm:$0xff]  ;;  %v5957_v14 = vld [vmem:[#allocation6 + $0xb0] sm:$0xff]  ;;  %v5956_v19 = vld [vmem:[#allocation6 + $0xa8] sm:$0xff]  ;;  %s7290_s30 = scalar_lea.vmem [#allocation8], %s6249_s27  ;;  %s4810_s15 = scalar_lea.sflag [#allocation5], %s6602_s6 }
  0x2d   : > { %6225 = vmatpush.bf16.msra.mxu1 %v5905_v1  ;;  %6226 = vmatpush.bf16.msra.mxu2 %v5905_v1  ;;  %v6010_v10 = vld [vmem:[#allocation6 + $0x138] sm:$0xff]  ;;  %v5931_v15 = vld [vmem:[#allocation6 + $0x70] sm:$0xff]  ;;  %v5930_v20 = vld [vmem:[#allocation6 + $0x68] sm:$0xff]  ;;  %s4822_s26 = scalar_lea.hbm %s7554_s3, %s6250_s19  ;;  %s4823_s28 = sshll.u32 %s7290_s30, 4  ;;  %s4824_s28 = int_to_ptr.vmem [resolvable:$true] %s4823_s28 }
  0x2e   : > { %452 = vmatpush.bf16.msra.mxu0 %v5905_v1  ;;  %6227 = vmatpush.bf16.msra.mxu3 %v5905_v1  ;;  %v5881_v13 = vld [vmem:[%s6606_s18] sm:$0xff]  ;;  %v6009_v16 = vld [vmem:[#allocation6 + $0x130] sm:$0xff]  ;;  %v6008_v21 = vld [vmem:[#allocation6 + $0x128] sm:$0xff]  ;;  %s4825_s21 = sshll.u32 %s4822_s26, 4  ;;  %s6410_s20 = scalar_lea.hbm %s7554_s3, 288  ;;  %s4826_s21 = int_to_ptr.hbm [resolvable:$true] %s4825_s21 }
  0x2f   : > { %v5896_v17 = vld [vmem:[%s6606_s18 + $0x78] sm:$0xff]  ;;  %v5955_v23 = vld [vmem:[#allocation6 + $0xa0] sm:$0xff]  ;;  %v5982_v26 = vld [vmem:[#allocation6 + $0xe8] sm:$0xff]  ;;  %s6404_s29 = sshra.s32 %s4826_s21, 4  ;;  %s6405_s29 = int_to_ptr.hbm [resolvable:$true] %s6404_s29 }
  0x30   : > { %v5984_v18 = vld [vmem:[#allocation6 + $0xf8] sm:$0xff]  ;;  %v5983_v22 = vld [vmem:[#allocation6 + $0xf0] sm:$0xff]  ;;  %v5929_v24 = vld [vmem:[#allocation6 + $0x60] sm:$0xff]  ;;  %s6406_s8 = scalar_lea.hbm %s6405_s29, 144  ;;  %p6411_p8 = scmp.lt.s32.totalorder %s6405_s29, %s7554_s3 }
  0x31   : > { %6228 = vmatpush.bf16.msra.mxu1 %v5904_v2  ;;  %6229 = vmatpush.bf16.msra.mxu2 %v5904_v2  ;;  %v6007_v25 = vld [vmem:[#allocation6 + $0x120] sm:$0xff]  ;;  %v5954_v27 = vld [vmem:[#allocation6 + $0x98] sm:$0xff]  ;;  %v5887_v29 = vld [vmem:[%s6606_s18 + $0x30] sm:$0xff]  ;;  %p6407_p1 = scmp.ne.s32.totalorder %s6405_s29, %s6406_s8  ;;  %p6412_p12 = scmp.lt.s32.totalorder %s6410_s20, %s6406_s8 }
  0x32   : > { %453 = vmatpush.bf16.msra.mxu0 %v5904_v2  ;;  %6230 = vmatpush.bf16.msra.mxu3 %v5904_v2  ;;  %v5928_v28 = vld [vmem:[#allocation6 + $0x58] sm:$0xff]  ;;  %v5882_v31 = vld [vmem:[%s6606_s18 + $0x8] sm:$0xff]  ;;  %v5953_v33 = vld [vmem:[#allocation6 + $0x90] sm:$0xff] }
  0x33   : > { %v5892_v30 = vld [vmem:[%s6606_s18 + $0x58] sm:$0xff]  ;;  %v5897_v32 = vld [vmem:[%s6606_s18 + $0x80] sm:$0xff]  ;;  %v5952_v37 = vld [vmem:[#allocation6 + $0x88] sm:$0xff]  ;;  %p6408_p2 = pnand %p6407_p1, %p6581_p5  ;;  %p6413_p13 = por %p6412_p12, %p6411_p8 }
  0x34   : > { %v6006_v34 = vld [vmem:[#allocation6 + $0x118] sm:$0xff]  ;;  %v5981_v35 = vld [vmem:[#allocation6 + $0xe0] sm:$0xff]  ;;  %v5927_v36 = vld [vmem:[#allocation6 + $0x50] sm:$0xff] }
  0x35   : > { %6231 = vmatpush.bf16.msra.mxu1 %v5903_v3  ;;  %6232 = vmatpush.bf16.msra.mxu2 %v5903_v3  ;;  %v6005_v38 = vld [vmem:[#allocation6 + $0x110] sm:$0xff]  ;;  %v5980_v39 = vld [vmem:[#allocation6 + $0xd8] sm:$0xff]  ;;  %v5898_v44 = vld [vmem:[%s6606_s18 + $0x88] sm:$0xff]  ;;  %p6409_p4 = pneg %p6408_p2 }
  0x36   : > { %454 = vmatpush.bf16.msra.mxu0 %v5903_v3  ;;  %6233 = vmatpush.bf16.msra.mxu3 %v5903_v3  ;;  %v5979_v40 = vld [vmem:[#allocation6 + $0xd0] sm:$0xff]  ;;  %v5893_v42 = vld [vmem:[%s6606_s18 + $0x60] sm:$0xff]  ;;  %v5926_v45 = vld [vmem:[#allocation6 + $0x48] sm:$0xff] }
  0x37   : > { %v5888_v41 = vld [vmem:[%s6606_s18 + $0x38] sm:$0xff]  ;;  %v5883_v43 = vld [vmem:[%s6606_s18 + $0x10] sm:$0xff]  ;;  %v5951_v47 = vld [vmem:[#allocation6 + $0x80] sm:$0xff]  ;;  %p6414_p0 = pnand %p6413_p13, %p6409_p4 }
  0x38   : > { %v5978_v46 = vld [vmem:[#allocation6 + $0xc8] sm:$0xff]  ;;  %v5925_v49 = vld [vmem:[#allocation6 + $0x40] sm:$0xff]  ;;  %v5884_v58 = vld [vmem:[%s6606_s18 + $0x18] sm:$0xff] }
  0x39   : > { %6234 = vmatpush.bf16.msra.mxu1 %v5902_v4  ;;  %6235 = vmatpush.bf16.msra.mxu2 %v5902_v4  ;;  %v6004_v48 = vld [vmem:[#allocation6 + $0x108] sm:$0xff]  ;;  %v5977_v50 = vld [vmem:[#allocation6 + $0xc0] sm:$0xff]  ;;  %v6062_v61 = vld [vmem:[#allocation6 + $0x1b8] sm:$0xff] }
  0x3a   : > { %455 = vmatpush.bf16.msra.mxu0 %v5902_v4  ;;  %6236 = vmatpush.bf16.msra.mxu3 %v5902_v4  ;;  %v6003_v51 = vld [vmem:[#allocation6 + $0x100] sm:$0xff]  ;;  %v5960_v54 = vld [vmem:[%s6606_s18 + $0x10] sm:$0xff]  ;;  %v6088_v63 = vld [vmem:[#allocation6 + $0x1f8] sm:$0xff] }
  0x3b   : > { %v5256_v52 = vld [vmem:[%s6606_s18 + $0x8] sm:$0xe]  ;;  %v5959_v53 = vld [vmem:[%s6606_s18 + $0x8] sm:$0xf0]  ;;  %v5889_v56 = vld [vmem:[%s6606_s18 + $0x40] sm:$0xff]  ;;  %v1761_v60 = vrot.slane %v5960_v54, 1 }
  0x3c   : > { %v5257_v55 = vor.u32 %v5959_v53, %v5256_v52  ;;  %v5894_v57 = vld [vmem:[%s6606_s18 + $0x68] sm:$0xff]  ;;  %v6036_v0 = vld [vmem:[#allocation6 + $0x178] sm:$0xff] }
  0x3d   : > { %6237 = vmatpush.bf16.msra.mxu1 %v5901_v5  ;;  %6238 = vmatpush.bf16.msra.mxu2 %v5901_v5  ;;  %v6114_v1 = vld [vmem:[#allocation6 + $0x238] sm:$0xff]  ;;  %v5360_v3 = vld [vmem:[%s6606_s18 + $0x8] sm:$0xe]  ;;  %v5985_v4 = vld [vmem:[%s6606_s18 + $0x8] sm:$0xf0] }
  0x3e   : > { %456 = vmatpush.bf16.msra.mxu0 %v5901_v5  ;;  %6239 = vmatpush.bf16.msra.mxu3 %v5901_v5  ;;  %v1760_v59 = vrot.slane %v5257_v55, 1  ;;  %v5961_v2 = vld [vmem:[%s6606_s18 + $0x18] sm:$0xff]  ;;  %v5890_v5 = vld [vmem:[%s6606_s18 + $0x48] sm:$0xff] }
  0x40   : > { %v1762_v62 = vsel %vm1302_vm0, %v1760_v59, %v1761_v60 }
  0x41   : > { %6240 = vmatpush.bf16.msra.mxu1 %v5900_v6  ;;  %6241 = vmatpush.bf16.msra.mxu2 %v5900_v6 }
  0x42   : > { %457 = vmatpush.bf16.msra.mxu0 %v5900_v6  ;;  %6242 = vmatpush.bf16.msra.mxu3 %v5900_v6  ;;  %v5895_v6 = vld [vmem:[%s6606_s18 + $0x70] sm:$0xff] }
  0x45   : > { %6243 = vmatpush.bf16.msra.mxu1 %v5899_v7  ;;  %6244 = vmatpush.bf16.msra.mxu2 %v5899_v7 }
  0x46   : > { %458 = vmatpush.bf16.msra.mxu0 %v5899_v7  ;;  %6245 = vmatpush.bf16.msra.mxu3 %v5899_v7  ;;  %v5885_v7 = vld [vmem:[%s6606_s18 + $0x20] sm:$0xff] }
  0x48   : > { %484 = vmatmul.bf16.vlgmr.msra.gmra.mxu1 %v5886_v11  ;;  %509 = vmatmul.bf16.vlgmr.msra.gmra.mxu2 %v5891_v12  ;;  %v5361_v11 = vor.u32 %v5985_v4, %v5360_v3  ;;  %v5908_v12 = vld [vmem:[%s6606_s18 + $0x8] sm:$0xff] }
  0x49   : > { %1406 = vmatpush.bf16.msrb.mxu2 %v5958_v8  ;;  %948 = vmatpush.bf16.msrb.mxu1 %v5932_v9  ;;  %v5907_v8 = vld [vmem:[%s6606_s18] sm:$0xff]  ;;  %v1763_v9 = vrot.slane %v5961_v2, 1 }
  0x4a   : > { %2454 = vmatpush.bf16.msrb.mxu0 %v6010_v10  ;;  %534 = vmatmul.bf16.vlgmr.msra.gmra.mxu3 %v5896_v17  ;;  %v5986_v10 = vld [vmem:[%s6606_s18 + $0x10] sm:$0xff]  ;;  %v2219_v17 = vshrl.u32 %v5361_v11, 16 }
  0x4b   : > { %459 = vmatmul.bf16.vlgmr.msra.gmra.mxu0 %v5881_v13  ;;  %1863 = vmatpush.bf16.msrb.mxu3 %v5984_v18  ;;  %v737_v13 = vshll.u32 %v5907_v8, 16  ;;  %v2222_v18 = vshll.u32 %v5361_v11, 16 }
  0x4d   : > { %1407 = vmatpush.bf16.msrb.mxu2 %v5957_v14  ;;  %949 = vmatpush.bf16.msrb.mxu1 %v5931_v15  ;;  %v5152_v14 = vld [vmem:[%s6606_s18] sm:$0xe]  ;;  %v1764_v15 = vsel %vm1302_vm0, %v1761_v60, %v1763_v9 }
  0x4e   : > { %2455 = vmatpush.bf16.msrb.mxu0 %v6009_v16  ;;  %v5933_v16 = vld [vmem:[%s6606_s18] sm:$0xf0] }
  0x4f   : > { %1864 = vmatpush.bf16.msrb.mxu3 %v5983_v22  ;;  %v739_v22 = vrot.slane %v737_v13, 1  ;;  %v5964_v13 = vld [vmem:[%s6606_s18 + $0x30] sm:$0xff] }
  0x51   : > { %1408 = vmatpush.bf16.msrb.mxu2 %v5956_v19  ;;  %950 = vmatpush.bf16.msrb.mxu1 %v5930_v20  ;;  %v2227_v19 = vshrl.u32 %v5986_v10, 16  ;;  %v2230_v20 = vshll.u32 %v5986_v10, 16 }
  0x52   : > { %2456 = vmatpush.bf16.msrb.mxu0 %v6008_v21  ;;  %v735_v21 = vshrl.u32 %v5907_v8, 16 }
  0x53   : > { %1865 = vmatpush.bf16.msrb.mxu3 %v5982_v26  ;;  %v2221_v26 = vrot.slane %v2219_v17, 1  ;;  %v1769_v17 = vrot.slane %v5964_v13, 1 }
  0x55   : > { %1409 = vmatpush.bf16.msrb.mxu2 %v5955_v23  ;;  %951 = vmatpush.bf16.msrb.mxu1 %v5929_v24  ;;  %v742_v23 = vshll.u32 %v5908_v12, 16  ;;  %v5934_v24 = vld [vmem:[%s6606_s18 + $0x8] sm:$0xff] }
  0x56   : > { %2457 = vmatpush.bf16.msrb.mxu0 %v6007_v25  ;;  %v5153_v25 = vor.u32 %v5933_v16, %v5152_v14 }
  0x57   : > { %1866 = vmatpush.bf16.msrb.mxu3 %v5981_v35 }
  0x58   : > { %489 = vmatmul.bf16.gmra.mxu1 %v5887_v29  ;;  %514 = vmatmul.bf16.gmra.mxu2 %v5892_v30  ;;  %v2232_v29 = vrot.slane %v2230_v20, 2  ;;  %v740_v30 = vor.u32 %v739_v22, %v735_v21  ;;  %v5911_v20 = vld [vmem:[%s6606_s18 + $0x20] sm:$0xff] }
  0x59   : > { %1410 = vmatpush.bf16.msrb.mxu2 %v5954_v27  ;;  %952 = vmatpush.bf16.msrb.mxu1 %v5928_v28  ;;  %v2224_v27 = vrot.slane %v2222_v18, 2  ;;  %v2229_v28 = vrot.slane %v2227_v19, 1  ;;  %v5989_v19 = vld [vmem:[%s6606_s18 + $0x28] sm:$0xff] }
  0x5a   : > { %2458 = vmatpush.bf16.msrb.mxu0 %v6006_v34  ;;  %539 = vmatmul.bf16.gmra.mxu3 %v5897_v32  ;;  %v1303_v32 = vrot.slane %v5153_v25, 1  ;;  %v5962_v34 = vld [vmem:[%s6606_s18 + $0x20] sm:$0xff]  ;;  %v2254_v22 = vshrl.u32 %v5989_v19, 16  ;;  %v766_v25 = vshll.u32 %v5911_v20, 16 }
  0x5b   : > { %464 = vmatmul.bf16.gmra.mxu0 %v5882_v31  ;;  %1867 = vmatpush.bf16.msrb.mxu3 %v5980_v39  ;;  %v744_v31 = vrot.slane %v742_v23, 1  ;;  %v2225_v35 = vor.u32 %v2224_v27, %v2221_v26  ;;  %v1765_v39 = vrot.slane %v5962_v34, 1  ;;  %v2257_v23 = vshll.u32 %v5989_v19, 16  ;;  %v5937_v26 = vld [vmem:[%s6606_s18 + $0x20] sm:$0xff]  ;;  %v5965_v34 = vld [vmem:[%s6606_s18 + $0x38] sm:$0xff] }
  0x5c   : > { %v2256_v27 = vrot.slane %v2254_v22, 1 }
  0x5d   : > { %1411 = vmatpush.bf16.msrb.mxu2 %v5953_v33  ;;  %953 = vmatpush.bf16.msrb.mxu1 %v5927_v36  ;;  %v1304_v33 = vrot.slane %v5934_v24, 1  ;;  %v2233_v36 = vor.u32 %v2232_v29, %v2229_v28  ;;  %v2259_v28 = vrot.slane %v2257_v23, 2  ;;  %v6060_v29 = vld [vmem:[#allocation6 + $0x1a8] sm:$0xff] }
  0x5e   : > { %2459 = vmatpush.bf16.msrb.mxu0 %v6005_v38 }
  0x5f   : > { %1868 = vmatpush.bf16.msrb.mxu3 %v5979_v40  ;;  %v1305_v38 = vsel %vm1302_vm0, %v1303_v32, %v1304_v33  ;;  %v2234_v40 = vsel %vm2217_vm2, %v2225_v35, %v2233_v36  ;;  %v768_v32 = vrot.slane %v766_v25, 1  ;;  %v2260_v35 = vor.u32 %v2259_v28, %v2256_v27  ;;  %v6059_v27 = vld [vmem:[#allocation6 + $0x1a0] sm:$0xff] }
  0x61   : > { %1412 = vmatpush.bf16.msrb.mxu2 %v5952_v37  ;;  %954 = vmatpush.bf16.msrb.mxu1 %v5926_v45  ;;  %v745_v37 = vsel %vm733_vm1, %v740_v30, %v744_v31  ;;  %v6087_v45 = vld [vmem:[#allocation6 + $0x1f0] sm:$0xff]  ;;  %v6086_v30 = vld [vmem:[#allocation6 + $0x1e8] sm:$0xff] }
  0x62   : > { %2460 = vmatpush.bf16.msrb.mxu0 %v6004_v48 }
  0x63   : > { %1869 = vmatpush.bf16.msrb.mxu3 %v5978_v46  ;;  %v6035_v46 = vld [vmem:[#allocation6 + $0x170] sm:$0xff] }
  0x65   : > { %1413 = vmatpush.bf16.msrb.mxu2 %v5951_v47  ;;  %955 = vmatpush.bf16.msrb.mxu1 %v5925_v49  ;;  %v746_v49 = vshrl.u32 %v5908_v12, 16 }
  0x66   : > { %2461 = vmatpush.bf16.msrb.mxu0 %v6003_v51  ;;  %v5935_v51 = vld [vmem:[%s6606_s18 + $0x10] sm:$0xff] }
  0x67   : > { %1870 = vmatpush.bf16.msrb.mxu3 %v5977_v50  ;;  %v748_v54 = vor.u32 %v746_v49, %v744_v31 }
  0x68   : > { %494 = vmatmul.bf16.gmra.mxu1 %v5888_v41  ;;  %519 = vmatmul.bf16.gmra.mxu2 %v5893_v42  ;;  %v5987_v41 = vld [vmem:[%s6606_s18 + $0x18] sm:$0xff]  ;;  %v5909_v42 = vld [vmem:[%s6606_s18 + $0x10] sm:$0xff] }
  0x69   : > { %3369 = vmatpush.bf16.msra.mxu2 %v6062_v61  ;;  %2912 = vmatpush.bf16.msra.mxu1 %v6036_v0  ;;  %v2236_v47 = vshrl.u32 %v5987_v41, 16  ;;  %v2239_v48 = vshll.u32 %v5987_v41, 16  ;;  %v750_v50 = vshll.u32 %v5909_v42, 16  ;;  %v5988_v0 = vld [vmem:[%s6606_s18 + $0x20] sm:$0xff] }
  0x6a   : > { %544 = vmatmul.bf16.gmra.mxu3 %v5898_v44  ;;  %4418 = vmatpush.bf16.msra.mxu0 %v6114_v1  ;;  %v6061_v44 = vld [vmem:[#allocation6 + $0x1b0] sm:$0xff]  ;;  %v2245_v3 = vshrl.u32 %v5988_v0, 16  ;;  %v2248_v4 = vshll.u32 %v5988_v0, 16 }
  0x6b   : > { %469 = vmatmul.bf16.gmra.mxu0 %v5883_v43  ;;  %3960 = vmatpush.bf16.msra.mxu3 %v6088_v63  ;;  %v1766_v43 = vsel %vm1302_vm0, %v1763_v9, %v1765_v39  ;;  %v2238_v52 = vrot.slane %v2236_v47, 1  ;;  %v2241_v53 = vrot.slane %v2239_v48, 2  ;;  %v752_v55 = vrot.slane %v750_v50, 1  ;;  %v5910_v1 = vld [vmem:[%s6606_s18 + $0x18] sm:$0xff] }
  0x6c   : > { %v2247_v8 = vrot.slane %v2245_v3, 1  ;;  %v2250_v9 = vrot.slane %v2248_v4, 2  ;;  %v762_v24 = vshrl.u32 %v5910_v1, 16 }
  0x6d   : > { %3370 = vmatpush.bf16.msra.mxu2 %v6061_v44  ;;  %2913 = vmatpush.bf16.msra.mxu1 %v6035_v46  ;;  %v753_v59 = vsel %vm733_vm1, %v748_v54, %v752_v55  ;;  %v5912_v44 = vld [vmem:[%s6606_s18 + $0x28] sm:$0xff] }
  0x6e   : > { %v2251_v14 = vor.u32 %v2250_v9, %v2247_v8  ;;  %v6112_v46 = vld [vmem:[#allocation6 + $0x228] sm:$0xff] }
  0x6f   : > { %3961 = vmatpush.bf16.msra.mxu3 %v6087_v45  ;;  %v5913_v8 = vld [vmem:[%s6606_s18 + $0x30] sm:$0xff] }
  0x71   : > { %3371 = vmatpush.bf16.msra.mxu2 %v6060_v29 }
  0x73   : > { %3962 = vmatpush.bf16.msra.mxu3 %v6086_v30 }
  0x75   : > { %3372 = vmatpush.bf16.msra.mxu2 %v6059_v27 }
  0x78   : > { %499 = vmatmul.bf16.gmra.mxu1 %v5889_v56  ;;  %524 = vmatmul.bf16.gmra.mxu2 %v5894_v57  ;;  %v1306_v56 = vrot.slane %v5935_v51, 1  ;;  %v5963_v57 = vld [vmem:[%s6606_s18 + $0x28] sm:$0xff]  ;;  %v770_v51 = vshrl.u32 %v5911_v20, 16 }
  0x79   : > { %v1767_v61 = vrot.slane %v5963_v57, 1 }
  0x7a   : > { %1871 = vmatmul.bf16.vlgmr.msrb.gmra.mxu3 %v1762_v62  ;;  %v1307_v60 = vsel %vm1302_vm0, %v1304_v33, %v1306_v56  ;;  %v6113_v62 = vld [vmem:[#allocation6 + $0x230] sm:$0xff]  ;;  %v1310_v33 = vrot.slane %v5937_v26, 1 }
  0x7b   : > { %474 = vmatmul.bf16.gmra.mxu0 %v5884_v58  ;;  %v2242_v58 = vor.u32 %v2241_v53, %v2238_v52  ;;  %v1768_v2 = vsel %vm1302_vm0, %v1765_v39, %v1767_v61  ;;  %v1770_v21 = vsel %vm1302_vm0, %v1767_v61, %v1769_v17  ;;  %v774_v52 = vshll.u32 %v5912_v44, 16  ;;  %v5938_v53 = vld [vmem:[%s6606_s18 + $0x28] sm:$0xff]  ;;  %v5966_v61 = vld [vmem:[%s6606_s18 + $0x40] sm:$0xff] }
  0x7c   : > { %4419 = vmatpush.bf16.msra.mxu0 %v6113_v62  ;;  %v1773_v3 = vrot.slane %v5966_v61, 1  ;;  %v5968_v61 = vld [vmem:[%s6606_s18 + $0x50] sm:$0xff] }
  0x7d   : > { %v2243_v63 = vsel %vm2217_vm2, %v2233_v36, %v2242_v58  ;;  %v2252_v18 = vsel %vm2217_vm2, %v2242_v58, %v2251_v14  ;;  %v6034_v36 = vld [vmem:[#allocation6 + $0x168] sm:$0xff]  ;;  %v772_v58 = vor.u32 %v770_v51, %v768_v32  ;;  %v6111_v51 = vld [vmem:[#allocation6 + $0x220] sm:$0xff] }
  0x7e   : > { %2914 = vmatpush.bf16.msra.mxu1 %v6034_v36 }
  0x80   : > { %4420 = vmatpush.bf16.msra.mxu0 %v6112_v46  ;;  %v786_v46 = vshrl.u32 %v5913_v8, 16 }
  0x84   : > { %4421 = vmatpush.bf16.msra.mxu0 %v6111_v51  ;;  %v5994_v51 = vld [vmem:[%s6606_s18 + $0x50] sm:$0xff] }
  0x88   : > { %504 = vmatmul.bf16.gmra.mxu1 %v5890_v5  ;;  %529 = vmatmul.bf16.gmra.mxu2 %v5895_v6  ;;  %v754_v5 = vshrl.u32 %v5909_v42, 16  ;;  %v758_v6 = vshll.u32 %v5910_v1, 16  ;;  %v2261_v42 = vsel %vm2217_vm2, %v2251_v14, %v2260_v35  ;;  %v778_v14 = vshrl.u32 %v5912_v44, 16 }
  0x8a   : > { %1876 = vmatmul.bf16.gmra.mxu3 %v1764_v15  ;;  %v756_v10 = vor.u32 %v754_v5, %v752_v55  ;;  %v760_v11 = vrot.slane %v758_v6, 1  ;;  %v5991_v6 = vld [vmem:[%s6606_s18 + $0x38] sm:$0xff] }
  0x8b   : > { %479 = vmatmul.bf16.gmra.mxu0 %v5885_v7  ;;  %v5936_v7 = vld [vmem:[%s6606_s18 + $0x18] sm:$0xff] }
  0x8c   : > { %v1308_v12 = vrot.slane %v5936_v7, 1  ;;  %v761_v15 = vsel %vm733_vm1, %v756_v10, %v760_v11  ;;  %v764_v31 = vor.u32 %v762_v24, %v760_v11  ;;  %v2272_v10 = vshrl.u32 %v5991_v6, 16  ;;  %v5967_v24 = vld [vmem:[%s6606_s18 + $0x48] sm:$0xff] }
  0x8d   : > { %v2275_v11 = vshll.u32 %v5991_v6, 16  ;;  %v1777_v6 = vrot.slane %v5968_v61, 1  ;;  %v6084_v61 = vld [vmem:[#allocation6 + $0x1d8] sm:$0xff] }
  0x8e   : > { %v1309_v16 = vsel %vm1302_vm0, %v1306_v56, %v1308_v12  ;;  %v1311_v39 = vsel %vm1302_vm0, %v1308_v12, %v1310_v33 }
  0x8f   : > { %v2277_v19 = vrot.slane %v2275_v11, 2 }
  0x98   : > { %956 = vmatmul.bf16.vlgmr.msrb.gmra.mxu1 %v745_v37  ;;  %1414 = vmatmul.bf16.vlgmr.msrb.gmra.mxu2 %v1305_v38  ;;  %v769_v38 = vsel %vm733_vm1, %v764_v31, %v768_v32  ;;  %v1775_v31 = vrot.slane %v5967_v24, 1  ;;  %v6085_v32 = vld [vmem:[#allocation6 + $0x1e0] sm:$0xff] }
  0x99   : > { %3963 = vmatpush.bf16.msra.mxu3 %v6085_v32  ;;  %v5941_v24 = vld [vmem:[%s6606_s18 + $0x40] sm:$0xff] }
  0x9a   : > { %1881 = vmatmul.bf16.gmra.mxu3 %v1766_v43  ;;  %v5990_v43 = vld [vmem:[%s6606_s18 + $0x30] sm:$0xff] }
  0x9b   : > { %2462 = vmatmul.bf16.vlgmr.msrb.gmra.mxu0 %v2234_v40  ;;  %v1771_v40 = vrot.slane %v5965_v34, 1  ;;  %v2263_v47 = vshrl.u32 %v5990_v43, 16  ;;  %v2266_v48 = vshll.u32 %v5990_v43, 16 }
  0x9d   : > { %v1772_v45 = vsel %vm1302_vm0, %v1769_v17, %v1771_v40  ;;  %v2265_v55 = vrot.slane %v2263_v47, 1  ;;  %v2268_v56 = vrot.slane %v2266_v48, 2  ;;  %v1774_v9 = vsel %vm1302_vm0, %v1771_v40, %v1773_v3  ;;  %v5940_v48 = vld [vmem:[%s6606_s18 + $0x38] sm:$0xff]  ;;  %3964 = vmatpush.bf16.msra.mxu3 %v6084_v61 }
  0x9e   : > { %v1776_v40 = vsel %vm1302_vm0, %v1773_v3, %v1775_v31 }
  0x9f   : > { %v2269_v62 = vor.u32 %v2268_v56, %v2265_v55 }
  0xa1   : > { %v2270_v5 = vsel %vm2217_vm2, %v2260_v35, %v2269_v62  ;;  %v5992_v35 = vld [vmem:[%s6606_s18 + $0x40] sm:$0xff] }
  0xa2   : > { %v2284_v43 = vshll.u32 %v5992_v35, 16 }
  0xa4   : > { %v2286_v55 = vrot.slane %v2284_v43, 2 }
  0xa8   : > { %961 = vmatmul.bf16.gmra.mxu1 %v753_v59  ;;  %1419 = vmatmul.bf16.gmra.mxu2 %v1307_v60  ;;  %v776_v59 = vrot.slane %v774_v52, 1  ;;  %v1312_v60 = vrot.slane %v5938_v53, 1 }
  0xaa   : > { %1886 = vmatmul.bf16.gmra.mxu3 %v1768_v2  ;;  %v777_v1 = vsel %vm733_vm1, %v772_v58, %v776_v59  ;;  %v1313_v2 = vsel %vm1302_vm0, %v1310_v33, %v1312_v60 }
  0xab   : > { %2467 = vmatmul.bf16.gmra.mxu0 %v2243_v63 }
  0xb8   : > { %966 = vmatmul.bf16.gmra.mxu1 %v761_v15  ;;  %1424 = vmatmul.bf16.gmra.mxu2 %v1309_v16  ;;  %v782_v15 = vshll.u32 %v5913_v8, 16  ;;  %v5939_v16 = vld [vmem:[%s6606_s18 + $0x30] sm:$0xff] }
  0xb9   : > { %v1314_v23 = vrot.slane %v5939_v16, 1 }
  0xba   : > { %1891 = vmatmul.bf16.gmra.mxu3 %v1770_v21  ;;  %v780_v21 = vor.u32 %v778_v14, %v776_v59  ;;  %v784_v22 = vrot.slane %v782_v15, 1  ;;  %v5915_v14 = vld [vmem:[%s6606_s18 + $0x40] sm:$0xff]  ;;  %v1778_v15 = vsel %vm1302_vm0, %v1775_v31, %v1777_v6 }
  0xbb   : > { %2472 = vmatmul.bf16.gmra.mxu0 %v2252_v18  ;;  %v2274_v18 = vrot.slane %v2272_v10, 1  ;;  %v1315_v30 = vsel %vm1302_vm0, %v1312_v60, %v1314_v23  ;;  %v1316_v60 = vrot.slane %v5940_v48, 1  ;;  %v5993_v10 = vld [vmem:[%s6606_s18 + $0x48] sm:$0xff] }
  0xbc   : > { %v785_v29 = vsel %vm733_vm1, %v780_v21, %v784_v22  ;;  %v788_v58 = vor.u32 %v786_v46, %v784_v22  ;;  %v2290_v16 = vshrl.u32 %v5993_v10, 16 }
  0xbd   : > { %v2278_v25 = vor.u32 %v2277_v19, %v2274_v18  ;;  %v2293_v18 = vshll.u32 %v5993_v10, 16 }
  0xbe   : > { %v2292_v27 = vrot.slane %v2290_v16, 1 }
  0xbf   : > { %v2279_v34 = vsel %vm2217_vm2, %v2269_v62, %v2278_v25 }
  0xc5   : > { %v6673_v37 = vpop.f32.mrf.mxu1 }
  0xc8   : > { %v6677_v41 = vpop.f32.mrf.mxu0  ;;  %971 = vmatmul.bf16.gmra.mxu1 %v769_v38  ;;  %1429 = vmatmul.bf16.gmra.mxu2 %v1311_v39  ;;  %v6033_v38 = vld [vmem:[#allocation6 + $0x160] sm:$0xff]  ;;  %v5914_v39 = vld [vmem:[%s6606_s18 + $0x38] sm:$0xff] }
  0xc9   : > { %2915 = vmatpush.bf16.msra.mxu1 %v6033_v38  ;;  %v790_v47 = vshll.u32 %v5914_v39, 16  ;;  %v794_v22 = vshrl.u32 %v5914_v39, 16 }
  0xca   : > { %1896 = vmatmul.bf16.gmra.mxu3 %v1772_v45 }
  0xcb   : > { %2477 = vmatmul.bf16.gmra.mxu0 %v2261_v42  ;;  %v6683_v49 = vpop.f32.mrf.mxu2  ;;  %v2281_v42 = vshrl.u32 %v5992_v35, 16  ;;  %v792_v59 = vrot.slane %v790_v47, 1  ;;  %v5969_v35 = vld [vmem:[%s6606_s18 + $0x58] sm:$0xff] }
  0xcc   : > { %v1779_v46 = vrot.slane %v5969_v35, 1  ;;  %v5970_v35 = vld [vmem:[%s6606_s18 + $0x60] sm:$0xff] }
  0xcd   : > { %v6685_v50 = vpop.f32.mrf.mxu1  ;;  %v6690_v57 = vpop.f32.mrf.mxu3  ;;  %v2283_v53 = vrot.slane %v2281_v42, 1  ;;  %v793_v3 = vsel %vm733_vm1, %v788_v58, %v792_v59  ;;  %v796_v32 = vor.u32 %v794_v22, %v792_v59  ;;  %v5916_v58 = vld [vmem:[%s6606_s18 + $0x48] sm:$0xff] }
  0xce   : > { %v1780_v59 = vsel %vm1302_vm0, %v1777_v6, %v1779_v46  ;;  %v806_v10 = vshll.u32 %v5916_v58, 16  ;;  %v6110_v6 = vld [vmem:[#allocation6 + $0x218] sm:$0xff] }
  0xcf   : > { %v2287_v62 = vor.u32 %v2286_v55, %v2283_v53  ;;  %v6058_v55 = vld [vmem:[#allocation6 + $0x198] sm:$0xff]  ;;  %4422 = vmatpush.bf16.msra.mxu0 %v6110_v6 }
  0xd0   : > { %v6688_v54 = vpop.f32.mrf.mxu0  ;;  %3373 = vmatpush.bf16.msra.mxu2 %v6058_v55  ;;  %v1781_v55 = vrot.slane %v5970_v35, 1 }
  0xd3   : > { %v6693_v63 = vpop.f32.mrf.mxu2 }
  0xd5   : > { %v6695_v0 = vpop.f32.mrf.mxu1  ;;  %v6703_v7 = vpop.f32.mrf.mxu3 }
  0xd8   : > { %v6699_v4 = vpop.f32.mrf.mxu0  ;;  %976 = vmatmul.bf16.gmra.mxu1 %v777_v1  ;;  %1434 = vmatmul.bf16.gmra.mxu2 %v1313_v2 }
  0xda   : > { %1901 = vmatmul.bf16.gmra.mxu3 %v1774_v9  ;;  %v2288_v9 = vsel %vm2217_vm2, %v2278_v25, %v2287_v62 }
  0xdb   : > { %2482 = vmatmul.bf16.gmra.mxu0 %v2270_v5  ;;  %v6707_v12 = vpop.f32.mrf.mxu2  ;;  %v1317_v5 = vsel %vm1302_vm0, %v1314_v23, %v1316_v60  ;;  %v798_v23 = vshll.u32 %v5915_v14, 16 }
  0xdd   : > { %v6709_v13 = vpop.f32.mrf.mxu1  ;;  %v6714_v20 = vpop.f32.mrf.mxu3  ;;  %v800_v31 = vrot.slane %v798_v23, 1  ;;  %v6032_v23 = vld [vmem:[#allocation6 + $0x158] sm:$0xff] }
  0xde   : > { %2916 = vmatpush.bf16.msra.mxu1 %v6032_v23  ;;  %v810_v23 = vshrl.u32 %v5916_v58, 16 }
  0xdf   : > { %v801_v39 = vsel %vm733_vm1, %v796_v32, %v800_v31 }
  0xe0   : > { %v6712_v17 = vpop.f32.mrf.mxu0 }
  0xe3   : > { %v6717_v26 = vpop.f32.mrf.mxu2 }
  0xe5   : > { %v6719_v28 = vpop.f32.mrf.mxu1  ;;  %v6727_v36 = vpop.f32.mrf.mxu3 }
  0xe8   : > { %v6723_v33 = vpop.f32.mrf.mxu0  ;;  %981 = vmatmul.bf16.gmra.mxu1 %v785_v29  ;;  %1439 = vmatmul.bf16.gmra.mxu2 %v1315_v30  ;;  %v2295_v29 = vrot.slane %v2293_v18, 2 }
  0xea   : > { %1906 = vmatmul.bf16.gmra.mxu3 %v1776_v40  ;;  %v2296_v38 = vor.u32 %v2295_v29, %v2292_v27  ;;  %v808_v29 = vrot.slane %v806_v10, 1 }
  0xeb   : > { %2487 = vmatmul.bf16.gmra.mxu0 %v2279_v34  ;;  %v6731_v44 = vpop.f32.mrf.mxu2  ;;  %v1318_v34 = vrot.slane %v5941_v24, 1 }
  0xec   : > { %v2297_v48 = vsel %vm2217_vm2, %v2287_v62, %v2296_v38 }
  0xed   : > { %v6733_v45 = vpop.f32.mrf.mxu1  ;;  %v6738_v56 = vpop.f32.mrf.mxu3  ;;  %v1319_v43 = vsel %vm1302_vm0, %v1316_v60, %v1318_v34 }
  0xf0   : > { %v6736_v52 = vpop.f32.mrf.mxu0 }
  0xf3   : > { %v6741_v1 = vpop.f32.mrf.mxu2 }
  0xf5   : > { %v6743_v2 = vpop.f32.mrf.mxu1  ;;  %v6751_v11 = vpop.f32.mrf.mxu3 }
  0xf6   : > { %7561 = vst [vmem:[#allocation12_spill] sm:$0xff] %v6751_v11 }
  0xf8   : > { %v6747_v8 = vpop.f32.mrf.mxu0  ;;  %986 = vmatmul.bf16.gmra.mxu1 %v793_v3  ;;  %1444 = vmatmul.bf16.gmra.mxu2 %v1317_v5  ;;  %v2299_v3 = vshrl.u32 %v5994_v51, 16  ;;  %v2302_v5 = vshll.u32 %v5994_v51, 16 }
  0xfa   : > { %1911 = vmatmul.bf16.gmra.mxu3 %v1778_v15  ;;  %v5942_v15 = vld [vmem:[%s6606_s18 + $0x48] sm:$0xff]  ;;  %v2301_v18 = vrot.slane %v2299_v3, 1  ;;  %v2304_v22 = vrot.slane %v2302_v5, 2  ;;  %v5995_v3 = vld [vmem:[%s6606_s18 + $0x58] sm:$0xff] }
  0xfb   : > { %2492 = vmatmul.bf16.gmra.mxu0 %v2288_v9  ;;  %v6755_v19 = vpop.f32.mrf.mxu2  ;;  %v802_v9 = vshrl.u32 %v5915_v14, 16  ;;  %v1320_v32 = vrot.slane %v5942_v15, 1  ;;  %v2308_v15 = vshrl.u32 %v5995_v3, 16 }
  0xfd   : > { %v6757_v21 = vpop.f32.mrf.mxu1  ;;  %v6762_v30 = vpop.f32.mrf.mxu3  ;;  %v804_v27 = vor.u32 %v802_v9, %v800_v31  ;;  %v1321_v51 = vsel %vm1302_vm0, %v1318_v34, %v1320_v32  ;;  %v6798_v31 = vld [vmem:[%s6606_s18 + $0x50] sm:$0xff]  ;;  %v1782_v9 = vsel %vm1302_vm0, %v1779_v46, %v1781_v55 }
  0xfe   : > { %v814_v6 = vshll.u32 %v6798_v31, 16 }
 0x100   : > { %v6760_v25 = vpop.f32.mrf.mxu0 }
 0x103   : > { %v6765_v40 = vpop.f32.mrf.mxu2 }
 0x105   : > { %v6767_v42 = vpop.f32.mrf.mxu1  ;;  %v6775_v53 = vpop.f32.mrf.mxu3 }
 0x108   : > { %v6771_v47 = vpop.f32.mrf.mxu0  ;;  %991 = vmatmul.bf16.gmra.mxu1 %v801_v39  ;;  %1449 = vmatmul.bf16.gmra.mxu2 %v1319_v43  ;;  %v2305_v39 = vor.u32 %v2304_v22, %v2301_v18  ;;  %v2311_v18 = vshll.u32 %v5995_v3, 16  ;;  %v816_v3 = vrot.slane %v814_v6, 1 }
 0x10a   : > { %1916 = vmatmul.bf16.gmra.mxu3 %v1780_v59  ;;  %v2306_v61 = vsel %vm2217_vm2, %v2296_v38, %v2305_v39 }
 0x10b   : > { %2497 = vmatmul.bf16.gmra.mxu0 %v2297_v48  ;;  %v6779_v60 = vpop.f32.mrf.mxu2  ;;  %v809_v48 = vsel %vm733_vm1, %v804_v27, %v808_v29  ;;  %v6804_v27 = vld [vmem:[%s6606_s18 + $0x50] sm:$0xff] }
 0x10d   : > { %v6781_v62 = vpop.f32.mrf.mxu1  ;;  %v6786_v24 = vpop.f32.mrf.mxu3 }
 0x110   : > { %v6784_v16 = vpop.f32.mrf.mxu0 }
 0x113   : > { %v6789_v14 = vpop.f32.mrf.mxu2 }
 0x115   : > { %v957_v43 = vpop.f32.mrf.mxu1  ;;  %v6795_v5 = vpop.f32.mrf.mxu3 }
 0x116   : > { %v1083_v10 = vadd.f32 %v957_v43, %v6677_v41  ;;  %v812_v43 = vor.u32 %v810_v23, %v808_v29 }
 0x118   : > { %v2463_v59 = vpop.f32.mrf.mxu0  ;;  %996 = vmatmul.bf16.gmra.mxu1 %v809_v48  ;;  %1454 = vmatmul.bf16.gmra.mxu2 %v1321_v51  ;;  %v2310_v51 = vrot.slane %v2308_v15, 1  ;;  %v817_v15 = vsel %vm733_vm1, %v812_v43, %v816_v3 }
 0x11a   : > { %1921 = vmatmul.bf16.gmra.mxu3 %v1782_v9  ;;  %v1322_v9 = vrot.slane %v6804_v27, 1  ;;  %v5996_v27 = vld [vmem:[%s6606_s18 + $0x60] sm:$0xff] }
 0x11b   : > { %2502 = vmatmul.bf16.gmra.mxu0 %v2306_v61  ;;  %v1415_v34 = vpop.f32.mrf.mxu2  ;;  %v2313_v61 = vrot.slane %v2311_v18, 2 }
 0x11c   : > { %v1541_v22 = vadd.f32 %v1415_v34, %v1083_v10  ;;  %v6813_v10 = vld [vmem:[%s6606_s18 + $0x68] sm:$0xff]  ;;  %v1323_v18 = vsel %vm1302_vm0, %v1320_v32, %v1322_v9 }
 0x11d   : > { %v959_v38 = vpop.f32.mrf.mxu1  ;;  %v6807_v46 = vpop.f32.mrf.mxu3  ;;  %v2314_v34 = vor.u32 %v2313_v61, %v2310_v51  ;;  %v2317_v51 = vshrl.u32 %v5996_v27, 16 }
 0x11e   : > { %v1998_v35 = vadd.f32 %v6762_v30, %v1541_v22  ;;  %v1084_v58 = vadd.f32 %v959_v38, %v6688_v54 }
 0x11f   : > { %v2315_v6 = vsel %vm2217_vm2, %v2305_v39, %v2314_v34 }
 0x120   : > { %v2465_v48 = vpop.f32.mrf.mxu0  ;;  %v6809_v41 = vadd.f32 %v2463_v59, %v1998_v35  ;;  %v1783_v59 = vrot.slane %v6813_v10, 1  ;;  %v818_v10 = vshrl.u32 %v6798_v31, 16 }
 0x122   : > { %7562 = vst [vmem:[#allocation13_spill] sm:$0xff] %v6809_v41  ;;  %v1784_v32 = vsel %vm1302_vm0, %v1781_v55, %v1783_v59  ;;  %v820_v31 = vor.u32 %v818_v10, %v816_v3 }
 0x123   : > { %v1417_v11 = vpop.f32.mrf.mxu2 }
 0x124   : > { %v1542_v30 = vadd.f32 %v1417_v11, %v1084_v58  ;;  %v6827_v11 = vld [vmem:[%s6606_s18 + $0x58] sm:$0xff] }
 0x125   : > { %v962_v22 = vpop.f32.mrf.mxu1  ;;  %v6822_v35 = vpop.f32.mrf.mxu3  ;;  %v822_v58 = vshll.u32 %v6827_v11, 16 }
 0x126   : > { %v1999_v29 = vadd.f32 %v6775_v53, %v1542_v30  ;;  %v1085_v38 = vadd.f32 %v962_v22, %v6699_v4  ;;  %v2320_v53 = vshll.u32 %v5996_v27, 16  ;;  %v6834_v30 = vld [vmem:[%s6606_s18 + $0x58] sm:$0xff] }
 0x127   : > { %v6083_v4 = vld [vmem:[#allocation6 + $0x1d0] sm:$0xff] }
 0x128   : > { %v2468_v23 = vpop.f32.mrf.mxu0  ;;  %1001 = vmatmul.bf16.gmra.mxu1 %v817_v15  ;;  %1459 = vmatmul.bf16.gmra.mxu2 %v1323_v18  ;;  %v6824_v54 = vadd.f32 %v2465_v48, %v1999_v29  ;;  %v2319_v18 = vrot.slane %v2317_v51, 1  ;;  %v2322_v55 = vrot.slane %v2320_v53, 2  ;;  %v6057_v29 = vld [vmem:[#allocation6 + $0x190] sm:$0xff] }
 0x129   : > { %v6031_v22 = vld [vmem:[#allocation6 + $0x150] sm:$0xff]  ;;  %3374 = vmatpush.bf16.msra.mxu2 %v6057_v29  ;;  %3965 = vmatpush.bf16.msra.mxu3 %v6083_v4 }
 0x12a   : > { %7563 = vst [vmem:[#allocation14_spill] sm:$0xff] %v6824_v54  ;;  %1926 = vmatmul.bf16.gmra.mxu3 %v1784_v32  ;;  %v824_v32 = vrot.slane %v822_v58, 1  ;;  %2917 = vmatpush.bf16.msra.mxu1 %v6031_v22  ;;  %v2323_v51 = vor.u32 %v2322_v55, %v2319_v18 }
 0x12b   : > { %2507 = vmatmul.bf16.gmra.mxu0 %v2315_v6  ;;  %v1420_v61 = vpop.f32.mrf.mxu2 }
 0x12c   : > { %v1543_v43 = vadd.f32 %v1420_v61, %v1085_v38  ;;  %v1324_v38 = vrot.slane %v6834_v30, 1  ;;  %v5972_v61 = vld [vmem:[%s6606_s18 + $0x70] sm:$0xff]  ;;  %v825_v41 = vsel %vm733_vm1, %v820_v31, %v824_v32  ;;  %v2324_v58 = vsel %vm2217_vm2, %v2314_v34, %v2323_v51  ;;  %v5997_v30 = vld [vmem:[%s6606_s18 + $0x68] sm:$0xff] }
 0x12d   : > { %v964_v39 = vpop.f32.mrf.mxu1  ;;  %v6837_v6 = vpop.f32.mrf.mxu3  ;;  %v2329_v55 = vshll.u32 %v5997_v30, 16 }
 0x12e   : > { %v2000_v48 = vadd.f32 %v6786_v24, %v1543_v43  ;;  %v1086_v24 = vadd.f32 %v964_v39, %v6712_v17  ;;  %v1325_v29 = vsel %vm1302_vm0, %v1322_v9, %v1324_v38  ;;  %v6854_v39 = vld [vmem:[%s6606_s18 + $0x60] sm:$0xff] }
 0x130   : > { %v2470_v15 = vpop.f32.mrf.mxu0  ;;  %v6839_v27 = vadd.f32 %v2468_v23, %v2000_v48  ;;  %v1785_v23 = vrot.slane %v5972_v61, 1  ;;  %v6109_v48 = vld [vmem:[#allocation6 + $0x210] sm:$0xff]  ;;  %v5945_v61 = vld [vmem:[%s6606_s18 + $0x60] sm:$0xff] }
 0x131   : > { %4423 = vmatpush.bf16.msra.mxu0 %v6109_v48 }
 0x132   : > { %v1786_v9 = vsel %vm1302_vm0, %v1783_v59, %v1785_v23  ;;  %v2331_v59 = vrot.slane %v2329_v55, 2 }
 0x133   : > { %v1422_v53 = vpop.f32.mrf.mxu2 }
 0x134   : > { %v1544_v43 = vadd.f32 %v1422_v53, %v1086_v24 }
 0x135   : > { %v967_v54 = vpop.f32.mrf.mxu1  ;;  %v6849_v4 = vpop.f32.mrf.mxu3 }
 0x136   : > { %v2001_v3 = vadd.f32 %v6795_v5, %v1544_v43  ;;  %v1087_v18 = vadd.f32 %v967_v54, %v6723_v33  ;;  %v2326_v5 = vshrl.u32 %v5997_v30, 16  ;;  %v6867_v30 = vld [vmem:[%s6606_s18 + $0x78] sm:$0xff] }
 0x138   : > { %v2473_v10 = vpop.f32.mrf.mxu0  ;;  %1006 = vmatmul.bf16.gmra.mxu1 %v825_v41  ;;  %1464 = vmatmul.bf16.gmra.mxu2 %v1325_v29  ;;  %v6851_v17 = vadd.f32 %v2470_v15, %v2001_v3  ;;  %v826_v41 = vshrl.u32 %v6827_v11, 16  ;;  %v830_v15 = vshll.u32 %v6854_v39, 16  ;;  %v2328_v43 = vrot.slane %v2326_v5, 1 }
 0x13a   : > { %1931 = vmatmul.bf16.gmra.mxu3 %v1786_v9  ;;  %v828_v54 = vor.u32 %v826_v41, %v824_v32  ;;  %v832_v3 = vrot.slane %v830_v15, 1  ;;  %v2332_v48 = vor.u32 %v2331_v59, %v2328_v43  ;;  %v5998_v41 = vld [vmem:[%s6606_s18 + $0x70] sm:$0xff] }
 0x13b   : > { %2512 = vmatmul.bf16.gmra.mxu0 %v2324_v58  ;;  %v1425_v34 = vpop.f32.mrf.mxu2  ;;  %v1326_v58 = vrot.slane %v5945_v61, 1 }
 0x13c   : > { %v1545_v22 = vadd.f32 %v1425_v34, %v1087_v18  ;;  %v833_v5 = vsel %vm733_vm1, %v828_v54, %v832_v3  ;;  %v834_v54 = vshrl.u32 %v6854_v39, 16 }
 0x13d   : > { %v969_v31 = vpop.f32.mrf.mxu1  ;;  %v6862_v29 = vpop.f32.mrf.mxu3  ;;  %v1327_v55 = vsel %vm1302_vm0, %v1324_v38, %v1326_v58 }
 0x13e   : > { %v2002_v24 = vadd.f32 %v6807_v46, %v1545_v22  ;;  %v1088_v11 = vadd.f32 %v969_v31, %v6736_v52  ;;  %v2333_v22 = vsel %vm2217_vm2, %v2323_v51, %v2332_v48  ;;  %v6881_v31 = vld [vmem:[%s6606_s18 + $0x68] sm:$0xff]  ;;  %v836_v39 = vor.u32 %v834_v54, %v832_v3 }
 0x140   : > { %v2475_v53 = vpop.f32.mrf.mxu0  ;;  %v6864_v33 = vadd.f32 %v2473_v10, %v2002_v24  ;;  %v1787_v10 = vrot.slane %v6867_v30, 1  ;;  %v2335_v24 = vshrl.u32 %v5998_v41, 16  ;;  %v838_v30 = vshll.u32 %v6881_v31, 16 }
 0x142   : > { %v1788_v38 = vsel %vm1302_vm0, %v1785_v23, %v1787_v10 }
 0x143   : > { %v1427_v9 = vpop.f32.mrf.mxu2 }
 0x144   : > { %v1546_v18 = vadd.f32 %v1427_v9, %v1088_v11 }
 0x145   : > { %v972_v46 = vpop.f32.mrf.mxu1  ;;  %v6876_v15 = vpop.f32.mrf.mxu3 }
 0x146   : > { %v2003_v34 = vadd.f32 %v6822_v35, %v1546_v18  ;;  %v1089_v61 = vadd.f32 %v972_v46, %v6747_v8  ;;  %v2338_v35 = vshll.u32 %v5998_v41, 16  ;;  %v2337_v18 = vrot.slane %v2335_v24, 1  ;;  %v6082_v8 = vld [vmem:[#allocation6 + $0x1c8] sm:$0xff]  ;;  %v6897_v41 = vld [vmem:[%s6606_s18 + $0x80] sm:$0xff] }
 0x147   : > { %3966 = vmatpush.bf16.msra.mxu3 %v6082_v8 }
 0x148   : > { %v2478_v32 = vpop.f32.mrf.mxu0  ;;  %1011 = vmatmul.bf16.gmra.mxu1 %v833_v5  ;;  %1469 = vmatmul.bf16.gmra.mxu2 %v1327_v55  ;;  %v6878_v52 = vadd.f32 %v2475_v53, %v2003_v34  ;;  %v6888_v53 = vld [vmem:[%s6606_s18 + $0x68] sm:$0xff]  ;;  %v2340_v23 = vrot.slane %v2338_v35, 2  ;;  %v840_v34 = vrot.slane %v838_v30, 1 }
 0x149   : > { %v6056_v5 = vld [vmem:[#allocation6 + $0x188] sm:$0xff] }
 0x14a   : > { %1936 = vmatmul.bf16.gmra.mxu3 %v1788_v38  ;;  %3375 = vmatpush.bf16.msra.mxu2 %v6056_v5  ;;  %v2341_v38 = vor.u32 %v2340_v23, %v2337_v18  ;;  %v6108_v18 = vld [vmem:[#allocation6 + $0x208] sm:$0xff] }
 0x14b   : > { %2517 = vmatmul.bf16.gmra.mxu0 %v2333_v22  ;;  %v1430_v43 = vpop.f32.mrf.mxu2  ;;  %v1328_v22 = vrot.slane %v6888_v53, 1  ;;  %v5999_v53 = vld [vmem:[%s6606_s18 + $0x78] sm:$0xff] }
 0x14c   : > { %v1547_v59 = vadd.f32 %v1430_v43, %v1089_v61  ;;  %v841_v43 = vsel %vm733_vm1, %v836_v39, %v840_v34  ;;  %v2342_v30 = vsel %vm2217_vm2, %v2332_v48, %v2341_v38  ;;  %v2344_v23 = vshrl.u32 %v5999_v53, 16  ;;  %4424 = vmatpush.bf16.msra.mxu0 %v6108_v18 }
 0x14d   : > { %v974_v51 = vpop.f32.mrf.mxu1  ;;  %v6891_v46 = vpop.f32.mrf.mxu3  ;;  %v2347_v8 = vshll.u32 %v5999_v53, 16 }
 0x14e   : > { %v2004_v11 = vadd.f32 %v6837_v6, %v1547_v59  ;;  %v1090_v6 = vadd.f32 %v974_v51, %v6760_v25  ;;  %v1329_v59 = vsel %vm1302_vm0, %v1326_v58, %v1328_v22  ;;  %v5921_v51 = vld [vmem:[%s6606_s18 + $0x70] sm:$0xff] }
 0x150   : > { %v2480_v9 = vpop.f32.mrf.mxu0  ;;  %v6893_v55 = vadd.f32 %v2478_v32, %v2004_v11  ;;  %v1789_v32 = vrot.slane %v6897_v41, 1  ;;  %v6030_v11 = vld [vmem:[#allocation6 + $0x148] sm:$0xff] }
 0x151   : > { %2918 = vmatpush.bf16.msra.mxu1 %v6030_v11  ;;  %v6921_v11 = vld [vmem:[%s6606_s18 + $0x88] sm:$0xff] }
 0x152   : > { %v1790_v58 = vsel %vm1302_vm0, %v1787_v10, %v1789_v32  ;;  %v2346_v10 = vrot.slane %v2344_v23, 1 }
 0x153   : > { %v1432_v61 = vpop.f32.mrf.mxu2 }
 0x154   : > { %v1548_v24 = vadd.f32 %v1432_v61, %v1090_v6  ;;  %v846_v6 = vshll.u32 %v5921_v51, 16  ;;  %v5947_v61 = vld [vmem:[%s6606_s18 + $0x70] sm:$0xff] }
 0x155   : > { %v977_v35 = vpop.f32.mrf.mxu1  ;;  %v6906_v5 = vpop.f32.mrf.mxu3  ;;  %v1330_v53 = vrot.slane %v5947_v61, 1 }
 0x156   : > { %v2005_v3 = vadd.f32 %v6849_v4, %v1548_v24  ;;  %v1091_v4 = vadd.f32 %v977_v35, %v6771_v47 }
 0x158   : > { %v2483_v54 = vpop.f32.mrf.mxu0  ;;  %1016 = vmatmul.bf16.gmra.mxu1 %v841_v43  ;;  %1474 = vmatmul.bf16.gmra.mxu2 %v1329_v59  ;;  %v6908_v25 = vadd.f32 %v2480_v9, %v2005_v3  ;;  %v842_v9 = vshrl.u32 %v6881_v31, 16  ;;  %v2349_v59 = vrot.slane %v2347_v8, 2  ;;  %v1331_v8 = vsel %vm1302_vm0, %v1328_v22, %v1330_v53 }
 0x15a   : > { %1941 = vmatmul.bf16.gmra.mxu3 %v1790_v58  ;;  %v844_v35 = vor.u32 %v842_v9, %v840_v34  ;;  %v2350_v31 = vor.u32 %v2349_v59, %v2346_v10  ;;  %v6000_v9 = vld [vmem:[%s6606_s18 + $0x80] sm:$0xff] }
 0x15b   : > { %2522 = vmatmul.bf16.gmra.mxu0 %v2342_v30  ;;  %v1435_v48 = vpop.f32.mrf.mxu2  ;;  %v848_v30 = vrot.slane %v846_v6, 1 }
 0x15c   : > { %v1549_v39 = vadd.f32 %v1435_v48, %v1091_v4 }
 0x15d   : > { %v979_v41 = vpop.f32.mrf.mxu1  ;;  %v6916_v3 = vpop.f32.mrf.mxu3  ;;  %v849_v23 = vsel %vm733_vm1, %v844_v35, %v848_v30  ;;  %v850_v35 = vshrl.u32 %v5921_v51, 16 }
 0x15e   : > { %v2006_v24 = vadd.f32 %v6862_v29, %v1549_v39  ;;  %v1092_v58 = vadd.f32 %v979_v41, %v6784_v16  ;;  %v2351_v39 = vsel %vm2217_vm2, %v2341_v38, %v2350_v31  ;;  %v6935_v41 = vld [vmem:[%s6606_s18 + $0x78] sm:$0xff] }
 0x160   : > { %v2485_v43 = vpop.f32.mrf.mxu0  ;;  %v6918_v47 = vadd.f32 %v2483_v54, %v2006_v24  ;;  %v1791_v54 = vrot.slane %v6921_v11, 1  ;;  %v2353_v24 = vshrl.u32 %v6000_v9, 16  ;;  %v854_v11 = vshll.u32 %v6935_v41, 16 }
 0x162   : > { %v1792_v22 = vsel %vm1302_vm0, %v1789_v32, %v1791_v54 }
 0x163   : > { %v1437_v18 = vpop.f32.mrf.mxu2 }
 0x164   : > { %v1550_v4 = vadd.f32 %v1437_v18, %v1092_v58  ;;  %v6941_v58 = vld [vmem:[%s6606_s18 + $0x78] sm:$0xff] }
 0x165   : > { %v982_v29 = vpop.f32.mrf.mxu1  ;;  %v6930_v6 = vpop.f32.mrf.mxu3 }
 0x166   : > { %v2007_v48 = vadd.f32 %v6876_v15, %v1550_v4  ;;  %v1093_v61 = vadd.f32 %v982_v29, %v6673_v37  ;;  %v2356_v15 = vshll.u32 %v6000_v9, 16  ;;  %v2355_v4 = vrot.slane %v2353_v24, 1 }
 0x167   : > { %v852_v29 = vor.u32 %v850_v35, %v848_v30  ;;  %v6001_v35 = vld [vmem:[%s6606_s18 + $0x88] sm:$0xff] }
 0x168   : > { %v2488_v34 = vpop.f32.mrf.mxu0  ;;  %1021 = vmatmul.bf16.gmra.mxu1 %v849_v23  ;;  %1479 = vmatmul.bf16.gmra.mxu2 %v1331_v8  ;;  %v6932_v16 = vadd.f32 %v2485_v43, %v2007_v48  ;;  %v2358_v23 = vrot.slane %v2356_v15, 2  ;;  %v856_v8 = vrot.slane %v854_v11, 1  ;;  %v1332_v48 = vrot.slane %v6941_v58, 1  ;;  %v6055_v11 = vld [vmem:[#allocation6 + $0x180] sm:$0xff] }
 0x169   : > { %v6029_v58 = vld [vmem:[#allocation6 + $0x140] sm:$0xff]  ;;  %3376 = vmatpush.bf16.msra.mxu2 %v6055_v11 }
 0x16a   : > { %7564 = vst [vmem:[#allocation15_spill] sm:$0xff] %v6932_v16  ;;  %1946 = vmatmul.bf16.gmra.mxu3 %v1792_v22  ;;  %v2359_v9 = vor.u32 %v2358_v23, %v2355_v4  ;;  %v857_v24 = vsel %vm733_vm1, %v852_v29, %v856_v8  ;;  %v1333_v15 = vsel %vm1302_vm0, %v1330_v53, %v1332_v48  ;;  %v6964_v53 = vld [vmem:[%s6606_s18 + $0x80] sm:$0xff]  ;;  %v2362_v4 = vshrl.u32 %v6001_v35, 16  ;;  %v1649_v29 = vld [vmem:[%s6606_s18 + $0x98] sm:$0x1] }
 0x16b   : > { %2527 = vmatmul.bf16.gmra.mxu0 %v2351_v39  ;;  %v1440_v10 = vpop.f32.mrf.mxu2  ;;  %v6950_v39 = vld [vmem:[%s6606_s18 + $0x90] sm:$0xff]  ;;  %v2365_v23 = vshll.u32 %v6001_v35, 16  ;;  %2919 = vmatpush.bf16.msra.mxu1 %v6029_v58  ;;  %v6107_v35 = vld [vmem:[#allocation6 + $0x200] sm:$0xff] }
 0x16c   : > { %v1551_v38 = vadd.f32 %v1440_v10, %v1093_v61  ;;  %4425 = vmatpush.bf16.msra.mxu0 %v6107_v35 }
 0x16d   : > { %v984_v59 = vpop.f32.mrf.mxu1  ;;  %v6944_v32 = vpop.f32.mrf.mxu3 }
 0x16e   : > { %v2008_v43 = vadd.f32 %v6891_v46, %v1551_v38  ;;  %v1094_v51 = vadd.f32 %v984_v59, %v6685_v50  ;;  %v2360_v38 = vsel %vm2217_vm2, %v2350_v31, %v2359_v9  ;;  %v6081_v50 = vld [vmem:[#allocation6 + $0x1c0] sm:$0xff] }
 0x16f   : > { %3967 = vmatpush.bf16.msra.mxu3 %v6081_v50 }
 0x170   : > { %v2490_v18 = vpop.f32.mrf.mxu0  ;;  %v6946_v37 = vadd.f32 %v2488_v34, %v2008_v43  ;;  %v1793_v34 = vrot.slane %v6950_v39, 1 }
 0x172   : > { %7565 = vst [vmem:[#allocation16_spill] sm:$0xff] %v6946_v37 }
 0x173   : > { %v1442_v22 = vpop.f32.mrf.mxu2 }
 0x174   : > { %v1552_v61 = vadd.f32 %v1442_v22, %v1094_v51 }
 0x175   : > { %v987_v46 = vpop.f32.mrf.mxu1  ;;  %v6959_v59 = vpop.f32.mrf.mxu3 }
 0x176   : > { %v2009_v30 = vadd.f32 %v6906_v5, %v1552_v61  ;;  %v1794_v5 = vsel %vm1302_vm0, %v1791_v54, %v1793_v34  ;;  %v1095_v31 = vadd.f32 %v987_v46, %v6695_v0  ;;  %v858_v61 = vshrl.u32 %v6935_v41, 16 }
 0x177   : > { %v2364_v0 = vrot.slane %v2362_v4, 1  ;;  %v2367_v46 = vrot.slane %v2365_v23, 2 }
 0x178   : > { %v2493_v10 = vpop.f32.mrf.mxu0  ;;  %1026 = vmatmul.bf16.gmra.mxu1 %v857_v24  ;;  %1484 = vmatmul.bf16.gmra.mxu2 %v1333_v15  ;;  %v6961_v43 = vadd.f32 %v2490_v18, %v2009_v30  ;;  %v862_v24 = vshll.u32 %v6964_v53, 16  ;;  %v6974_v15 = vld [vmem:[%s6606_s18 + $0x80] sm:$0xff]  ;;  %v1740_v30 = vunpack.c.l.b16 %v1649_v29  ;;  %v860_v58 = vor.u32 %v858_v61, %v856_v8 }
 0x179   : > { %v1334_v41 = vrot.slane %v6974_v15, 1 }
 0x17a   : > { %7566 = vst [vmem:[#allocation17_spill] sm:$0xff] %v6961_v43  ;;  %1951 = vmatmul.bf16.gmra.mxu3 %v1794_v5  ;;  %v864_v5 = vrot.slane %v862_v24, 1 }
 0x17b   : > { %2532 = vmatmul.bf16.gmra.mxu0 %v2360_v38  ;;  %v1445_v51 = vpop.f32.mrf.mxu2 }
 0x17c   : > { %v1553_v22 = vadd.f32 %v1445_v51, %v1095_v31  ;;  %v1759_v31 = vpack.c.b16 %v1740_v30, %v1740_v30  ;;  %v6994_v30 = vld [vmem:[%s6606_s18 + $0x88] sm:$0xff] }
 0x17d   : > { %v989_v18 = vpop.f32.mrf.mxu1  ;;  %v6977_v11 = vpop.f32.mrf.mxu3 }
 0x17e   : > { %v2010_v54 = vadd.f32 %v6916_v3, %v1553_v22  ;;  %v1096_v29 = vadd.f32 %v989_v18, %v6709_v13  ;;  %v6983_v3 = vor.u32 %v2367_v46, %v2364_v0  ;;  %v865_v22 = vsel %vm733_vm1, %v860_v58, %v864_v5  ;;  %v6002_v13 = vld [vmem:[%s6606_s18 + $0x90] sm:$0xff] }
 0x17f   : > { %v1795_v8 = vrot.slane %v1759_v31, 1  ;;  %v6063_v0 = vld [vmem:[%s6606_s18 + $0x10] sm:$0xf0]  ;;  %v2371_v58 = vshrl.u32 %v6002_v13, 16  ;;  %v2374_v31 = vshll.u32 %v6002_v13, 16 }
 0x180   : > { %v2495_v38 = vpop.f32.mrf.mxu0  ;;  %v6979_v50 = vadd.f32 %v2493_v10, %v2010_v54  ;;  %v1335_v10 = vsel %vm1302_vm0, %v1332_v48, %v1334_v41  ;;  %v2369_v15 = vsel %vm2217_vm2, %v2359_v9, %v6983_v3  ;;  %v5672_v54 = vld [vmem:[%s6606_s18 + $0x10] sm:$0xc]  ;;  %v6064_v48 = vld [vmem:[%s6606_s18 + $0x18] sm:$0xff] }
 0x181   : > { %v5673_v35 = vor.u32 %v6063_v0, %v5672_v54  ;;  %v2376_v13 = vrot.slane %v2374_v31, 2  ;;  %v2106_v0 = vld [vmem:[%s6606_s18 + $0x98] sm:$0x3] }
 0x182   : > { %7567 = vst [vmem:[#allocation18_spill] sm:$0xff] %v6979_v50 }
 0x183   : > { %v1447_v4 = vpop.f32.mrf.mxu2  ;;  %v3725_v39 = vshrl.u32 %v5673_v35, 16 }
 0x184   : > { %v1554_v23 = vadd.f32 %v1447_v4, %v1096_v29 }
 0x185   : > { %v992_v51 = vpop.f32.mrf.mxu1  ;;  %v6991_v18 = vpop.f32.mrf.mxu3 }
 0x186   : > { %v2011_v61 = vadd.f32 %v6930_v6, %v1554_v23  ;;  %v1796_v6 = vsel %vm1302_vm0, %v1793_v34, %v1795_v8  ;;  %v1097_v9 = vadd.f32 %v992_v51, %v6719_v28  ;;  %v866_v23 = vshrl.u32 %v6964_v53, 16 }
 0x187   : > { %v3733_v34 = vshrl.u32 %v6064_v48, 16  ;;  %v3736_v8 = vshll.u32 %v6064_v48, 16  ;;  %v2373_v51 = vrot.slane %v2371_v58, 1  ;;  %v2197_v58 = vunpack.c.l.b16 %v2106_v0 }
 0x188   : > { %v2498_v24 = vpop.f32.mrf.mxu0  ;;  %1031 = vmatmul.bf16.gmra.mxu1 %v865_v22  ;;  %1489 = vmatmul.bf16.gmra.mxu2 %v1335_v10  ;;  %v6998_v46 = vadd.f32 %v2495_v38, %v2011_v61  ;;  %v870_v22 = vshll.u32 %v6994_v30, 16  ;;  %v7008_v38 = vld [vmem:[%s6606_s18 + $0x88] sm:$0xff]  ;;  %v3728_v61 = vshll.u32 %v5673_v35, 16  ;;  %v868_v53 = vor.u32 %v866_v23, %v864_v5 }
 0x189   : > { %v3735_v35 = vrot.slane %v3733_v34, 2  ;;  %v3738_v43 = vrot.slane %v3736_v8, 3  ;;  %v2377_v48 = vor.u32 %v2376_v13, %v2373_v51  ;;  %v2216_v8 = vpack.c.b16 %v2197_v58, %v2197_v58  ;;  %v6065_v13 = vld [vmem:[%s6606_s18 + $0x20] sm:$0xff] }
 0x18a   : > { %7568 = vst [vmem:[#allocation19_spill] sm:$0xff] %v6998_v46  ;;  %1956 = vmatmul.bf16.gmra.mxu3 %v1796_v6  ;;  %v3727_v6 = vrot.slane %v3725_v39, 2  ;;  %v3730_v50 = vrot.slane %v3728_v61, 3 }
 0x18b   : > { %2537 = vmatmul.bf16.gmra.mxu0 %v2369_v15  ;;  %v1450_v29 = vpop.f32.mrf.mxu2  ;;  %v3739_v39 = vor.u32 %v3738_v43, %v3735_v35  ;;  %v2383_v0 = vshll.u32 %v2216_v8, 16 }
 0x18c   : > { %v1555_v4 = vadd.f32 %v1450_v29, %v1097_v9  ;;  %v872_v9 = vrot.slane %v870_v22, 1  ;;  %v1336_v29 = vrot.slane %v7008_v38, 1  ;;  %v3731_v22 = vor.u32 %v3730_v50, %v3727_v6  ;;  %v5464_v38 = vld [vmem:[%s6606_s18 + $0x8] sm:$0xc] }
 0x18d   : > { %v994_v10 = vpop.f32.mrf.mxu1  ;;  %v7011_v54 = vpop.f32.mrf.mxu3  ;;  %v874_v6 = vshrl.u32 %v6994_v30, 16 }
 0x18e   : > { %v2012_v15 = vadd.f32 %v6944_v32, %v1555_v4  ;;  %v1098_v32 = vadd.f32 %v994_v10, %v6733_v45  ;;  %v622_v4 = vld [vmem:[%s6606_s18 + $0x90] sm:$0x1]  ;;  %v873_v16 = vsel %vm733_vm1, %v868_v53, %v872_v9  ;;  %v2378_v45 = vsel %vm2217_vm2, %v6983_v3, %v2377_v48 }
 0x18f   : > { %v713_v23 = vunpack.c.l.b16 %v622_v4  ;;  %v1191_v10 = vld [vmem:[%s6606_s18 + $0x90] sm:$0x1]  ;;  %v3740_v43 = vsel %vm3723_vm3, %v3731_v22, %v3739_v39  ;;  %v3745_v4 = vshll.u32 %v6065_v13, 16 }
 0x190   : > { %v2500_v28 = vpop.f32.mrf.mxu0  ;;  %v7015_v46 = vadd.f32 %v2498_v24, %v2012_v15  ;;  %v1337_v24 = vsel %vm1302_vm0, %v1334_v41, %v1336_v29  ;;  %v1282_v50 = vunpack.c.l.b16 %v1191_v10 }
 0x191   : > { %v732_v41 = vpack.c.b16 %v713_v23, %v713_v23  ;;  %v2385_v23 = vrot.slane %v2383_v0, 2  ;;  %v3747_v30 = vrot.slane %v3745_v4, 3 }
 0x193   : > { %v1452_v31 = vpop.f32.mrf.mxu2 }
 0x194   : > { %v1556_v37 = vadd.f32 %v1452_v31, %v1098_v32  ;;  %v1301_v32 = vpack.c.b16 %v1282_v50, %v1282_v50 }
 0x195   : > { %v997_v5 = vpop.f32.mrf.mxu1  ;;  %v7027_v15 = vpop.f32.mrf.mxu3 }
 0x196   : > { %v2013_v61 = vadd.f32 %v6959_v59, %v1556_v37  ;;  %v1099_v37 = vadd.f32 %v997_v5, %v6743_v2  ;;  %v2380_v59 = vshrl.u32 %v2216_v8, 16  ;;  %v876_v2 = vor.u32 %v874_v6, %v872_v9  ;;  %v6066_v6 = vld [vmem:[%s6606_s18 + $0x28] sm:$0xff] }
 0x198   : > { %v2503_v34 = vpop.f32.mrf.mxu0  ;;  %1036 = vmatmul.bf16.gmra.mxu1 %v873_v16  ;;  %1494 = vmatmul.bf16.gmra.mxu2 %v1337_v24  ;;  %v7029_v51 = vadd.f32 %v2500_v28, %v2013_v61  ;;  %v878_v16 = vshll.u32 %v732_v41, 16  ;;  %v3742_v28 = vshrl.u32 %v6065_v13, 16  ;;  %v2382_v24 = vrot.slane %v2380_v59, 1 }
 0x19a   : > { %3968 = vmatmul.bf16.vlgmr.msra.gmra.mxu3 %v3740_v43  ;;  %v880_v61 = vrot.slane %v878_v16, 1  ;;  %v3744_v10 = vrot.slane %v3742_v28, 2  ;;  %v2386_v41 = vor.u32 %v2385_v23, %v2382_v24  ;;  %v6037_v16 = vld [vmem:[%s6606_s18 + $0x10] sm:$0xf0]  ;;  %v7064_v23 = vld [vmem:[%s6606_s18 + $0x18] sm:$0xff] }
 0x19b   : > { %2542 = vmatmul.bf16.gmra.mxu0 %v2378_v45  ;;  %v1455_v3 = vpop.f32.mrf.mxu2  ;;  %v1338_v45 = vrot.slane %v1301_v32, 1  ;;  %v5776_v32 = vld [vmem:[%s6606_s18 + $0x10] sm:$0x8]  ;;  %v6089_v28 = vld [vmem:[%s6606_s18 + $0x10] sm:$0xf0] }
 0x19c   : > { %v1557_v53 = vadd.f32 %v1455_v3, %v1099_v37  ;;  %v881_v13 = vsel %vm733_vm1, %v876_v2, %v880_v61  ;;  %v2387_v59 = vsel %vm2217_vm2, %v2377_v48, %v2386_v41  ;;  %v3751_v61 = vshrl.u32 %v6066_v6, 16 }
 0x19d   : > { %v999_v35 = vpop.f32.mrf.mxu1  ;;  %v7036_v22 = vpop.f32.mrf.mxu3  ;;  %v1339_v9 = vsel %vm1302_vm0, %v1336_v29, %v1338_v45  ;;  %v6011_v29 = vld [vmem:[%s6606_s18 + $0x8] sm:$0xf0] }
 0x19e   : > { %v2014_v58 = vadd.f32 %v6977_v11, %v1557_v53  ;;  %v1100_v8 = vadd.f32 %v999_v35, %v6757_v21  ;;  %v5568_v35 = vld [vmem:[%s6606_s18 + $0x10] sm:$0xc] }
 0x19f   : > { %v5569_v2 = vor.u32 %v6037_v16, %v5568_v35 }
 0x1a0   : > { %v2505_v31 = vpop.f32.mrf.mxu0  ;;  %v7038_v5 = vadd.f32 %v2503_v34, %v2014_v58  ;;  %v3748_v34 = vor.u32 %v3747_v30, %v3744_v10  ;;  %v7061_v58 = vld [vmem:[%s6606_s18 + $0x10] sm:$0xff]  ;;  %v6090_v10 = vld [vmem:[%s6606_s18 + $0x18] sm:$0xff]  ;;  %v5777_v30 = vor.u32 %v6089_v28, %v5776_v32 }
 0x1a2   : > { %v3749_v53 = vsel %vm3723_vm3, %v3739_v39, %v3748_v34  ;;  %v3754_v39 = vshll.u32 %v6066_v6, 16 }
 0x1a3   : > { %v1457_v50 = vpop.f32.mrf.mxu2 }
 0x1a4   : > { %v1558_v43 = vadd.f32 %v1457_v50, %v1100_v8  ;;  %v2810_v50 = vrot.slane %v7061_v58, 2  ;;  %v6067_v58 = vld [vmem:[%s6606_s18 + $0x30] sm:$0xff] }
 0x1a5   : > { %v1002_v11 = vpop.f32.mrf.mxu1  ;;  %v7047_v0 = vpop.f32.mrf.mxu3 }
 0x1a6   : > { %v2015_v37 = vadd.f32 %v6991_v18, %v1558_v43  ;;  %v1101_v18 = vadd.f32 %v1002_v11, %v6767_v42  ;;  %v3266_v11 = vrot.slane %v5569_v2, 2  ;;  %v6013_v2 = vld [vmem:[%s6606_s18 + $0x18] sm:$0xff] }
 0x1a8   : > { %v2508_v21 = vpop.f32.mrf.mxu0  ;;  %1041 = vmatmul.bf16.gmra.mxu1 %v881_v13  ;;  %1499 = vmatmul.bf16.gmra.mxu2 %v1339_v9  ;;  %v7049_v3 = vadd.f32 %v2505_v31, %v2015_v37  ;;  %v5465_v31 = vor.u32 %v6011_v29, %v5464_v38  ;;  %v3267_v13 = vrot.slane %v7064_v23, 2  ;;  %v3753_v9 = vrot.slane %v3751_v61, 2  ;;  %v6039_v61 = vld [vmem:[%s6606_s18 + $0x20] sm:$0xff] }
 0x1a9   : > { %v3756_v37 = vrot.slane %v3754_v39, 3  ;;  %v4315_v38 = vrot.slane %v5777_v30, 3  ;;  %v3760_v39 = vshrl.u32 %v6067_v58, 16 }
 0x1aa   : > { %3973 = vmatmul.bf16.gmra.mxu3 %v3749_v53  ;;  %v2809_v41 = vrot.slane %v5465_v31, 2 }
 0x1ab   : > { %2547 = vmatmul.bf16.gmra.mxu0 %v2387_v59  ;;  %v1460_v48 = vpop.f32.mrf.mxu2  ;;  %v3757_v35 = vor.u32 %v3756_v37, %v3753_v9  ;;  %v3269_v9 = vrot.slane %v6039_v61, 2  ;;  %v3762_v37 = vrot.slane %v3760_v39, 2 }
 0x1ac   : > { %v1559_v4 = vadd.f32 %v1460_v48, %v1101_v18  ;;  %v2811_v18 = vsel %vm2808_vm4, %v2809_v41, %v2810_v50  ;;  %v6091_v41 = vld [vmem:[%s6606_s18 + $0x20] sm:$0xff] }
 0x1ad   : > { %v1004_v24 = vpop.f32.mrf.mxu1  ;;  %v7068_v8 = vpop.f32.mrf.mxu3 }
 0x1ae   : > { %v2016_v45 = vadd.f32 %v7011_v54, %v1559_v4  ;;  %v1102_v59 = vadd.f32 %v1004_v24, %v6781_v62  ;;  %v4316_v54 = vrot.slane %v6090_v10, 3  ;;  %v3758_v4 = vsel %vm3723_vm3, %v3748_v34, %v3757_v35 }
 0x1af   : > { %v2812_v34 = vrot.slane %v6013_v2, 2 }
 0x1b0   : > { %v2510_v42 = vpop.f32.mrf.mxu0  ;;  %v7071_v43 = vadd.f32 %v2508_v21, %v2016_v45  ;;  %v3268_v21 = vsel %vm2808_vm4, %v3266_v11, %v3267_v13  ;;  %v4317_v62 = vsel %vm4314_vm5, %v4315_v38, %v4316_v54  ;;  %v3763_v45 = vshll.u32 %v6067_v58, 16  ;;  %v6068_v58 = vld [vmem:[%s6606_s18 + $0x38] sm:$0xff] }
 0x1b1   : > { %v4318_v38 = vrot.slane %v6091_v41, 3  ;;  %v3772_v2 = vshll.u32 %v6068_v58, 16 }
 0x1b3   : > { %v1462_v29 = vpop.f32.mrf.mxu2 }
 0x1b4   : > { %v1560_v53 = vadd.f32 %v1462_v29, %v1102_v59 }
 0x1b5   : > { %v1007_v6 = vpop.f32.mrf.mxu1  ;;  %v7079_v32 = vpop.f32.mrf.mxu3 }
 0x1b6   : > { %v2017_v16 = vadd.f32 %v7027_v15, %v1560_v53  ;;  %v1103_v31 = vadd.f32 %v1007_v6, %v6683_v49  ;;  %v3765_v49 = vrot.slane %v3763_v45, 3  ;;  %v6092_v45 = vld [vmem:[%s6606_s18 + $0x28] sm:$0xff] }
 0x1b8   : > { %v2513_v48 = vpop.f32.mrf.mxu0  ;;  %2920 = vmatmul.bf16.vlgmr.msra.gmra.mxu1 %v2811_v18  ;;  %3377 = vmatmul.bf16.vlgmr.msra.gmra.mxu2 %v3268_v21  ;;  %v7081_v28 = vadd.f32 %v2510_v42, %v2017_v16  ;;  %v2813_v18 = vsel %vm2808_vm4, %v2810_v50, %v2812_v34  ;;  %v3766_v21 = vor.u32 %v3765_v49, %v3762_v37 }
 0x1ba   : > { %3978 = vmatmul.bf16.gmra.mxu3 %v3758_v4  ;;  %v3767_v50 = vsel %vm3723_vm3, %v3757_v35, %v3766_v21 }
 0x1bb   : > { %4426 = vmatmul.bf16.vlgmr.msra.gmra.mxu0 %v4317_v62  ;;  %v1465_v24 = vpop.f32.mrf.mxu2  ;;  %v4319_v62 = vsel %vm4314_vm5, %v4316_v54, %v4318_v38  ;;  %v3769_v54 = vshrl.u32 %v6068_v58, 16  ;;  %v6069_v58 = vld [vmem:[%s6606_s18 + $0x40] sm:$0xff] }
 0x1bc   : > { %v1561_v23 = vadd.f32 %v1465_v24, %v1103_v31 }
 0x1bd   : > { %v1009_v15 = vpop.f32.mrf.mxu1  ;;  %v7090_v42 = vpop.f32.mrf.mxu3  ;;  %v3771_v37 = vrot.slane %v3769_v54, 2 }
 0x1be   : > { %v2018_v10 = vadd.f32 %v7036_v22, %v1561_v23  ;;  %v1104_v59 = vadd.f32 %v1009_v15, %v6693_v63  ;;  %v3270_v22 = vsel %vm2808_vm4, %v3267_v13, %v3269_v9  ;;  %v6014_v23 = vld [vmem:[%s6606_s18 + $0x20] sm:$0xff]  ;;  %v6040_v15 = vld [vmem:[%s6606_s18 + $0x28] sm:$0xff] }
 0x1bf   : > { %v2814_v35 = vrot.slane %v6014_v23, 2  ;;  %v3271_v41 = vrot.slane %v6040_v15, 2  ;;  %v3781_v23 = vshll.u32 %v6069_v58, 16 }
 0x1c0   : > { %v2515_v30 = vpop.f32.mrf.mxu0  ;;  %v7092_v11 = vadd.f32 %v2513_v48, %v2018_v10 }
 0x1c3   : > { %v1467_v29 = vpop.f32.mrf.mxu2 }
 0x1c4   : > { %v1562_v53 = vadd.f32 %v1467_v29, %v1104_v59  ;;  %v4320_v59 = vrot.slane %v6092_v45, 3 }
 0x1c5   : > { %v1012_v6 = vpop.f32.mrf.mxu1  ;;  %v7099_v4 = vpop.f32.mrf.mxu3 }
 0x1c6   : > { %v2019_v16 = vadd.f32 %v7047_v0, %v1562_v53  ;;  %v1105_v13 = vadd.f32 %v1012_v6, %v6707_v12  ;;  %v3774_v12 = vrot.slane %v3772_v2, 3  ;;  %v6093_v2 = vld [vmem:[%s6606_s18 + $0x30] sm:$0xff] }
 0x1c8   : > { %v2518_v48 = vpop.f32.mrf.mxu0  ;;  %2925 = vmatmul.bf16.gmra.mxu1 %v2813_v18  ;;  %3382 = vmatmul.bf16.gmra.mxu2 %v3270_v22  ;;  %v7101_v63 = vadd.f32 %v2515_v30, %v2019_v16  ;;  %v2815_v18 = vsel %vm2808_vm4, %v2812_v34, %v2814_v35  ;;  %v3775_v22 = vor.u32 %v3774_v12, %v3771_v37 }
 0x1ca   : > { %3983 = vmatmul.bf16.gmra.mxu3 %v3767_v50  ;;  %v3776_v34 = vsel %vm3723_vm3, %v3766_v21, %v3775_v22 }
 0x1cb   : > { %4431 = vmatmul.bf16.gmra.mxu0 %v4319_v62  ;;  %v1470_v31 = vpop.f32.mrf.mxu2  ;;  %v4321_v62 = vsel %vm4314_vm5, %v4318_v38, %v4320_v59  ;;  %v3778_v38 = vshrl.u32 %v6069_v58, 16  ;;  %v6070_v58 = vld [vmem:[%s6606_s18 + $0x48] sm:$0xff] }
 0x1cc   : > { %v1563_v24 = vadd.f32 %v1470_v31, %v1105_v13 }
 0x1cd   : > { %v1014_v0 = vpop.f32.mrf.mxu1  ;;  %v7110_v10 = vpop.f32.mrf.mxu3  ;;  %v3780_v37 = vrot.slane %v3778_v38, 2 }
 0x1ce   : > { %v2020_v61 = vadd.f32 %v7068_v8, %v1563_v24  ;;  %v1106_v49 = vadd.f32 %v1014_v0, %v6717_v26  ;;  %v3272_v8 = vsel %vm2808_vm4, %v3269_v9, %v3271_v41  ;;  %v6015_v24 = vld [vmem:[%s6606_s18 + $0x28] sm:$0xff]  ;;  %v6041_v0 = vld [vmem:[%s6606_s18 + $0x30] sm:$0xff] }
 0x1cf   : > { %v2816_v21 = vrot.slane %v6015_v24, 2  ;;  %v3273_v45 = vrot.slane %v6041_v0, 2  ;;  %v3790_v24 = vshll.u32 %v6070_v58, 16 }
 0x1d0   : > { %v2520_v39 = vpop.f32.mrf.mxu0  ;;  %v7112_v30 = vadd.f32 %v2518_v48, %v2020_v61 }
 0x1d3   : > { %v1472_v29 = vpop.f32.mrf.mxu2 }
 0x1d4   : > { %v1564_v53 = vadd.f32 %v1472_v29, %v1106_v49  ;;  %v4322_v49 = vrot.slane %v6093_v2, 3 }
 0x1d5   : > { %v1017_v6 = vpop.f32.mrf.mxu1  ;;  %v7119_v50 = vpop.f32.mrf.mxu3 }
 0x1d6   : > { %v2021_v16 = vadd.f32 %v7079_v32, %v1564_v53  ;;  %v1107_v9 = vadd.f32 %v1017_v6, %v6731_v44  ;;  %v3783_v44 = vrot.slane %v3781_v23, 3  ;;  %v6094_v23 = vld [vmem:[%s6606_s18 + $0x38] sm:$0xff] }
 0x1d8   : > { %v2523_v48 = vpop.f32.mrf.mxu0  ;;  %2930 = vmatmul.bf16.gmra.mxu1 %v2815_v18  ;;  %3387 = vmatmul.bf16.gmra.mxu2 %v3272_v8  ;;  %v7121_v26 = vadd.f32 %v2520_v39, %v2021_v16  ;;  %v2817_v18 = vsel %vm2808_vm4, %v2814_v35, %v2816_v21  ;;  %v3784_v8 = vor.u32 %v3783_v44, %v3780_v37 }
 0x1da   : > { %3988 = vmatmul.bf16.gmra.mxu3 %v3776_v34  ;;  %v3785_v35 = vsel %vm3723_vm3, %v3775_v22, %v3784_v8 }
 0x1db   : > { %4436 = vmatmul.bf16.gmra.mxu0 %v4321_v62  ;;  %v1475_v13 = vpop.f32.mrf.mxu2  ;;  %v4323_v62 = vsel %vm4314_vm5, %v4320_v59, %v4322_v49  ;;  %v3787_v59 = vshrl.u32 %v6070_v58, 16  ;;  %v6071_v58 = vld [vmem:[%s6606_s18 + $0x50] sm:$0xff] }
 0x1dc   : > { %v1565_v31 = vadd.f32 %v1475_v13, %v1107_v9 }
 0x1dd   : > { %v1019_v32 = vpop.f32.mrf.mxu1  ;;  %v7130_v61 = vpop.f32.mrf.mxu3  ;;  %v3789_v37 = vrot.slane %v3787_v59, 2 }
 0x1de   : > { %v2022_v15 = vadd.f32 %v7090_v42, %v1565_v31  ;;  %v1108_v12 = vadd.f32 %v1019_v32, %v6741_v1  ;;  %v3274_v42 = vsel %vm2808_vm4, %v3271_v41, %v3273_v45  ;;  %v6016_v31 = vld [vmem:[%s6606_s18 + $0x30] sm:$0xff]  ;;  %v6042_v32 = vld [vmem:[%s6606_s18 + $0x38] sm:$0xff] }
 0x1df   : > { %v2818_v22 = vrot.slane %v6016_v31, 2  ;;  %v3275_v2 = vrot.slane %v6042_v32, 2  ;;  %v3799_v31 = vshll.u32 %v6071_v58, 16 }
 0x1e0   : > { %v2525_v54 = vpop.f32.mrf.mxu0  ;;  %v7132_v39 = vadd.f32 %v2523_v48, %v2022_v15 }
 0x1e3   : > { %v1477_v29 = vpop.f32.mrf.mxu2 }
 0x1e4   : > { %v1566_v53 = vadd.f32 %v1477_v29, %v1108_v12  ;;  %v4324_v12 = vrot.slane %v6094_v23, 3 }
 0x1e5   : > { %v1022_v6 = vpop.f32.mrf.mxu1  ;;  %v7139_v34 = vpop.f32.mrf.mxu3 }
 0x1e6   : > { %v2023_v16 = vadd.f32 %v7099_v4, %v1566_v53  ;;  %v1109_v41 = vadd.f32 %v1022_v6, %v6755_v19  ;;  %v3792_v19 = vrot.slane %v3790_v24, 3  ;;  %v6095_v24 = vld [vmem:[%s6606_s18 + $0x40] sm:$0xff] }
 0x1e8   : > { %v2528_v48 = vpop.f32.mrf.mxu0  ;;  %2935 = vmatmul.bf16.gmra.mxu1 %v2817_v18  ;;  %3392 = vmatmul.bf16.gmra.mxu2 %v3274_v42  ;;  %v7141_v1 = vadd.f32 %v2525_v54, %v2023_v16  ;;  %v2819_v18 = vsel %vm2808_vm4, %v2816_v21, %v2818_v22  ;;  %v3793_v42 = vor.u32 %v3792_v19, %v3789_v37 }
 0x1ea   : > { %3993 = vmatmul.bf16.gmra.mxu3 %v3785_v35  ;;  %v3794_v21 = vsel %vm3723_vm3, %v3784_v8, %v3793_v42 }
 0x1eb   : > { %4441 = vmatmul.bf16.gmra.mxu0 %v4323_v62  ;;  %v1480_v9 = vpop.f32.mrf.mxu2  ;;  %v4325_v62 = vsel %vm4314_vm5, %v4322_v49, %v4324_v12  ;;  %v3796_v49 = vshrl.u32 %v6071_v58, 16  ;;  %v6072_v58 = vld [vmem:[%s6606_s18 + $0x58] sm:$0xff] }
 0x1ec   : > { %v1567_v13 = vadd.f32 %v1480_v9, %v1109_v41 }
 0x1ed   : > { %v1024_v4 = vpop.f32.mrf.mxu1  ;;  %v7150_v15 = vpop.f32.mrf.mxu3  ;;  %v3798_v37 = vrot.slane %v3796_v49, 2 }
 0x1ee   : > { %v2024_v0 = vadd.f32 %v7110_v10, %v1567_v13  ;;  %v1110_v44 = vadd.f32 %v1024_v4, %v6765_v40  ;;  %v3276_v10 = vsel %vm2808_vm4, %v3273_v45, %v3275_v2  ;;  %v6017_v13 = vld [vmem:[%s6606_s18 + $0x38] sm:$0xff]  ;;  %v6043_v4 = vld [vmem:[%s6606_s18 + $0x40] sm:$0xff] }
 0x1ef   : > { %v2820_v8 = vrot.slane %v6017_v13, 2  ;;  %v3277_v23 = vrot.slane %v6043_v4, 2  ;;  %v3808_v13 = vshll.u32 %v6072_v58, 16 }
 0x1f0   : > { %v2530_v38 = vpop.f32.mrf.mxu0  ;;  %v7152_v54 = vadd.f32 %v2528_v48, %v2024_v0 }
 0x1f3   : > { %v1482_v29 = vpop.f32.mrf.mxu2 }
 0x1f4   : > { %v1568_v53 = vadd.f32 %v1482_v29, %v1110_v44  ;;  %v4326_v44 = vrot.slane %v6095_v24, 3 }
 0x1f5   : > { %v1027_v6 = vpop.f32.mrf.mxu1  ;;  %v7159_v35 = vpop.f32.mrf.mxu3 }
 0x1f6   : > { %v2025_v16 = vadd.f32 %v7119_v50, %v1568_v53  ;;  %v1111_v45 = vadd.f32 %v1027_v6, %v6779_v60  ;;  %v3801_v60 = vrot.slane %v3799_v31, 3  ;;  %v6096_v31 = vld [vmem:[%s6606_s18 + $0x48] sm:$0xff] }
 0x1f8   : > { %v2533_v48 = vpop.f32.mrf.mxu0  ;;  %2940 = vmatmul.bf16.gmra.mxu1 %v2819_v18  ;;  %3397 = vmatmul.bf16.gmra.mxu2 %v3276_v10  ;;  %v7161_v40 = vadd.f32 %v2530_v38, %v2025_v16  ;;  %v2821_v18 = vsel %vm2808_vm4, %v2818_v22, %v2820_v8  ;;  %v3802_v10 = vor.u32 %v3801_v60, %v3798_v37 }
 0x1fa   : > { %3998 = vmatmul.bf16.gmra.mxu3 %v3794_v21  ;;  %v3803_v22 = vsel %vm3723_vm3, %v3793_v42, %v3802_v10 }
 0x1fb   : > { %4446 = vmatmul.bf16.gmra.mxu0 %v4325_v62  ;;  %v1485_v41 = vpop.f32.mrf.mxu2  ;;  %v4327_v62 = vsel %vm4314_vm5, %v4324_v12, %v4326_v44  ;;  %v3805_v12 = vshrl.u32 %v6072_v58, 16  ;;  %v6073_v58 = vld [vmem:[%s6606_s18 + $0x60] sm:$0xff] }
 0x1fc   : > { %v1569_v9 = vadd.f32 %v1485_v41, %v1111_v45 }
 0x1fd   : > { %v1029_v50 = vpop.f32.mrf.mxu1  ;;  %v7170_v0 = vpop.f32.mrf.mxu3  ;;  %v3807_v37 = vrot.slane %v3805_v12, 2 }
 0x1fe   : > { %v2026_v32 = vadd.f32 %v7130_v61, %v1569_v9  ;;  %v1112_v19 = vadd.f32 %v1029_v50, %v6789_v14  ;;  %v3278_v61 = vsel %vm2808_vm4, %v3275_v2, %v3277_v23  ;;  %v6018_v9 = vld [vmem:[%s6606_s18 + $0x40] sm:$0xff]  ;;  %v6044_v50 = vld [vmem:[%s6606_s18 + $0x48] sm:$0xff] }
 0x1ff   : > { %v2822_v42 = vrot.slane %v6018_v9, 2  ;;  %v3279_v24 = vrot.slane %v6044_v50, 2  ;;  %v3817_v9 = vshll.u32 %v6073_v58, 16 }
 0x200   : > { %v2535_v59 = vpop.f32.mrf.mxu0  ;;  %v7172_v38 = vadd.f32 %v2533_v48, %v2026_v32 }
 0x203   : > { %v1487_v29 = vpop.f32.mrf.mxu2 }
 0x204   : > { %v1570_v53 = vadd.f32 %v1487_v29, %v1112_v19  ;;  %v4328_v19 = vrot.slane %v6096_v31, 3 }
 0x205   : > { %v1032_v6 = vpop.f32.mrf.mxu1  ;;  %v7179_v21 = vpop.f32.mrf.mxu3 }
 0x206   : > { %v2027_v16 = vadd.f32 %v7139_v34, %v1570_v53  ;;  %v1113_v2 = vadd.f32 %v1032_v6, %v6690_v57  ;;  %v3810_v57 = vrot.slane %v3808_v13, 3  ;;  %v6097_v13 = vld [vmem:[%s6606_s18 + $0x50] sm:$0xff] }
 0x208   : > { %v2538_v48 = vpop.f32.mrf.mxu0  ;;  %2945 = vmatmul.bf16.gmra.mxu1 %v2821_v18  ;;  %3402 = vmatmul.bf16.gmra.mxu2 %v3278_v61  ;;  %v7181_v14 = vadd.f32 %v2535_v59, %v2027_v16  ;;  %v2823_v18 = vsel %vm2808_vm4, %v2820_v8, %v2822_v42  ;;  %v3811_v61 = vor.u32 %v3810_v57, %v3807_v37 }
 0x20a   : > { %4003 = vmatmul.bf16.gmra.mxu3 %v3803_v22  ;;  %v3812_v8 = vsel %vm3723_vm3, %v3802_v10, %v3811_v61 }
 0x20b   : > { %4451 = vmatmul.bf16.gmra.mxu0 %v4327_v62  ;;  %v1490_v45 = vpop.f32.mrf.mxu2  ;;  %v4329_v62 = vsel %vm4314_vm5, %v4326_v44, %v4328_v19  ;;  %v3814_v44 = vshrl.u32 %v6073_v58, 16  ;;  %v6074_v58 = vld [vmem:[%s6606_s18 + $0x68] sm:$0xff] }
 0x20c   : > { %v1571_v41 = vadd.f32 %v1490_v45, %v1113_v2 }
 0x20d   : > { %v1034_v34 = vpop.f32.mrf.mxu1  ;;  %v7190_v32 = vpop.f32.mrf.mxu3  ;;  %v3816_v37 = vrot.slane %v3814_v44, 2 }
 0x20e   : > { %v2028_v4 = vadd.f32 %v7150_v15, %v1571_v41  ;;  %v1114_v60 = vadd.f32 %v1034_v34, %v6703_v7  ;;  %v3280_v15 = vsel %vm2808_vm4, %v3277_v23, %v3279_v24  ;;  %v6019_v41 = vld [vmem:[%s6606_s18 + $0x48] sm:$0xff]  ;;  %v6045_v34 = vld [vmem:[%s6606_s18 + $0x50] sm:$0xff] }
 0x20f   : > { %v2824_v10 = vrot.slane %v6019_v41, 2  ;;  %v3281_v31 = vrot.slane %v6045_v34, 2  ;;  %v3826_v41 = vshll.u32 %v6074_v58, 16 }
 0x210   : > { %v2540_v49 = vpop.f32.mrf.mxu0  ;;  %v7192_v59 = vadd.f32 %v2538_v48, %v2028_v4 }
 0x213   : > { %v1492_v29 = vpop.f32.mrf.mxu2 }
 0x214   : > { %v1572_v53 = vadd.f32 %v1492_v29, %v1114_v60  ;;  %v4330_v60 = vrot.slane %v6097_v13, 3 }
 0x215   : > { %v1037_v6 = vpop.f32.mrf.mxu1  ;;  %v7199_v22 = vpop.f32.mrf.mxu3 }
 0x216   : > { %v2029_v16 = vadd.f32 %v7159_v35, %v1572_v53  ;;  %v1115_v23 = vadd.f32 %v1037_v6, %v6714_v20  ;;  %v3819_v20 = vrot.slane %v3817_v9, 3  ;;  %v6098_v9 = vld [vmem:[%s6606_s18 + $0x58] sm:$0xff] }
 0x218   : > { %v2543_v48 = vpop.f32.mrf.mxu0  ;;  %2950 = vmatmul.bf16.gmra.mxu1 %v2823_v18  ;;  %3407 = vmatmul.bf16.gmra.mxu2 %v3280_v15  ;;  %v7201_v7 = vadd.f32 %v2540_v49, %v2029_v16  ;;  %v2825_v18 = vsel %vm2808_vm4, %v2822_v42, %v2824_v10  ;;  %v3820_v15 = vor.u32 %v3819_v20, %v3816_v37  ;;  %v7569_v20 = vld [vmem:[#allocation12_spill] sm:$0xff] }
 0x21a   : > { %4008 = vmatmul.bf16.gmra.mxu3 %v3812_v8  ;;  %v3821_v42 = vsel %vm3723_vm3, %v3811_v61, %v3820_v15 }
 0x21b   : > { %4456 = vmatmul.bf16.gmra.mxu0 %v4329_v62  ;;  %v1495_v2 = vpop.f32.mrf.mxu2  ;;  %v4331_v62 = vsel %vm4314_vm5, %v4328_v19, %v4330_v60  ;;  %v3823_v19 = vshrl.u32 %v6074_v58, 16 }
 0x21c   : > { %v1573_v45 = vadd.f32 %v1495_v2, %v1115_v23 }
 0x21d   : > { %v1039_v35 = vpop.f32.mrf.mxu1  ;;  %v7210_v4 = vpop.f32.mrf.mxu3  ;;  %v3825_v37 = vrot.slane %v3823_v19, 2 }
 0x21e   : > { %v2030_v50 = vadd.f32 %v7170_v0, %v1573_v45  ;;  %v1116_v57 = vadd.f32 %v1039_v35, %v6727_v36  ;;  %v3282_v0 = vsel %vm2808_vm4, %v3279_v24, %v3281_v31  ;;  %v6020_v45 = vld [vmem:[%s6606_s18 + $0x50] sm:$0xff]  ;;  %v6046_v35 = vld [vmem:[%s6606_s18 + $0x58] sm:$0xff] }
 0x21f   : > { %v2826_v61 = vrot.slane %v6020_v45, 2  ;;  %v3283_v13 = vrot.slane %v6046_v35, 2  ;;  %v7247_v35 = vld [vmem:[%s6606_s18 + $0x58] sm:$0xff] }
 0x220   : > { %v2545_v12 = vpop.f32.mrf.mxu0  ;;  %v7212_v49 = vadd.f32 %v2543_v48, %v2030_v50 }
 0x223   : > { %v1497_v29 = vpop.f32.mrf.mxu2 }
 0x224   : > { %v1574_v53 = vadd.f32 %v1497_v29, %v1116_v57  ;;  %v4332_v29 = vrot.slane %v6098_v9, 3  ;;  %v7253_v9 = vld [vmem:[%s6606_s18 + $0x60] sm:$0xff] }
 0x225   : > { %v1042_v6 = vpop.f32.mrf.mxu1  ;;  %v7219_v8 = vpop.f32.mrf.mxu3 }
 0x226   : > { %v2031_v16 = vadd.f32 %v7179_v21, %v1574_v53  ;;  %v1117_v24 = vadd.f32 %v1042_v6, %v6738_v56  ;;  %v3828_v56 = vrot.slane %v3826_v41, 3 }
 0x228   : > { %v2548_v48 = vpop.f32.mrf.mxu0  ;;  %2955 = vmatmul.bf16.gmra.mxu1 %v2825_v18  ;;  %3412 = vmatmul.bf16.gmra.mxu2 %v3282_v0  ;;  %v7221_v36 = vadd.f32 %v2545_v12, %v2031_v16  ;;  %v2827_v0 = vsel %vm2808_vm4, %v2824_v10, %v2826_v61  ;;  %v3829_v16 = vor.u32 %v3828_v56, %v3825_v37  ;;  %v2828_v37 = vrot.slane %v7247_v35, 2 }
 0x22a   : > { %4013 = vmatmul.bf16.gmra.mxu3 %v3821_v42  ;;  %v4333_v42 = vsel %vm4314_vm5, %v4330_v60, %v4332_v29  ;;  %v3830_v10 = vsel %vm3723_vm3, %v3820_v15, %v3829_v16  ;;  %v7250_v60 = vld [vmem:[%s6606_s18 + $0x60] sm:$0xff] }
 0x22b   : > { %4461 = vmatmul.bf16.gmra.mxu0 %v4331_v62  ;;  %v1500_v23 = vpop.f32.mrf.mxu2  ;;  %v3285_v56 = vrot.slane %v7250_v60, 2 }
 0x22c   : > { %v1575_v2 = vadd.f32 %v1500_v23, %v1117_v24  ;;  %v6075_v23 = vld [vmem:[%s6606_s18 + $0x70] sm:$0xff] }
 0x22d   : > { %v1044_v21 = vpop.f32.mrf.mxu1  ;;  %v7230_v50 = vpop.f32.mrf.mxu3  ;;  %v3832_v19 = vshrl.u32 %v6075_v23, 16  ;;  %v3835_v41 = vshll.u32 %v6075_v23, 16  ;;  %v3286_v23 = vsel %vm2808_vm4, %v3283_v13, %v3285_v56 }
 0x22e   : > { %v2032_v34 = vadd.f32 %v7190_v32, %v1575_v2  ;;  %v1118_v57 = vadd.f32 %v1044_v21, %v7569_v20  ;;  %v3284_v32 = vsel %vm2808_vm4, %v3281_v31, %v3283_v13  ;;  %v7570_v31 = vld [vmem:[#allocation13_spill] sm:$0xff]  ;;  %v6076_v13 = vld [vmem:[%s6606_s18 + $0x78] sm:$0xff] }
 0x22f   : > { %v3834_v20 = vrot.slane %v3832_v19, 2 }
 0x230   : > { %v2550_v44 = vpop.f32.mrf.mxu0  ;;  %v7232_v12 = vadd.f32 %v2548_v48, %v2032_v34 }
 0x233   : > { %v1502_v53 = vpop.f32.mrf.mxu2 }
 0x234   : > { %v1576_v6 = vadd.f32 %v1502_v53, %v1118_v57  ;;  %v3837_v57 = vrot.slane %v3835_v41, 3  ;;  %v7571_v53 = vld [vmem:[#allocation14_spill] sm:$0xff] }
 0x235   : > { %v2921_v18 = vpop.f32.mrf.mxu1  ;;  %v7239_v58 = vpop.f32.mrf.mxu3 }
 0x236   : > { %v2033_v48 = vadd.f32 %v7199_v22, %v1576_v6  ;;  %v3047_v2 = vadd.f32 %v2921_v18, %v7570_v31  ;;  %v4334_v18 = vrot.slane %v7253_v9, 3  ;;  %v3838_v31 = vor.u32 %v3837_v57, %v3834_v20  ;;  %v7283_v20 = vld [vmem:[%s6606_s18 + $0x68] sm:$0xff] }
 0x237   : > { %v3841_v57 = vshrl.u32 %v6076_v13, 16 }
 0x238   : > { %v4427_v62 = vpop.f32.mrf.mxu0  ;;  %2960 = vmatmul.bf16.gmra.mxu1 %v2827_v0  ;;  %3417 = vmatmul.bf16.gmra.mxu2 %v3284_v32  ;;  %v7241_v24 = vadd.f32 %v2550_v44, %v2033_v48  ;;  %v7265_v48 = vld [vmem:[%s7553_s2] ss:$0 sm:$0xff] }
 0x23a   : > { %4018 = vmatmul.bf16.gmra.mxu3 %v3830_v10  ;;  %v2829_v10 = vsel %vm2808_vm4, %v2826_v61, %v2828_v37  ;;  %v3839_v61 = vsel %vm3723_vm3, %v3829_v16, %v3838_v31 }
 0x23b   : > { %4466 = vmatmul.bf16.gmra.mxu0 %v4333_v42  ;;  %v3378_v21 = vpop.f32.mrf.mxu2 }
 0x23c   : > { %v3504_v45 = vadd.f32 %v3378_v21, %v3047_v2 }
 0x23d   : > { %v2923_v22 = vpop.f32.mrf.mxu1  ;;  %v7255_v44 = vpop.f32.mrf.mxu3 }
 0x23e   : > { %v4095_v15 = vadd.f32 %v7210_v4, %v3504_v45  ;;  %v3048_v6 = vadd.f32 %v2923_v22, %v7571_v53  ;;  %v4335_v45 = vsel %vm4314_vm5, %v4332_v29, %v4334_v18  ;;  %v3844_v53 = vshll.u32 %v6076_v13, 16 }
 0x240   : > { %v4429_v34 = vpop.f32.mrf.mxu0  ;;  %v4553_v32 = vadd.f32 %v4427_v62, %v4095_v15 }
 0x242   : > { %v4665_v62 = vadd.f32 %v7265_v48, %v4553_v32 }
 0x243   : > { %v3380_v0 = vpop.f32.mrf.mxu2 }
 0x244   : > { %v3505_v42 = vadd.f32 %v3380_v0, %v3048_v6  ;;  %v4701_v19 = vmax.f32 %v4665_v62, 0.0  ;;  %v7286_v0 = vld [vmem:[%s6606_s18 + $0x68] sm:$0xff] }
 0x245   : > { %v2926_v4 = vpop.f32.mrf.mxu1  ;;  %v7271_v22 = vpop.f32.mrf.mxu3 }
 0x246   : > { %v4096_v2 = vadd.f32 %v7219_v8, %v3505_v42  ;;  %v3049_v60 = vadd.f32 %v2926_v4, %v6839_v27  ;;  %v3287_v4 = vrot.slane %v7283_v20, 2 }
 0x248   : > { %v4432_v21 = vpop.f32.mrf.mxu0  ;;  %v4554_v35 = vadd.f32 %v4429_v34, %v4096_v2  ;;  %2965 = vmatmul.bf16.gmra.mxu1 %v2829_v10  ;;  %3422 = vmatmul.bf16.gmra.mxu2 %v3286_v23  ;;  %v7280_v34 = vld [vmem:[%s6606_s18 + $0x60] sm:$0xff]  ;;  %v3843_v10 = vrot.slane %v3841_v57, 2  ;;  %v3846_v23 = vrot.slane %v3844_v53, 3 }
 0x249   : > { %v2830_v42 = vrot.slane %v7280_v34, 2 }
 0x24a   : > { %v4666_v8 = vadd.f32 %v7265_v48, %v4554_v35  ;;  %4023 = vmatmul.bf16.gmra.mxu3 %v3839_v61 }
 0x24b   : > { %4471 = vmatmul.bf16.gmra.mxu0 %v4335_v45  ;;  %v3383_v29 = vpop.f32.mrf.mxu2  ;;  %v4336_v45 = vrot.slane %v7286_v0, 3 }
 0x24c   : > { %v4702_v41 = vmax.f32 %v4666_v8, 0.0  ;;  %v3506_v9 = vadd.f32 %v3383_v29, %v3049_v60  ;;  %v2831_v8 = vsel %vm2808_vm4, %v2828_v37, %v2830_v42  ;;  %v3288_v60 = vsel %vm2808_vm4, %v3285_v56, %v3287_v4  ;;  %v6077_v56 = vld [vmem:[%s6606_s18 + $0x80] sm:$0xff] }
 0x24d   : > { %v2928_v15 = vpop.f32.mrf.mxu1  ;;  %v7288_v32 = vpop.f32.mrf.mxu3  ;;  %v3850_v0 = vshrl.u32 %v6077_v56, 16 }
 0x24e   : > { %v6118_v6 = vpack.c.bf16 %v4702_v41, %v4701_v19  ;;  %v4097_v27 = vadd.f32 %v7230_v50, %v3506_v9  ;;  %v3050_v2 = vadd.f32 %v2928_v15, %v6851_v17  ;;  %v3847_v50 = vor.u32 %v3846_v23, %v3843_v10  ;;  %v7316_v23 = vld [vmem:[%s6606_s18 + $0x70] sm:$0xff] }
 0x24f   : > { %v4337_v41 = vsel %vm4314_vm5, %v4334_v18, %v4336_v45 }
 0x250   : > { %v4434_v16 = vpop.f32.mrf.mxu0  ;;  %6119 = vst [vmem:[%s7290_s30] sm:$0xff] %v6118_v6   ;;  %v4555_v35 = vadd.f32 %v4432_v21, %v4097_v27  ;;  %v3848_v37 = vsel %vm3723_vm3, %v3838_v31, %v3847_v50  ;;  %v7310_v6 = vld [vmem:[%s6606_s18 + $0x68] sm:$0xff]  ;;  %v3853_v27 = vshll.u32 %v6077_v56, 16 }
 0x252   : > { %v4667_v17 = vadd.f32 %v7265_v48, %v4555_v35 }
 0x253   : > { %v3385_v62 = vpop.f32.mrf.mxu2 }
 0x254   : > { %v3507_v61 = vadd.f32 %v3385_v62, %v3050_v2  ;;  %v4703_v34 = vmax.f32 %v4667_v17, 0.0  ;;  %v2832_v62 = vrot.slane %v7310_v6, 2 }
 0x255   : > { %v2931_v13 = vpop.f32.mrf.mxu1  ;;  %v7302_v9 = vpop.f32.mrf.mxu3 }
 0x256   : > { %v4098_v29 = vadd.f32 %v7239_v58, %v3507_v61  ;;  %v3051_v58 = vadd.f32 %v2931_v13, %v6864_v33  ;;  %v3852_v61 = vrot.slane %v3850_v0, 2  ;;  %v3855_v13 = vrot.slane %v3853_v27, 3  ;;  %v7338_v0 = vld [vmem:[%s6606_s18 + $0x70] sm:$0xff]  ;;  %v7341_v27 = vld [vmem:[%s6606_s18 + $0x78] sm:$0xff] }
 0x258   : > { %v4437_v19 = vpop.f32.mrf.mxu0  ;;  %v4556_v21 = vadd.f32 %v4434_v16, %v4098_v29  ;;  %2970 = vmatmul.bf16.gmra.mxu1 %v2831_v8  ;;  %3427 = vmatmul.bf16.gmra.mxu2 %v3288_v60  ;;  %v7313_v16 = vld [vmem:[%s6606_s18 + $0x70] sm:$0xff]  ;;  %v4338_v60 = vrot.slane %v7316_v23, 3 }
 0x259   : > { %v3289_v35 = vrot.slane %v7313_v16, 2 }
 0x25a   : > { %v4668_v15 = vadd.f32 %v7265_v48, %v4556_v21  ;;  %4028 = vmatmul.bf16.gmra.mxu3 %v3848_v37  ;;  %v2833_v37 = vsel %vm2808_vm4, %v2830_v42, %v2832_v62 }
 0x25b   : > { %4476 = vmatmul.bf16.gmra.mxu0 %v4337_v41  ;;  %v3388_v18 = vpop.f32.mrf.mxu2  ;;  %v3290_v56 = vsel %vm2808_vm4, %v3287_v4, %v3289_v35  ;;  %v6078_v4 = vld [vmem:[%s6606_s18 + $0x88] sm:$0xff] }
 0x25c   : > { %v4704_v20 = vmax.f32 %v4668_v15, 0.0  ;;  %v3508_v57 = vadd.f32 %v3388_v18, %v3051_v58  ;;  %v4339_v18 = vsel %vm4314_vm5, %v4336_v45, %v4338_v60 }
 0x25d   : > { %v2933_v53 = vpop.f32.mrf.mxu1  ;;  %v7318_v2 = vpop.f32.mrf.mxu3 }
 0x25e   : > { %v6123_v31 = vpack.c.bf16 %v4704_v20, %v4703_v34  ;;  %v4099_v33 = vadd.f32 %v7255_v44, %v3508_v57  ;;  %v3052_v8 = vadd.f32 %v2933_v53, %v6878_v52  ;;  %v3856_v44 = vor.u32 %v3855_v13, %v3852_v61 }
 0x25f   : > { %v2834_v13 = vrot.slane %v7338_v0, 2  ;;  %v7366_v0 = vld [vmem:[%s6606_s18 + $0x78] sm:$0xff] }
 0x260   : > { %v4439_v10 = vpop.f32.mrf.mxu0  ;;  %6205 = vst [vmem:[%s7290_s30 + $0x8] sm:$0xff] %v6123_v31   ;;  %v4557_v41 = vadd.f32 %v4437_v19, %v4099_v33  ;;  %v3857_v42 = vsel %vm3723_vm3, %v3847_v50, %v3856_v44  ;;  %v3859_v31 = vshrl.u32 %v6078_v4, 16  ;;  %v7344_v33 = vld [vmem:[%s6606_s18 + $0x78] sm:$0xff] }
 0x262   : > { %v4669_v52 = vadd.f32 %v7265_v48, %v4557_v41 }
 0x263   : > { %v3390_v29 = vpop.f32.mrf.mxu2 }
 0x264   : > { %v3509_v17 = vadd.f32 %v3390_v29, %v3052_v8  ;;  %v4705_v57 = vmax.f32 %v4669_v52, 0.0  ;;  %v3291_v8 = vrot.slane %v7341_v27, 2  ;;  %v3861_v29 = vrot.slane %v3859_v31, 2  ;;  %v7369_v27 = vld [vmem:[%s6606_s18 + $0x80] sm:$0xff] }
 0x265   : > { %v2936_v21 = vpop.f32.mrf.mxu1  ;;  %v7330_v34 = vpop.f32.mrf.mxu3  ;;  %v2835_v52 = vsel %vm2808_vm4, %v2832_v62, %v2834_v13 }
 0x266   : > { %v4100_v15 = vadd.f32 %v7271_v22, %v3509_v17  ;;  %v3053_v22 = vadd.f32 %v2936_v21, %v6893_v55  ;;  %v4340_v21 = vrot.slane %v7344_v33, 3 }
 0x268   : > { %v4442_v58 = vpop.f32.mrf.mxu0  ;;  %v4558_v19 = vadd.f32 %v4439_v10, %v4100_v15  ;;  %2975 = vmatmul.bf16.gmra.mxu1 %v2833_v37  ;;  %3432 = vmatmul.bf16.gmra.mxu2 %v3290_v56  ;;  %v3862_v10 = vshll.u32 %v6078_v4, 16 }
 0x26a   : > { %v4670_v20 = vadd.f32 %v7265_v48, %v4558_v19  ;;  %4033 = vmatmul.bf16.gmra.mxu3 %v3857_v42  ;;  %v3864_v41 = vrot.slane %v3862_v10, 3  ;;  %v3292_v19 = vsel %vm2808_vm4, %v3289_v35, %v3291_v8  ;;  %v6079_v35 = vld [vmem:[%s6606_s18 + $0x90] sm:$0xff] }
 0x26b   : > { %4481 = vmatmul.bf16.gmra.mxu0 %v4339_v18  ;;  %v3393_v45 = vpop.f32.mrf.mxu2  ;;  %v3868_v31 = vshrl.u32 %v6079_v35, 16  ;;  %v3871_v10 = vshll.u32 %v6079_v35, 16 }
 0x26c   : > { %v4706_v53 = vmax.f32 %v4670_v20, 0.0  ;;  %v3510_v6 = vadd.f32 %v3393_v45, %v3053_v22  ;;  %v4341_v20 = vsel %vm4314_vm5, %v4338_v60, %v4340_v21 }
 0x26d   : > { %v2938_v16 = vpop.f32.mrf.mxu1  ;;  %v7346_v61 = vpop.f32.mrf.mxu3 }
 0x26e   : > { %v6128_v50 = vpack.c.bf16 %v4706_v53, %v4705_v57  ;;  %v4101_v55 = vadd.f32 %v7288_v32, %v3510_v6  ;;  %v3054_v17 = vadd.f32 %v2938_v16, %v6908_v25  ;;  %v3865_v32 = vor.u32 %v3864_v41, %v3861_v29 }
 0x26f   : > { %v3293_v29 = vrot.slane %v7369_v27, 2  ;;  %v3870_v41 = vrot.slane %v3868_v31, 2  ;;  %v7394_v27 = vld [vmem:[%s6606_s18 + $0x80] sm:$0xff]  ;;  %v7397_v31 = vld [vmem:[%s6606_s18 + $0x88] sm:$0xff] }
 0x270   : > { %v4444_v23 = vpop.f32.mrf.mxu0  ;;  %6206 = vst [vmem:[%s7290_s30 + $0x10] sm:$0xff] %v6128_v50   ;;  %v4559_v56 = vadd.f32 %v4442_v58, %v4101_v55  ;;  %v3866_v62 = vsel %vm3723_vm3, %v3856_v44, %v3865_v32  ;;  %v2836_v55 = vrot.slane %v7366_v0, 2 }
 0x272   : > { %v4671_v25 = vadd.f32 %v7265_v48, %v4559_v56 }
 0x273   : > { %v3395_v37 = vpop.f32.mrf.mxu2 }
 0x274   : > { %v3511_v15 = vadd.f32 %v3395_v37, %v3054_v17  ;;  %v4707_v57 = vmax.f32 %v4671_v25, 0.0  ;;  %v3873_v17 = vrot.slane %v3871_v10, 3  ;;  %v7572_v37 = vld [vmem:[#allocation15_spill] sm:$0xff]  ;;  %v3294_v25 = vsel %vm2808_vm4, %v3291_v8, %v3293_v29 }
 0x275   : > { %v2941_v18 = vpop.f32.mrf.mxu1  ;;  %v7358_v22 = vpop.f32.mrf.mxu3  ;;  %v6080_v8 = vld [vmem:[%s6606_s18 + $0x98] sm:$0xff] }
 0x276   : > { %v4102_v42 = vadd.f32 %v7302_v9, %v3511_v15  ;;  %v3055_v9 = vadd.f32 %v2941_v18, %v6918_v47  ;;  %v3877_v10 = vshrl.u32 %v6080_v8, 16 }
 0x278   : > { %v4447_v4 = vpop.f32.mrf.mxu0  ;;  %v4560_v58 = vadd.f32 %v4444_v23, %v4102_v42  ;;  %2980 = vmatmul.bf16.gmra.mxu1 %v2835_v52  ;;  %3437 = vmatmul.bf16.gmra.mxu2 %v3292_v19  ;;  %v7372_v23 = vld [vmem:[%s6606_s18 + $0x80] sm:$0xff] }
 0x279   : > { %v4342_v15 = vrot.slane %v7372_v23, 3  ;;  %v7400_v23 = vld [vmem:[%s6606_s18 + $0x88] sm:$0xff] }
 0x27a   : > { %v4672_v45 = vadd.f32 %v7265_v48, %v4560_v58  ;;  %4038 = vmatmul.bf16.gmra.mxu3 %v3866_v62 }
 0x27b   : > { %4486 = vmatmul.bf16.gmra.mxu0 %v4341_v20  ;;  %v3398_v60 = vpop.f32.mrf.mxu2  ;;  %v2837_v20 = vsel %vm2808_vm4, %v2834_v13, %v2836_v55  ;;  %v4343_v35 = vsel %vm4314_vm5, %v4340_v21, %v4342_v15 }
 0x27c   : > { %v4708_v53 = vmax.f32 %v4672_v45, 0.0  ;;  %v3512_v6 = vadd.f32 %v3398_v60, %v3055_v9 }
 0x27d   : > { %v2943_v16 = vpop.f32.mrf.mxu1  ;;  %v7374_v33 = vpop.f32.mrf.mxu3 }
 0x27e   : > { %v6133_v44 = vpack.c.bf16 %v4708_v53, %v4707_v57  ;;  %v4103_v47 = vadd.f32 %v7318_v2, %v3512_v6  ;;  %v3056_v56 = vadd.f32 %v2943_v16, %v7572_v37  ;;  %v3874_v2 = vor.u32 %v3873_v17, %v3870_v41 }
 0x27f   : > { %v2838_v17 = vrot.slane %v7394_v27, 2  ;;  %v3295_v37 = vrot.slane %v7397_v31, 2 }
 0x280   : > { %v4449_v50 = vpop.f32.mrf.mxu0  ;;  %6207 = vst [vmem:[%s7290_s30 + $0x18] sm:$0xff] %v6133_v44   ;;  %v4561_v52 = vadd.f32 %v4447_v4, %v4103_v47  ;;  %v3875_v13 = vsel %vm3723_vm3, %v3865_v32, %v3874_v2  ;;  %v3880_v44 = vshll.u32 %v6080_v8, 16 }
 0x282   : > { %v4673_v9 = vadd.f32 %v7265_v48, %v4561_v52  ;;  %v7574_v52 = vld [vmem:[#allocation17_spill] sm:$0xff] }
 0x283   : > { %v3400_v18 = vpop.f32.mrf.mxu2 }
 0x284   : > { %v3513_v19 = vadd.f32 %v3400_v18, %v3056_v56  ;;  %v4709_v53 = vmax.f32 %v4673_v9, 0.0  ;;  %v3879_v56 = vrot.slane %v3877_v10, 2  ;;  %v3882_v18 = vrot.slane %v3880_v44, 3  ;;  %v6027_v44 = vld [vmem:[%s6606_s18 + $0x88] sm:$0xff] }
 0x285   : > { %v2946_v42 = vpop.f32.mrf.mxu1  ;;  %v7386_v45 = vpop.f32.mrf.mxu3  ;;  %v2839_v9 = vsel %vm2808_vm4, %v2836_v55, %v2838_v17 }
 0x286   : > { %v4104_v58 = vadd.f32 %v7330_v34, %v3513_v19  ;;  %v7573_v34 = vld [vmem:[#allocation16_spill] sm:$0xff] }
 0x287   : > { %v3057_v57 = vadd.f32 %v2946_v42, %v7573_v34  ;;  %v4344_v42 = vrot.slane %v7400_v23, 3  ;;  %v3612_v34 = vld [vmem:[%s6606_s18 + $0xa0] sm:$0x7] }
 0x288   : > { %v4452_v62 = vpop.f32.mrf.mxu0  ;;  %v4562_v4 = vadd.f32 %v4449_v50, %v4104_v58  ;;  %2985 = vmatmul.bf16.gmra.mxu1 %v2837_v20  ;;  %3442 = vmatmul.bf16.gmra.mxu2 %v3294_v25 }
 0x28a   : > { %v4674_v60 = vadd.f32 %v7265_v48, %v4562_v4  ;;  %4043 = vmatmul.bf16.gmra.mxu3 %v3875_v13  ;;  %v3296_v4 = vsel %vm2808_vm4, %v3293_v29, %v3295_v37 }
 0x28b   : > { %4491 = vmatmul.bf16.gmra.mxu0 %v4343_v35  ;;  %v3403_v21 = vpop.f32.mrf.mxu2 }
 0x28c   : > { %v4710_v6 = vmax.f32 %v4674_v60, 0.0  ;;  %v3514_v16 = vadd.f32 %v3403_v21, %v3057_v57  ;;  %v4345_v60 = vsel %vm4314_vm5, %v4342_v15, %v4344_v42  ;;  %v3703_v21 = vunpack.c.l.b16 %v3612_v34 }
 0x28d   : > { %v2948_v0 = vpop.f32.mrf.mxu1  ;;  %v7402_v47 = vpop.f32.mrf.mxu3 }
 0x28e   : > { %v6138_v32 = vpack.c.bf16 %v4710_v6, %v4709_v53  ;;  %v4105_v41 = vadd.f32 %v7346_v61, %v3514_v16  ;;  %v3058_v19 = vadd.f32 %v2948_v0, %v7574_v52  ;;  %v3883_v61 = vor.u32 %v3882_v18, %v3879_v56  ;;  %v7575_v6 = vld [vmem:[#allocation18_spill] sm:$0xff] }
 0x28f   : > { %v3722_v29 = vpack.c.b16 %v3703_v21, %v3703_v21 }
 0x290   : > { %v4454_v50 = vpop.f32.mrf.mxu0  ;;  %6208 = vst [vmem:[%s7290_s30 + $0x20] sm:$0xff] %v6138_v32   ;;  %v4563_v25 = vadd.f32 %v4452_v62, %v4105_v41  ;;  %v3884_v55 = vsel %vm3723_vm3, %v3874_v2, %v3883_v61  ;;  %v6053_v32 = vld [vmem:[%s6606_s18 + $0x90] sm:$0xff] }
 0x291   : > { %v3889_v23 = vshll.u32 %v3722_v29, 16  ;;  %v6105_v2 = vld [vmem:[%s6606_s18 + $0x90] sm:$0xff] }
 0x292   : > { %v4675_v53 = vadd.f32 %v7265_v48, %v4563_v25 }
 0x293   : > { %v3405_v20 = vpop.f32.mrf.mxu2 }
 0x294   : > { %v3515_v58 = vadd.f32 %v3405_v20, %v3058_v19  ;;  %v4711_v0 = vmax.f32 %v4675_v53, 0.0  ;;  %v2840_v19 = vrot.slane %v6027_v44, 2  ;;  %v3297_v20 = vrot.slane %v6053_v32, 2  ;;  %v6054_v44 = vld [vmem:[%s6606_s18 + $0x98] sm:$0xff] }
 0x295   : > { %v2951_v35 = vpop.f32.mrf.mxu1  ;;  %v7415_v57 = vpop.f32.mrf.mxu3 }
 0x296   : > { %v4106_v13 = vadd.f32 %v7358_v22, %v3515_v58  ;;  %v3059_v15 = vadd.f32 %v2951_v35, %v7575_v6  ;;  %v3891_v58 = vrot.slane %v3889_v23, 3  ;;  %v7576_v35 = vld [vmem:[#allocation19_spill] sm:$0xff]  ;;  %v2841_v53 = vsel %vm2808_vm4, %v2838_v17, %v2840_v19 }
 0x297   : > { %v6106_v23 = vld [vmem:[%s6606_s18 + $0x98] sm:$0xff] }
 0x298   : > { %v4457_v8 = vpop.f32.mrf.mxu0  ;;  %v4564_v62 = vadd.f32 %v4454_v50, %v4106_v13  ;;  %2990 = vmatmul.bf16.gmra.mxu1 %v2839_v9  ;;  %3447 = vmatmul.bf16.gmra.mxu2 %v3296_v4  ;;  %v3886_v50 = vshrl.u32 %v3722_v29, 16  ;;  %v4346_v4 = vrot.slane %v6105_v2, 3 }
 0x29a   : > { %v4676_v22 = vadd.f32 %v7265_v48, %v4564_v62  ;;  %4048 = vmatmul.bf16.gmra.mxu3 %v3884_v55  ;;  %v3888_v25 = vrot.slane %v3886_v50, 2  ;;  %v3298_v62 = vsel %vm2808_vm4, %v3295_v37, %v3297_v20 }
 0x29b   : > { %4496 = vmatmul.bf16.gmra.mxu0 %v4345_v60  ;;  %v3408_v16 = vpop.f32.mrf.mxu2 }
 0x29c   : > { %v4712_v27 = vmax.f32 %v4676_v22, 0.0  ;;  %v3516_v31 = vadd.f32 %v3408_v16, %v3059_v15  ;;  %v3892_v55 = vor.u32 %v3891_v58, %v3888_v25 }
 0x29d   : > { %v2953_v10 = vpop.f32.mrf.mxu1  ;;  %v7424_v18 = vpop.f32.mrf.mxu3 }
 0x29e   : > { %v6143_v41 = vpack.c.bf16 %v4712_v27, %v4711_v0  ;;  %v4107_v52 = vadd.f32 %v7374_v33, %v3516_v31  ;;  %v3060_v9 = vadd.f32 %v2953_v10, %v7576_v35  ;;  %v4347_v33 = vsel %vm4314_vm5, %v4344_v42, %v4346_v4  ;;  %v6028_v10 = vld [vmem:[%s6606_s18 + $0x90] sm:$0xff] }
 0x29f   : > { %v3893_v17 = vsel %vm3723_vm3, %v3883_v61, %v3892_v55  ;;  %v4203_v55 = vld [vmem:[%s6606_s18 + $0xa0] sm:$0x7] }
 0x2a0   : > { %v4459_v56 = vpop.f32.mrf.mxu0  ;;  %6209 = vst [vmem:[%s7290_s30 + $0x28] sm:$0xff] %v6143_v41   ;;  %v4565_v60 = vadd.f32 %v4457_v8, %v4107_v52  ;;  %v4348_v52 = vrot.slane %v6106_v23, 3 }
 0x2a2   : > { %v4677_v15 = vadd.f32 %v7265_v48, %v4565_v60 }
 0x2a3   : > { %v3410_v13 = vpop.f32.mrf.mxu2 }
 0x2a4   : > { %v3517_v34 = vadd.f32 %v3410_v13, %v3060_v9  ;;  %v4713_v42 = vmax.f32 %v4677_v15, 0.0  ;;  %v4294_v15 = vunpack.c.l.b16 %v4203_v55 }
 0x2a5   : > { %v2956_v21 = vpop.f32.mrf.mxu1  ;;  %v7433_v6 = vpop.f32.mrf.mxu3 }
 0x2a6   : > { %v4108_v29 = vadd.f32 %v7386_v45, %v3517_v34  ;;  %v3061_v45 = vadd.f32 %v2956_v21, %v7015_v46  ;;  %v2842_v46 = vrot.slane %v6028_v10, 2 }
 0x2a8   : > { %v4462_v22 = vpop.f32.mrf.mxu0  ;;  %v4566_v16 = vadd.f32 %v4459_v56, %v4108_v29  ;;  %2995 = vmatmul.bf16.gmra.mxu1 %v2841_v53  ;;  %3452 = vmatmul.bf16.gmra.mxu2 %v3298_v62  ;;  %v3299_v56 = vrot.slane %v6054_v44, 2  ;;  %v2843_v13 = vsel %vm2808_vm4, %v2840_v19, %v2842_v46  ;;  %v4349_v53 = vsel %vm4314_vm5, %v4346_v4, %v4348_v52  ;;  %v3155_v62 = vld [vmem:[%s6606_s18 + $0xa0] sm:$0x3] }
 0x2a9   : > { %v3246_v19 = vunpack.c.l.b16 %v3155_v62 }
 0x2aa   : > { %v4678_v37 = vadd.f32 %v7265_v48, %v4566_v16  ;;  %4053 = vmatmul.bf16.gmra.mxu3 %v3893_v17  ;;  %v3300_v60 = vsel %vm2808_vm4, %v3297_v20, %v3299_v56 }
 0x2ab   : > { %4501 = vmatmul.bf16.gmra.mxu0 %v4347_v33  ;;  %v3413_v8 = vpop.f32.mrf.mxu2 }
 0x2ac   : > { %v4714_v0 = vmax.f32 %v4678_v37, 0.0  ;;  %v3518_v27 = vadd.f32 %v3413_v8, %v3061_v45 }
 0x2ad   : > { %v2958_v31 = vpop.f32.mrf.mxu1  ;;  %v7442_v41 = vpop.f32.mrf.mxu3 }
 0x2ae   : > { %v6148_v32 = vpack.c.bf16 %v4714_v0, %v4713_v42  ;;  %v4109_v61 = vadd.f32 %v7402_v47, %v3518_v27  ;;  %v3062_v2 = vadd.f32 %v2958_v31, %v7029_v51  ;;  %v2697_v47 = vld [vmem:[%s6606_s18 + $0x98] sm:$0x3]  ;;  %v3265_v42 = vpack.c.b16 %v3246_v19, %v3246_v19 }
 0x2af   : > { %v4313_v31 = vpack.c.b16 %v4294_v15, %v4294_v15 }
 0x2b0   : > { %v4464_v50 = vpop.f32.mrf.mxu0  ;;  %6210 = vst [vmem:[%s7290_s30 + $0x30] sm:$0xff] %v6148_v32   ;;  %v4567_v58 = vadd.f32 %v4462_v22, %v4109_v61  ;;  %v2788_v22 = vunpack.c.l.b16 %v2697_v47 }
 0x2b2   : > { %v4679_v51 = vadd.f32 %v7265_v48, %v4567_v58  ;;  %v2807_v8 = vpack.c.b16 %v2788_v22, %v2788_v22 }
 0x2b3   : > { %v3415_v25 = vpop.f32.mrf.mxu2 }
 0x2b4   : > { %v3519_v35 = vadd.f32 %v3415_v25, %v3062_v2  ;;  %v4715_v4 = vmax.f32 %v4679_v51, 0.0  ;;  %v2844_v32 = vrot.slane %v2807_v8, 2 }
 0x2b5   : > { %v2961_v9 = vpop.f32.mrf.mxu1  ;;  %v4016_v29 = vpop.f32.mrf.mxu3 }
 0x2b6   : > { %v4110_v34 = vadd.f32 %v7415_v57, %v3519_v35  ;;  %v3063_v57 = vadd.f32 %v2961_v9, %v7038_v5  ;;  %v4350_v5 = vrot.slane %v4313_v31, 3  ;;  %v2845_v35 = vsel %vm2808_vm4, %v2842_v46, %v2844_v32 }
 0x2b8   : > { %v4467_v21 = vpop.f32.mrf.mxu0  ;;  %v4568_v33 = vadd.f32 %v4464_v50, %v4110_v34  ;;  %3000 = vmatmul.bf16.gmra.mxu1 %v2843_v13  ;;  %3457 = vmatmul.bf16.gmra.mxu2 %v3300_v60  ;;  %v3301_v50 = vrot.slane %v3265_v42, 2  ;;  %v4351_v34 = vsel %vm4314_vm5, %v4348_v52, %v4350_v5 }
 0x2ba   : > { %v4680_v20 = vadd.f32 %v7265_v48, %v4568_v33  ;;  %v3302_v9 = vsel %vm2808_vm4, %v3299_v56, %v3301_v50 }
 0x2bb   : > { %4506 = vmatmul.bf16.gmra.mxu0 %v4349_v53  ;;  %v3418_v16 = vpop.f32.mrf.mxu2 }
 0x2bc   : > { %v4716_v17 = vmax.f32 %v4680_v20, 0.0  ;;  %v3520_v37 = vadd.f32 %v3418_v16, %v3063_v57 }
 0x2bd   : > { %v2963_v45 = vpop.f32.mrf.mxu1  ;;  %v4019_v10 = vpop.f32.mrf.mxu3 }
 0x2be   : > { %v6153_v0 = vpack.c.bf16 %v4716_v17, %v4715_v4  ;;  %v4111_v44 = vadd.f32 %v7424_v18, %v3520_v37  ;;  %v3064_v23 = vadd.f32 %v2963_v45, %v7049_v3 }
 0x2c0   : > { %v4469_v27 = vpop.f32.mrf.mxu0  ;;  %6211 = vst [vmem:[%s7290_s30 + $0x38] sm:$0xff] %v6153_v0   ;;  %v4569_v2 = vadd.f32 %v4467_v21, %v4111_v44 }
 0x2c2   : > { %v4681_v18 = vadd.f32 %v7265_v48, %v4569_v2 }
 0x2c3   : > { %v3420_v61 = vpop.f32.mrf.mxu2 }
 0x2c4   : > { %v3521_v25 = vadd.f32 %v3420_v61, %v3064_v23  ;;  %v4717_v62 = vmax.f32 %v4681_v18, 0.0 }
 0x2c5   : > { %v2966_v58 = vpop.f32.mrf.mxu1  ;;  %v4021_v3 = vpop.f32.mrf.mxu3 }
 0x2c6   : > { %v4112_v13 = vadd.f32 %v7433_v6, %v3521_v25  ;;  %v3065_v47 = vadd.f32 %v2966_v58, %v7071_v43 }
 0x2c8   : > { %v4472_v60 = vpop.f32.mrf.mxu0  ;;  %v4570_v53 = vadd.f32 %v4469_v27, %v4112_v13  ;;  %3005 = vmatmul.bf16.gmra.mxu1 %v2845_v35  ;;  %3462 = vmatmul.bf16.gmra.mxu2 %v3302_v9 }
 0x2ca   : > { %v4682_v21 = vadd.f32 %v7265_v48, %v4570_v53 }
 0x2cb   : > { %4511 = vmatmul.bf16.gmra.mxu0 %v4351_v34  ;;  %v3423_v46 = vpop.f32.mrf.mxu2 }
 0x2cc   : > { %v4718_v56 = vmax.f32 %v4682_v21, 0.0  ;;  %v3522_v55 = vadd.f32 %v3423_v46, %v3065_v47 }
 0x2cd   : > { %v2968_v6 = vpop.f32.mrf.mxu1  ;;  %v4024_v20 = vpop.f32.mrf.mxu3 }
 0x2ce   : > { %v6158_v51 = vpack.c.bf16 %v4718_v56, %v4717_v62  ;;  %v4113_v52 = vadd.f32 %v7442_v41, %v3522_v55  ;;  %v3066_v22 = vadd.f32 %v2968_v6, %v7081_v28 }
 0x2d0   : > { %v4474_v33 = vpop.f32.mrf.mxu0  ;;  %6212 = vst [vmem:[%s7290_s30 + $0x40] sm:$0xff] %v6158_v51   ;;  %v4571_v57 = vadd.f32 %v4472_v60, %v4113_v52 }
 0x2d2   : > { %v4683_v17 = vadd.f32 %v7265_v48, %v4571_v57 }
 0x2d3   : > { %v3425_v19 = vpop.f32.mrf.mxu2 }
 0x2d4   : > { %v3523_v15 = vadd.f32 %v3425_v19, %v3066_v22  ;;  %v4719_v0 = vmax.f32 %v4683_v17, 0.0 }
 0x2d5   : > { %v2971_v16 = vpop.f32.mrf.mxu1  ;;  %v4026_v31 = vpop.f32.mrf.mxu3 }
 0x2d6   : > { %v4114_v4 = vadd.f32 %v4016_v29, %v3523_v15  ;;  %v3067_v8 = vadd.f32 %v2971_v16, %v7092_v11 }
 0x2d8   : > { %v4477_v43 = vpop.f32.mrf.mxu0  ;;  %v4572_v37 = vadd.f32 %v4474_v33, %v4114_v4 }
 0x2da   : > { %v4684_v45 = vadd.f32 %v7265_v48, %v4572_v37 }
 0x2db   : > { %v3428_v42 = vpop.f32.mrf.mxu2 }
 0x2dc   : > { %v4720_v41 = vmax.f32 %v4684_v45, 0.0  ;;  %v3524_v27 = vadd.f32 %v3428_v42, %v3067_v8 }
 0x2dd   : > { %v2973_v28 = vpop.f32.mrf.mxu1  ;;  %v4029_v11 = vpop.f32.mrf.mxu3 }
 0x2de   : > { %v6163_v44 = vpack.c.bf16 %v4720_v41, %v4719_v0  ;;  %v4115_v50 = vadd.f32 %v4019_v10, %v3524_v27  ;;  %v3068_v29 = vadd.f32 %v2973_v28, %v7101_v63 }
 0x2e0   : > { %v4479_v32 = vpop.f32.mrf.mxu0  ;;  %6213 = vst [vmem:[%s7290_s30 + $0x48] sm:$0xff] %v6163_v44   ;;  %v4573_v5 = vadd.f32 %v4477_v43, %v4115_v50 }
 0x2e2   : > { %v4685_v35 = vadd.f32 %v7265_v48, %v4573_v5 }
 0x2e3   : > { %v3430_v23 = vpop.f32.mrf.mxu2 }
 0x2e4   : > { %v3525_v61 = vadd.f32 %v3430_v23, %v3068_v29  ;;  %v4721_v18 = vmax.f32 %v4685_v35, 0.0 }
 0x2e5   : > { %v2976_v2 = vpop.f32.mrf.mxu1  ;;  %v4031_v62 = vpop.f32.mrf.mxu3 }
 0x2e6   : > { %v4116_v25 = vadd.f32 %v4021_v3, %v3525_v61  ;;  %v3069_v60 = vadd.f32 %v2976_v2, %v7112_v30 }
 0x2e8   : > { %v4482_v58 = vpop.f32.mrf.mxu0  ;;  %v4574_v9 = vadd.f32 %v4479_v32, %v4116_v25 }
 0x2ea   : > { %v4686_v13 = vadd.f32 %v7265_v48, %v4574_v9 }
 0x2eb   : > { %v3433_v34 = vpop.f32.mrf.mxu2 }
 0x2ec   : > { %v4722_v10 = vmax.f32 %v4686_v13, 0.0  ;;  %v3526_v53 = vadd.f32 %v3433_v34, %v3069_v60 }
 0x2ed   : > { %v2978_v63 = vpop.f32.mrf.mxu1  ;;  %v4034_v16 = vpop.f32.mrf.mxu3 }
 0x2ee   : > { %v6168_v21 = vpack.c.bf16 %v4722_v10, %v4721_v18  ;;  %v4117_v46 = vadd.f32 %v4024_v20, %v3526_v53  ;;  %v3070_v3 = vadd.f32 %v2978_v63, %v7121_v26 }
 0x2f0   : > { %v4484_v47 = vpop.f32.mrf.mxu0  ;;  %6214 = vst [vmem:[%s7290_s30 + $0x50] sm:$0xff] %v6168_v21   ;;  %v4575_v55 = vadd.f32 %v4482_v58, %v4117_v46 }
 0x2f2   : > { %v4687_v30 = vadd.f32 %v7265_v48, %v4575_v55 }
 0x2f3   : > { %v3435_v56 = vpop.f32.mrf.mxu2 }
 0x2f4   : > { %v3527_v6 = vadd.f32 %v3435_v56, %v3070_v3  ;;  %v4723_v20 = vmax.f32 %v4687_v30, 0.0 }
 0x2f5   : > { %v2981_v51 = vpop.f32.mrf.mxu1  ;;  %v4036_v28 = vpop.f32.mrf.mxu3 }
 0x2f6   : > { %v4118_v33 = vadd.f32 %v4026_v31, %v3527_v6  ;;  %v3071_v57 = vadd.f32 %v2981_v51, %v7132_v39 }
 0x2f8   : > { %v4487_v52 = vpop.f32.mrf.mxu0  ;;  %v4576_v22 = vadd.f32 %v4484_v47, %v4118_v33 }
 0x2fa   : > { %v4688_v19 = vadd.f32 %v7265_v48, %v4576_v22 }
 0x2fb   : > { %v3438_v15 = vpop.f32.mrf.mxu2 }
 0x2fc   : > { %v4724_v4 = vmax.f32 %v4688_v19, 0.0  ;;  %v3528_v43 = vadd.f32 %v3438_v15, %v3071_v57 }
 0x2fd   : > { %v2983_v26 = vpop.f32.mrf.mxu1 }
 0x2fe   : > { %v6173_v17 = vpack.c.bf16 %v4724_v4, %v4723_v20  ;;  %v4119_v45 = vadd.f32 %v4029_v11, %v3528_v43  ;;  %v3072_v8 = vadd.f32 %v2983_v26, %v7141_v1  ;;  %v4039_v11 = vpop.f32.mrf.mxu3 }
 0x300   : > { %v4489_v37 = vpop.f32.mrf.mxu0  ;;  %6215 = vst [vmem:[%s7290_s30 + $0x58] sm:$0xff] %v6173_v17   ;;  %v4577_v0 = vadd.f32 %v4487_v52, %v4119_v45 }
 0x302   : > { %v4689_v44 = vadd.f32 %v7265_v48, %v4577_v0 }
 0x303   : > { %v3440_v42 = vpop.f32.mrf.mxu2 }
 0x304   : > { %v3529_v41 = vadd.f32 %v3440_v42, %v3072_v8  ;;  %v4725_v5 = vmax.f32 %v4689_v44, 0.0 }
 0x305   : > { %v2986_v27 = vpop.f32.mrf.mxu1 }
 0x306   : > { %v4120_v31 = vadd.f32 %v4031_v62, %v3529_v41  ;;  %v3073_v29 = vadd.f32 %v2986_v27, %v7152_v54  ;;  %v4041_v21 = vpop.f32.mrf.mxu3 }
 0x308   : > { %v4492_v39 = vpop.f32.mrf.mxu0  ;;  %v4578_v32 = vadd.f32 %v4489_v37, %v4120_v31 }
 0x30a   : > { %v4690_v50 = vadd.f32 %v7265_v48, %v4578_v32 }
 0x30b   : > { %v3443_v23 = vpop.f32.mrf.mxu2 }
 0x30c   : > { %v4726_v61 = vmax.f32 %v4690_v50, 0.0  ;;  %v3530_v2 = vadd.f32 %v3443_v23, %v3073_v29 }
 0x30d   : > { %v2988_v1 = vpop.f32.mrf.mxu1 }
 0x30e   : > { %v6178_v25 = vpack.c.bf16 %v4726_v61, %v4725_v5  ;;  %v4121_v35 = vadd.f32 %v4034_v16, %v3530_v2  ;;  %v3074_v9 = vadd.f32 %v2988_v1, %v7161_v40  ;;  %v4044_v22 = vpop.f32.mrf.mxu3 }
 0x310   : > { %v4494_v58 = vpop.f32.mrf.mxu0  ;;  %6216 = vst [vmem:[%s7290_s30 + $0x60] sm:$0xff] %v6178_v25   ;;  %v4579_v60 = vadd.f32 %v4492_v39, %v4121_v35 }
 0x312   : > { %v4691_v54 = vadd.f32 %v7265_v48, %v4579_v60 }
 0x313   : > { %v3445_v13 = vpop.f32.mrf.mxu2 }
 0x314   : > { %v3531_v34 = vadd.f32 %v3445_v13, %v3074_v9  ;;  %v4727_v3 = vmax.f32 %v4691_v54, 0.0 }
 0x315   : > { %v2991_v18 = vpop.f32.mrf.mxu1 }
 0x316   : > { %v4122_v10 = vadd.f32 %v4036_v28, %v3531_v34  ;;  %v3075_v46 = vadd.f32 %v2991_v18, %v7172_v38  ;;  %v4046_v42 = vpop.f32.mrf.mxu3 }
 0x318   : > { %v4497_v53 = vpop.f32.mrf.mxu0  ;;  %v4580_v63 = vadd.f32 %v4494_v58, %v4122_v10 }
 0x31a   : > { %v4692_v47 = vadd.f32 %v7265_v48, %v4580_v63 }
 0x31b   : > { %v3448_v62 = vpop.f32.mrf.mxu2 }
 0x31c   : > { %v4728_v56 = vmax.f32 %v4692_v47, 0.0  ;;  %v3532_v55 = vadd.f32 %v3448_v62, %v3075_v46 }
 0x31d   : > { %v2993_v40 = vpop.f32.mrf.mxu1 }
 0x31e   : > { %v6183_v6 = vpack.c.bf16 %v4728_v56, %v4727_v3  ;;  %v4123_v33 = vadd.f32 %v4039_v11, %v3532_v55  ;;  %v3076_v52 = vadd.f32 %v2993_v40, %v7181_v14  ;;  %v4049_v29 = vpop.f32.mrf.mxu3 }
 0x320   : > { %v4499_v51 = vpop.f32.mrf.mxu0  ;;  %6217 = vst [vmem:[%s7290_s30 + $0x68] sm:$0xff] %v6183_v6   ;;  %v4581_v19 = vadd.f32 %v4497_v53, %v4123_v33 }
 0x322   : > { %v4693_v38 = vadd.f32 %v7265_v48, %v4581_v19 }
 0x323   : > { %v3450_v30 = vpop.f32.mrf.mxu2 }
 0x324   : > { %v3533_v57 = vadd.f32 %v3450_v30, %v3076_v52  ;;  %v4729_v37 = vmax.f32 %v4693_v38, 0.0 }
 0x325   : > { %v2996_v15 = vpop.f32.mrf.mxu1 }
 0x326   : > { %v4124_v16 = vadd.f32 %v4041_v21, %v3533_v57  ;;  %v3077_v26 = vadd.f32 %v2996_v15, %v7192_v59  ;;  %v4051_v13 = vpop.f32.mrf.mxu3 }
 0x328   : > { %v4502_v20 = vpop.f32.mrf.mxu0  ;;  %v4582_v4 = vadd.f32 %v4499_v51, %v4124_v16 }
 0x32a   : > { %v4694_v43 = vadd.f32 %v7265_v48, %v4582_v4 }
 0x32b   : > { %v3453_v17 = vpop.f32.mrf.mxu2 }
 0x32c   : > { %v4730_v45 = vmax.f32 %v4694_v43, 0.0  ;;  %v3534_v8 = vadd.f32 %v3453_v17, %v3077_v26 }
 0x32d   : > { %v2998_v14 = vpop.f32.mrf.mxu1 }
 0x32e   : > { %v6188_v0 = vpack.c.bf16 %v4730_v45, %v4729_v37  ;;  %v4125_v27 = vadd.f32 %v4044_v22, %v3534_v8  ;;  %v3078_v28 = vadd.f32 %v2998_v14, %v7201_v7  ;;  %v4054_v62 = vpop.f32.mrf.mxu3 }
 0x330   : > { %v4504_v41 = vpop.f32.mrf.mxu0  ;;  %6218 = vst [vmem:[%s7290_s30 + $0x70] sm:$0xff] %v6188_v0   ;;  %v4583_v39 = vadd.f32 %v4502_v20, %v4125_v27 }
 0x332   : > { %v4695_v59 = vadd.f32 %v7265_v48, %v4583_v39 }
 0x333   : > { %v3455_v31 = vpop.f32.mrf.mxu2 }
 0x334   : > { %v3535_v44 = vadd.f32 %v3455_v31, %v3078_v28  ;;  %v4731_v25 = vmax.f32 %v4695_v59, 0.0 }
 0x335   : > { %v3001_v32 = vpop.f32.mrf.mxu1 }
 0x336   : > { %v4126_v50 = vadd.f32 %v4046_v42, %v3535_v44  ;;  %v3079_v2 = vadd.f32 %v3001_v32, %v7212_v49  ;;  %v6329_v49 = vld [vmem:[%s7553_s2] ss:$0 sm:$0xff] }
 0x338   : > { %v4584_v23 = vadd.f32 %v4504_v41, %v4126_v50  ;;  %v4507_v5 = vpop.f32.mrf.mxu0 }
 0x33a   : > { %v4696_v61 = vadd.f32 %v7265_v48, %v4584_v23 }
 0x33b   : > { %v3458_v1 = vpop.f32.mrf.mxu2 }
 0x33c   : > { %v4732_v58 = vmax.f32 %v4696_v61, 0.0  ;;  %v3536_v11 = vadd.f32 %v3458_v1, %v3079_v2 }
 0x33d   : > { %v3003_v7 = vpop.f32.mrf.mxu1 }
 0x33e   : > { %v6193_v35 = vpack.c.bf16 %v4732_v58, %v4731_v25  ;;  %v4127_v9 = vadd.f32 %v4049_v29, %v3536_v11  ;;  %v3080_v60 = vadd.f32 %v3003_v7, %v7221_v36 }
 0x340   : > { %6219 = vst [vmem:[%s7290_s30 + $0x78] sm:$0xff] %v6193_v35   ;;  %v4509_v34 = vpop.f32.mrf.mxu0  ;;  %v4585_v10 = vadd.f32 %v4507_v5, %v4127_v9 }
 0x342   : > { %v4697_v63 = vadd.f32 %v6329_v49, %v4585_v10 }
 0x343   : > { %v3460_v18 = vpop.f32.mrf.mxu2 }
 0x344   : > { %v3537_v53 = vadd.f32 %v3460_v18, %v3080_v60  ;;  %v4733_v36 = vmax.f32 %v4697_v63, 0.0 }
 0x345   : > { %v3006_v54 = vpop.f32.mrf.mxu1 }
 0x346   : > { %v4128_v48 = vadd.f32 %v4051_v13, %v3537_v53  ;;  %v3081_v46 = vadd.f32 %v3006_v54, %v7232_v12  ;;  %v4056_v12 = vpop.f32.mrf.mxu3 }
 0x348   : > { %v4586_v21 = vadd.f32 %v4509_v34, %v4128_v48  ;;  %v4512_v40 = vpop.f32.mrf.mxu0 }
 0x34a   : > { %v4698_v47 = vadd.f32 %v6329_v49, %v4586_v21 }
 0x34b   : > { %v3463_v3 = vpop.f32.mrf.mxu2 }
 0x34c   : > { %v4734_v56 = vmax.f32 %v4698_v47, 0.0  ;;  %v3538_v55 = vadd.f32 %v3463_v3, %v3081_v46 }
 0x34d   : > { %v3008_v51 = vpop.f32.mrf.mxu1 }
 0x34e   : > { %v6198_v6 = vpack.c.bf16 %v4734_v56, %v4733_v36  ;;  %v4129_v33 = vadd.f32 %v4054_v62, %v3538_v55  ;;  %v3082_v52 = vadd.f32 %v3008_v51, %v7241_v24 }
 0x350   : > { %6220 = vst [vmem:[%s7290_s30 + $0x80] sm:$0xff] %v6198_v6   ;;  %v4587_v22 = vadd.f32 %v4512_v40, %v4129_v33  ;;  %v4514_v15 = vpop.f32.mrf.mxu0 }
 0x352   : > { %v4699_v16 = vadd.f32 %v6329_v49, %v4587_v22 }
 0x353   : > { %v3465_v30 = vpop.f32.mrf.mxu2 }
 0x354   : > { %v3539_v19 = vadd.f32 %v3465_v30, %v3082_v52  ;;  %v4735_v24 = vmax.f32 %v4699_v16, 0.0 }
 0x356   : > { %v4130_v57 = vadd.f32 %v4056_v12, %v3539_v19 }
 0x358   : > { %v4588_v20 = vadd.f32 %v4514_v15, %v4130_v57 }
 0x35a   : > { %v4700_v38 = vadd.f32 %v6329_v49, %v4588_v20 }
 0x35c   : > { %v4736_v4 = vmax.f32 %v4700_v38, 0.0 }
 0x35e   : > { %v6203_v43 = vpack.c.bf16 %v4736_v4, %v4735_v24 }
 0x360   : > { %6221 = vst [vmem:[%s7290_s30 + $0x88] sm:$0xff] %v6203_v43  }
 0x361   : > { %6417 = shalt.err (!%p6414_p0)
}
 0x362   : > { %s6481_s6 = smov 64   ;;  %s6482_s30 = smov 4  }
 0x363   : > { %6257 = dma.vmem_to_hbm [thread:$0]  (%p6581_p5), %s4824_s28, 2304, %s4826_s21, %s4810_s15, %s6481_s6, %s6481_s6, %s6482_s30  }
 0x364 PF: > { %s4840_s4 = sand.u32 1, %s6456_s12   ;;  %p6268_p3 = pnand %p4938_p11, %p6552_p6 }
 0x365   : > { %s4841_s9 = scalar_lea.sflag [#allocation5], %s4840_s4 }
 0x366   : > { %p6269_p7 = pneg %p6268_p3 }
 0x368   : > { %6451 = dma.done.wait (%p6269_p7), %s4841_s9, 2304  }
 0x369   : > { %6453 = vsyncadd (%p6269_p7), %s4841_s9, 4294964992  ;;  %s20_s17 = sadd.s32 1, %s6476_s17   ;;  %s7577_s12 = smov %s6460_s13 }
 0x36a   : > { %p17_p9 = scmp.ge.s32.totalorder %s20_s17, 4   ;;  %s7578_s13 = smov %s6464_s14 }
 0x36b   : > { %s7579_s14 = smov %s6590_s11  ;;  %s7580_s15 = smov %s6472_s16 }
 0x36c   : > { %s7581_s16 = smov %s7583_s5  ;;  %19 = sbr.rel (!%p17_p9) target bundleno = 7 (0x7), region = 93 }
 0x371   :  { %4847 = vsyncpa [#allocation4], 1 }
 0x372   :  { %4849 = vsyncpa [#allocation4 + $0x1], 1 }
 0x373   :  { %4850 = vsyncpa [#allocation7], 1 }
 0x374   :  { %4851 = vsyncpa [#allocation5], 1 }
 0x375   :  { %4853 = vsyncpa [#allocation5 + $0x1], 1 }

</bundles_post_ra>
